<compile_context>
chip_gen: v6e
topology: v6e:2x2x1
jax: 0.10.0
libtpu: 0.0.40
codegen_flags: <defaults>
</compile_context>

<pallas_src>
import functools

import jax
import jax.numpy as jnp
from jax.experimental import pallas as pl
from jax.experimental.pallas import tpu as pltpu

_EPS = 1e-5          # nn.BatchNorm2d default eps
_NEG_SLOPE = 0.1     # nn.LeakyReLU(negative_slope=0.1)
_VMEM_LIMIT = 48 * 1024 * 1024   # comfortably below v7x's 64 MiB physical VMEM


# ---------------------------------------------------------------------------
# helpers
# ---------------------------------------------------------------------------
def _cparams(*sem):
    return pltpu.CompilerParams(dimension_semantics=sem,
                                vmem_limit_bytes=_VMEM_LIMIT)


def _row_tile(rows):
    """Largest tile in {512..8} that divides `rows` and leaves >= 2 tiles."""
    for t in (512, 256, 128, 64, 32, 16, 8):
        if rows % t == 0 and rows // t >= 2:
            return t
    return rows


def _fold_factor(m, c):
    """Fold (m, c) -> (m/f, f*c): lane-dense last dim (free contiguous reshape)."""
    f = 1
    while (m % (2 * f) == 0) and (2 * f * c <= 512) and (m // (2 * f) >= 8):
        f *= 2
    return f


# ---------------------------------------------------------------------------
# Pallas kernels
# ---------------------------------------------------------------------------
def _gemm_stats_kernel(x_ref, w_ref, b_ref, y_ref, s1_ref, s2_ref):
    """(tm, K) @ (K, C) + bias; accumulate per-channel sum / sum-of-squares."""
    @pl.when(pl.program_id(0) == 0)
    def _():
        s1_ref[...] = jnp.zeros_like(s1_ref)
        s2_ref[...] = jnp.zeros_like(s2_ref)

    y = jnp.dot(x_ref[...], w_ref[...], preferred_element_type=jnp.float32)
    y = y + b_ref[...]
    y_ref[...] = y
    s1_ref[...] += jnp.sum(y, axis=0, keepdims=True)
    s2_ref[...] += jnp.sum(y * y, axis=0, keepdims=True)


def _gemm_kernel(x_ref, w_ref, b_ref, y_ref):
    """Plain (tm, K) @ (K, C) + bias (final 1x1 conv, no BN / act)."""
    y = jnp.dot(x_ref[...], w_ref[...], preferred_element_type=jnp.float32)
    y_ref[...] = (y + b_ref[...]).astype(y_ref.dtype)


def _bn_apply_kernel(has_res, x_ref, sc_ref, sh_ref, *rest):
    """y*scale + shift, LeakyReLU, optional fused residual add (lane-dense)."""
    if has_res:
        r_ref, o_ref = rest
    else:
        (o_ref,) = rest
    y = x_ref[...] * sc_ref[...] + sh_ref[...]
    y = jnp.where(y > 0, y, _NEG_SLOPE * y)
    if has_res:
        y = y + r_ref[...]
    o_ref[...] = y.astype(o_ref.dtype)


def _stats_kernel(x_ref, s1_ref, s2_ref):
    """Accumulate column sum / sum-of-squares over row tiles (for bn0)."""
    @pl.when(pl.program_id(0) == 0)
    def _():
        s1_ref[...] = jnp.zeros_like(s1_ref)
        s2_ref[...] = jnp.zeros_like(s2_ref)
    x = x_ref[...]
    s1_ref[...] += jnp.sum(x, axis=0, keepdims=True)
    s2_ref[...] += jnp.sum(x * x, axis=0, keepdims=True)


def _upsample2x_kernel(x_ref, ee_ref, eo_ref, oe_ref, oo_ref):
    """Bilinear x2 (align_corners=False), H and W fused in one pass.

    out[2k]   = 0.25*x[k-1] + 0.75*x[k]   (clamped at borders)
    out[2k+1] = 0.75*x[k]   + 0.25*x[k+1] (clamped at borders)
    Emits the four (H-parity, W-parity) planes; interleave is glue-side.
    """
    x = x_ref[...]                                   # (1, H, W, C)
    h, w = x.shape[1], x.shape[2]
    xm = jnp.concatenate([x[:, :1], x[:, :h - 1]], axis=1)
    xp = jnp.concatenate([x[:, 1:], x[:, h - 1:]], axis=1)
    ev = 0.25 * xm + 0.75 * x                        # even output rows
    od = 0.75 * x + 0.25 * xp                        # odd output rows

    def wdir(t):
        tl = jnp.concatenate([t[:, :, :1], t[:, :, :w - 1]], axis=2)
        tr = jnp.concatenate([t[:, :, 1:], t[:, :, w - 1:]], axis=2)
        return 0.25 * tl + 0.75 * t, 0.75 * t + 0.25 * tr

    ee, eo = wdir(ev)
    oe, oo = wdir(od)
    ee_ref[...] = ee
    eo_ref[...] = eo
    oe_ref[...] = oe
    oo_ref[...] = oo


# ---------------------------------------------------------------------------
# Pallas wrappers
# ---------------------------------------------------------------------------
def _gemm_stats(x, w, b):
    m, k = x.shape
    c = w.shape[1]
    tm = _row_tile(m)
    return pl.pallas_call(
        _gemm_stats_kernel,
        out_shape=(jax.ShapeDtypeStruct((m, c), jnp.float32),
                   jax.ShapeDtypeStruct((1, c), jnp.float32),
                   jax.ShapeDtypeStruct((1, c), jnp.float32)),
        grid=(m // tm,),
        in_specs=[pl.BlockSpec((tm, k), lambda i: (i, 0)),
                  pl.BlockSpec((k, c), lambda i: (0, 0)),
                  pl.BlockSpec((1, c), lambda i: (0, 0))],
        out_specs=(pl.BlockSpec((tm, c), lambda i: (i, 0)),
                   pl.BlockSpec((1, c), lambda i: (0, 0)),
                   pl.BlockSpec((1, c), lambda i: (0, 0))),
        compiler_params=_cparams("arbitrary"),   # stats outputs are revisited
    )(x, w, b)


def _gemm(x, w, b):
    m, k = x.shape
    c = w.shape[1]
    tm = _row_tile(m)
    return pl.pallas_call(
        _gemm_kernel,
        out_shape=jax.ShapeDtypeStruct((m, c), jnp.float32),
        grid=(m // tm,),
        in_specs=[pl.BlockSpec((tm, k), lambda i: (i, 0)),
                  pl.BlockSpec((k, c), lambda i: (0, 0)),
                  pl.BlockSpec((1, c), lambda i: (0, 0))],
        out_specs=pl.BlockSpec((tm, c), lambda i: (i, 0)),
        compiler_params=_cparams("parallel"),
    )(x, w, b)


def _bn_apply(y, sc, sh, res=None):
    """Apply per-channel affine + LeakyReLU (+ residual) on a folded view."""
    m, c = y.shape
    f = _fold_factor(m, c)
    rows, lanes = m // f, f * c
    tm = _row_tile(rows)
    args = [y.reshape(rows, lanes), jnp.tile(sc, (1, f)), jnp.tile(sh, (1, f))]
    in_specs = [pl.BlockSpec((tm, lanes), lambda i: (i, 0)),
                pl.BlockSpec((1, lanes), lambda i: (0, 0)),
                pl.BlockSpec((1, lanes), lambda i: (0, 0))]
    if res is not None:
        args.append(res.reshape(rows, lanes))
        in_specs.append(pl.BlockSpec((tm, lanes), lambda i: (i, 0)))
    out = pl.pallas_call(
        functools.partial(_bn_apply_kernel, res is not None),
        out_shape=jax.ShapeDtypeStruct((rows, lanes), jnp.float32),
        grid=(rows // tm,),
        in_specs=in_specs,
        out_specs=pl.BlockSpec((tm, lanes), lambda i: (i, 0)),
        compiler_params=_cparams("parallel"),
    )(*args)
    return out.reshape(m, c)


def _channel_stats(x_nhwc):
    """Per-channel (biased) mean/var of an NHWC tensor via a tiled Pallas pass."""
    n, h, w, c = x_nhwc.shape
    m = n * h * w
    f = _fold_factor(m, c)
    rows, lanes = m // f, f * c
    tm = _row_tile(rows)
    s1, s2 = pl.pallas_call(
        _stats_kernel,
        out_shape=(jax.ShapeDtypeStruct((1, lanes), jnp.float32),
                   jax.ShapeDtypeStruct((1, lanes), jnp.float32)),
        grid=(rows // tm,),
        in_specs=[pl.BlockSpec((tm, lanes), lambda i: (i, 0))],
        out_specs=(pl.BlockSpec((1, lanes), lambda i: (0, 0)),
                   pl.BlockSpec((1, lanes), lambda i: (0, 0))),
        compiler_params=_cparams("arbitrary"),
    )(x_nhwc.reshape(rows, lanes))
    s1 = s1.reshape(f, c).sum(axis=0)
    s2 = s2.reshape(f, c).sum(axis=0)
    mean = s1 / m
    var = jnp.maximum(s2 / m - mean * mean, 0.0)   # guard f32 cancellation
    return mean, var


def _upsample2x_bilinear(x):
    """NHWC bilinear x2 upsample, align_corners=False (matches nn.Upsample)."""
    n, h, w, c = x.shape
    blk = pl.BlockSpec((1, h, w, c), lambda i: (i, 0, 0, 0))
    ee, eo, oe, oo = pl.pallas_call(
        _upsample2x_kernel,
        out_shape=tuple(jax.ShapeDtypeStruct((n, h, w, c), x.dtype)
                        for _ in range(4)),
        grid=(n,),
        in_specs=[blk],
        out_specs=(blk, blk, blk, blk),
        compiler_params=_cparams("parallel"),
    )(x)
    # interleave parities -> (n, h, 2, w, 2, c); final reshape is a contiguous
    # merge (no transpose), so out[n, 2h+ph, 2w+pw, c] lands correctly.
    e = jnp.stack([ee, eo], axis=3)
    o = jnp.stack([oe, oo], axis=3)
    y = jnp.stack([e, o], axis=2)
    return y.reshape(n, 2 * h, 2 * w, c)


# ---------------------------------------------------------------------------
# Conv / BN building blocks (im2col glue + Pallas GEMM / BN passes)
# ---------------------------------------------------------------------------
def _im2col(x, kh, kw, stride, pad, scale=None, shift=None):
    """NHWC -> (N*Ho*Wo, kh*kw*C).  Optional per-channel affine (folded BN)
    is applied to x BEFORE zero padding (exactly BN -> Conv order)."""
    n, h, w, c = x.shape
    if scale is not None:
        x = x * scale.reshape(1, 1, 1, c) + shift.reshape(1, 1, 1, c)
    if kh == 1 and kw == 1 and stride == 1 and pad == 0:
        return x.reshape(n * h * w, c), (n, h, w)       # 1x1 conv: free reshape
    xp = jnp.pad(x, ((0, 0), (pad, pad), (pad, pad), (0, 0)))
    ho = (h + 2 * pad - kh) // stride + 1
    wo = (w + 2 * pad - kw) // stride + 1
    cols = []
    for i in range(kh):
        for j in range(kw):
            cols.append(xp[:, i:i + stride * (ho - 1) + 1:stride,
                           j:j + stride * (wo - 1) + 1:stride, :])
    cols = jnp.concatenate(cols, axis=-1)               # (N, Ho, Wo, kh*kw*C)
    return cols.reshape(n * ho * wo, kh * kw * c), (n, ho, wo)


def conv_bn_act(x, conv_p, bn_p, stride, pad, pre_affine=None, residual=None):
    """Conv (+bias) [+ training-mode BN + LeakyReLU (+ fused residual add)]."""
    kh, kw, cin, cout = conv_p["w"].shape
    scale, shift = pre_affine if pre_affine is not None else (None, None)
    cols, (n, ho, wo) = _im2col(x, kh, kw, stride, pad, scale, shift)
    m = n * ho * wo
    cols = cols.astype(jnp.bfloat16)                    # halve GEMM DMA bytes
    w2 = conv_p["w"].reshape(kh * kw * cin, cout).astype(jnp.bfloat16)
    b = conv_p["b"].reshape(1, cout).astype(jnp.float32)
    if bn_p is None:
        y = _gemm(cols, w2, b)
        return y.reshape(n, ho, wo, cout)
    y, s1, s2 = _gemm_stats(cols, w2, b)
    mean = s1 / m
    var = jnp.maximum(s2 / m - mean * mean, 0.0)
    inv = jax.lax.rsqrt(var + _EPS)
    sc = bn_p["gamma"].reshape(1, cout) * inv
    sh = bn_p["beta"].reshape(1, cout) - mean * sc
    res = None if residual is None else residual.reshape(m, cout)
    out = _bn_apply(y, sc, sh, res)
    return out.reshape(n, ho, wo, cout)


def _bn_fold_affine(x, bn_p):
    """Standalone training-mode BN expressed as a per-channel affine."""
    mean, var = _channel_stats(x)
    scale = bn_p["gamma"] * jax.lax.rsqrt(var + _EPS)
    shift = bn_p["beta"] - mean * scale
    return scale, shift


# ---------------------------------------------------------------------------
# DIPNet parameters + forward (mirrors the PyTorch module structure)
# ---------------------------------------------------------------------------
def init_dipnet_params(key, nu, ku, nd, kd, ns, ks, d_in):
    assert len(nu) == len(ku) == len(ns) == len(ks) == len(nd) == len(kd)
    n = len(nu)
    c_in = d_in[1]

    def conv_p(key, cin, cout, k):
        k1, k2 = jax.random.split(key)
        scale = 1.0 / float(cin * k * k) ** 0.5
        return {"w": jax.random.normal(k1, (k, k, cin, cout), jnp.float32) * scale,
                "b": jax.random.normal(k2, (cout,), jnp.float32) * 0.05}

    def bn_p(cout):  # PyTorch default BN init: weight=1, bias=0
        return {"gamma": jnp.ones((cout,), jnp.float32),
                "beta": jnp.zeros((cout,), jnp.float32)}

    encoders, prev = [], c_in
    for i in range(n):
        key, k1, k2 = jax.random.split(key, 3)
        encoders.append({"conv1": conv_p(k1, prev, nd[i], kd[i]), "bn1": bn_p(nd[i]),
                         "conv2": conv_p(k2, nd[i], nd[i], kd[i]), "bn2": bn_p(nd[i])})
        prev = nd[i]

    skips = []
    for i in range(n):
        if ns[i] != 0:
            key, k1 = jax.random.split(key)
            skips.append({"conv": conv_p(k1, nd[i], ns[i], ks[i]), "bn": bn_p(ns[i])})
        else:
            skips.append(None)

    def up_p(key, cin, cout, k):
        k1, k2 = jax.random.split(key)
        # "convt" stores the Conv2d-equivalent (flipped/transposed) weight of
        # the stride-1 ConvTranspose2d; identical math, synthetic init.
        return {"bn0": bn_p(cin),
                "convt": conv_p(k1, cin, cout, k), "bn1": bn_p(cout),
                "conv1x1": conv_p(k2, cout, cout, 1), "bn2": bn_p(cout)}

    decoders = []
    for i in range(n - 1):
        key, k1 = jax.random.split(key)
        decoders.append(up_p(k1, nd[i + 1], nd[i], ku[i]))
    key, k1 = jax.random.split(key)
    decoders.append(up_p(k1, nu[n - 1], nu[n - 1], ku[n - 1]))
    decoders.reverse()
    skips.reverse()

    key, k1 = jax.random.split(key)
    final = conv_p(k1, nu[0], 3, 1)
    return {"enc": encoders, "skip": skips, "dec": decoders, "final": final}


def dipnet_forward(params, x_nchw):
    x = jnp.transpose(x_nchw, (0, 2, 3, 1)).astype(jnp.float32)   # -> NHWC

    # ---- encoder ----
    skip_outs = [None]
    for lp in params["enc"]:
        k = lp["conv1"]["w"].shape[0]
        x = conv_bn_act(x, lp["conv1"], lp["bn1"], stride=2, pad=k // 2)
        x = conv_bn_act(x, lp["conv2"], lp["bn2"], stride=1, pad=k // 2)
        skip_outs.append(x)
    skip_outs = skip_outs[:-1]

    # ---- decoder ----
    for idx, dp in enumerate(params["dec"]):
        k = dp["convt"]["w"].shape[0]
        # bn0: Pallas stats pass; the affine is folded (exactly) into the
        # convtranspose's im2col, before zero padding.
        aff = _bn_fold_affine(x, dp["bn0"])
        # ConvTranspose2d(stride=1, padding=k//2) == flipped-weight Conv2d
        # with padding k-1-k//2 (equals k//2 for odd k).
        x = conv_bn_act(x, dp["convt"], dp["bn1"], stride=1,
                        pad=k - 1 - k // 2, pre_affine=aff)
        x = conv_bn_act(x, dp["conv1x1"], dp["bn2"], stride=1, pad=0)
        x = _upsample2x_bilinear(x)

        sp = params["skip"][idx]
        s_in = skip_outs[-(idx + 1)]
        if (sp is not None) and (s_in is not None):
            ksk = sp["conv"]["w"].shape[0]
            rf = x.shape[-1] // sp["conv"]["w"].shape[-1]
            # fold torch's channel-wise .repeat into the skip conv/BN params
            conv_rep = {"w": jnp.tile(sp["conv"]["w"], (1, 1, 1, rf)),
                        "b": jnp.tile(sp["conv"]["b"], (rf,))}
            bn_rep = {"gamma": jnp.tile(sp["bn"]["gamma"], (rf,)),
                      "beta": jnp.tile(sp["bn"]["beta"], (rf,))}
            # fused: x = x + leakyrelu(bn(conv(s_in)))  (residual add in-kernel)
            x = conv_bn_act(s_in, conv_rep, bn_rep, stride=1, pad=ksk // 2,
                            residual=x)

    x = conv_bn_act(x, params["final"], None, stride=1, pad=0)
    return jnp.transpose(x, (0, 3, 1, 2))               # -> NCHW (N, 3, H, W)


if __name__ == "__main__":
    key = jax.random.PRNGKey(0)
    # Small config: n = 2 levels, 4 input channels, 16x16 spatial, batch 2.
    nu = [8, 8]; ku = [3, 3]
    nd = [8, 8]; kd = [3, 3]
    ns = [4, 4]; ks = [1, 1]
    d_in = (2, 4, 16, 16)

    pkey, xkey = jax.random.split(key)
    params = init_dipnet_params(pkey, nu, ku, nd, kd, ns, ks, d_in)
    x = jax.random.normal(xkey, d_in, jnp.float32)   # NCHW, like the PyTorch module

    fwd = jax.jit(dipnet_forward)
    out = fwd(params, x)
    jax.block_until_ready(out)
    assert out.shape == (2, 3, 16, 16), out.shape
    assert out.dtype == jnp.float32
    print("KERNEL_OK")
</pallas_src>

<mosaic_0001>
module attributes {stable_mosaic.version = 11 : i64} {
  func.func @_gemm_stats_kernel(%arg0: i32, %arg1: memref<64x36xbf16, #tpu.memory_space<vmem>>, %arg2: memref<36x8xbf16, #tpu.memory_space<vmem>>, %arg3: memref<1x8xf32, #tpu.memory_space<vmem>>, %arg4: memref<64x8xf32, #tpu.memory_space<vmem>>, %arg5: memref<1x8xf32, #tpu.memory_space<vmem>>, %arg6: memref<1x8xf32, #tpu.memory_space<vmem>>) attributes {dimension_semantics = [#tpu.dimension_semantics<arbitrary>], iteration_bounds = array<i64: 2>, scalar_prefetch = 0 : i64, scratch_operands = 0 : i64, tpu.core_type = #tpu.core_type<tc>, window_params = [{transform_indices = @transform_0, window_bounds = array<i64: 64, 36>}, {pipeline_mode = #tpu.pipeline_mode<synchronous>, transform_indices = @transform_1, window_bounds = array<i64: 36, 8>}, {pipeline_mode = #tpu.pipeline_mode<synchronous>, transform_indices = @transform_2, window_bounds = array<i64: 1, 8>}, {transform_indices = @transform_3, window_bounds = array<i64: 64, 8>}, {pipeline_mode = #tpu.pipeline_mode<synchronous>, transform_indices = @transform_4, window_bounds = array<i64: 1, 8>}, {pipeline_mode = #tpu.pipeline_mode<synchronous>, transform_indices = @transform_5, window_bounds = array<i64: 1, 8>}]} {
    %c0_i32 = arith.constant 0 : i32
    %0 = arith.cmpi eq, %arg0, %c0_i32 : i32
    %1 = arith.extui %0 : i1 to i32
    %c0_i32_0 = arith.constant 0 : i32
    %2 = arith.cmpi ne, %1, %c0_i32_0 : i32
    scf.if %2 {
      %cst_18 = arith.constant 0.000000e+00 : f32
      %21 = vector.broadcast %cst_18 : f32 to vector<1x8xf32>
      %c0_19 = arith.constant 0 : index
      %c0_20 = arith.constant 0 : index
      %22 = vector.load %arg5[%c0_19, %c0_20] : memref<1x8xf32, #tpu.memory_space<vmem>>, vector<1x8xf32>
      tpu.vector_store %arg5[%c0_19, %c0_20], %21 {strides = array<i32>} : memref<1x8xf32, #tpu.memory_space<vmem>>, vector<1x8xf32>,
      %cst_21 = arith.constant 0.000000e+00 : f32
      %23 = vector.broadcast %cst_21 : f32 to vector<1x8xf32>
      %c0_22 = arith.constant 0 : index
      %c0_23 = arith.constant 0 : index
      %24 = vector.load %arg6[%c0_22, %c0_23] : memref<1x8xf32, #tpu.memory_space<vmem>>, vector<1x8xf32>
      tpu.vector_store %arg6[%c0_22, %c0_23], %23 {strides = array<i32>} : memref<1x8xf32, #tpu.memory_space<vmem>>, vector<1x8xf32>,
    } else {
    }
    %c0 = arith.constant 0 : index
    %c0_1 = arith.constant 0 : index
    %3 = vector.load %arg1[%c0, %c0_1] : memref<64x36xbf16, #tpu.memory_space<vmem>>, vector<64x36xbf16>
    %c0_2 = arith.constant 0 : index
    %c0_3 = arith.constant 0 : index
    %4 = vector.load %arg2[%c0_2, %c0_3] : memref<36x8xbf16, #tpu.memory_space<vmem>>, vector<36x8xbf16>
    %cst = arith.constant dense<0.000000e+00> : vector<64x8xf32>
    %5 = tpu.matmul %3, %4, %cst {dimension_numbers = #tpu.dot_dimension_numbers<[1], [0], [0], [1], [0, 0, 1, 1], [], []>} : vector<64x36xbf16>, vector<36x8xbf16>, vector<64x8xf32> -> vector<64x8xf32>
    %c0_4 = arith.constant 0 : index
    %c0_5 = arith.constant 0 : index
    %6 = vector.load %arg3[%c0_4, %c0_5] : memref<1x8xf32, #tpu.memory_space<vmem>>, vector<1x8xf32>
    %7 = vector.broadcast %6 : vector<1x8xf32> to vector<64x8xf32>
    %8 = arith.addf %5, %7 : vector<64x8xf32>
    %c0_6 = arith.constant 0 : index
    %c0_7 = arith.constant 0 : index
    %9 = vector.load %arg4[%c0_6, %c0_7] : memref<64x8xf32, #tpu.memory_space<vmem>>, vector<64x8xf32>
    tpu.vector_store %arg4[%c0_6, %c0_7], %8 {strides = array<i32>} : memref<64x8xf32, #tpu.memory_space<vmem>>, vector<64x8xf32>,
    %c0_8 = arith.constant 0 : index
    %c0_9 = arith.constant 0 : index
    %10 = vector.load %arg5[%c0_8, %c0_9] : memref<1x8xf32, #tpu.memory_space<vmem>>, vector<1x8xf32>
    %cst_10 = arith.constant dense<0.000000e+00> : vector<8xf32>
    %11 = vector.multi_reduction <add>, %8, %cst_10 [0] : vector<64x8xf32> to vector<8xf32>
    %12 = vector.shape_cast %11 : vector<8xf32> to vector<1x8xf32>
    %13 = arith.addf %10, %12 : vector<1x8xf32>
    %c0_11 = arith.constant 0 : index
    %c0_12 = arith.constant 0 : index
    %14 = vector.load %arg5[%c0_11, %c0_12] : memref<1x8xf32, #tpu.memory_space<vmem>>, vector<1x8xf32>
    tpu.vector_store %arg5[%c0_11, %c0_12], %13 {strides = array<i32>} : memref<1x8xf32, #tpu.memory_space<vmem>>, vector<1x8xf32>,
    %c0_13 = arith.constant 0 : index
    %c0_14 = arith.constant 0 : index
    %15 = vector.load %arg6[%c0_13, %c0_14] : memref<1x8xf32, #tpu.memory_space<vmem>>, vector<1x8xf32>
    %16 = arith.mulf %8, %8 : vector<64x8xf32>
    %cst_15 = arith.constant dense<0.000000e+00> : vector<8xf32>
    %17 = vector.multi_reduction <add>, %16, %cst_15 [0] : vector<64x8xf32> to vector<8xf32>
    %18 = vector.shape_cast %17 : vector<8xf32> to vector<1x8xf32>
    %19 = arith.addf %15, %18 : vector<1x8xf32>
    %c0_16 = arith.constant 0 : index
    %c0_17 = arith.constant 0 : index
    %20 = vector.load %arg6[%c0_16, %c0_17] : memref<1x8xf32, #tpu.memory_space<vmem>>, vector<1x8xf32>
    tpu.vector_store %arg6[%c0_16, %c0_17], %19 {strides = array<i32>} : memref<1x8xf32, #tpu.memory_space<vmem>>, vector<1x8xf32>,
    return
  }
  func.func @transform_0(%arg0: i32) -> (i32, i32) {
    %c0_i32 = arith.constant 0 : i32
    %c0_i32_0 = arith.constant 0 : i32
    return %arg0, %c0_i32 : i32, i32
  }
  func.func @transform_1(%arg0: i32) -> (i32, i32) {
    %c0_i32 = arith.constant 0 : i32
    %c0_i32_0 = arith.constant 0 : i32
    %c0_i32_1 = arith.constant 0 : i32
    return %c0_i32, %c0_i32_0 : i32, i32
  }
  func.func @transform_2(%arg0: i32) -> (i32, i32) {
    %c0_i32 = arith.constant 0 : i32
    %c0_i32_0 = arith.constant 0 : i32
    %c0_i32_1 = arith.constant 0 : i32
    return %c0_i32, %c0_i32_0 : i32, i32
  }
  func.func @transform_3(%arg0: i32) -> (i32, i32) {
    %c0_i32 = arith.constant 0 : i32
    %c0_i32_0 = arith.constant 0 : i32
    return %arg0, %c0_i32 : i32, i32
  }
  func.func @transform_4(%arg0: i32) -> (i32, i32) {
    %c0_i32 = arith.constant 0 : i32
    %c0_i32_0 = arith.constant 0 : i32
    %c0_i32_1 = arith.constant 0 : i32
    return %c0_i32, %c0_i32_0 : i32, i32
  }
  func.func @transform_5(%arg0: i32) -> (i32, i32) {
    %c0_i32 = arith.constant 0 : i32
    %c0_i32_0 = arith.constant 0 : i32
    %c0_i32_1 = arith.constant 0 : i32
    return %c0_i32, %c0_i32_0 : i32, i32
  }
}

module attributes {stable_mosaic.version = 11 : i64} {
  func.func @_bn_apply_kernel(%arg0: i32, %arg1: memref<8x128xf32, #tpu.memory_space<vmem>>, %arg2: memref<1x128xf32, #tpu.memory_space<vmem>>, %arg3: memref<1x128xf32, #tpu.memory_space<vmem>>, %arg4: memref<8x128xf32, #tpu.memory_space<vmem>>) attributes {dimension_semantics = [#tpu.dimension_semantics<parallel>], iteration_bounds = array<i64: 1>, scalar_prefetch = 0 : i64, scratch_operands = 0 : i64, tpu.core_type = #tpu.core_type<tc>, window_params = [{transform_indices = @transform_0, window_bounds = array<i64: 8, 128>}, {pipeline_mode = #tpu.pipeline_mode<synchronous>, transform_indices = @transform_1, window_bounds = array<i64: 1, 128>}, {pipeline_mode = #tpu.pipeline_mode<synchronous>, transform_indices = @transform_2, window_bounds = array<i64: 1, 128>}, {transform_indices = @transform_3, window_bounds = array<i64: 8, 128>}]} {
    %c0 = arith.constant 0 : index
    %c0_0 = arith.constant 0 : index
    %0 = vector.load %arg1[%c0, %c0_0] : memref<8x128xf32, #tpu.memory_space<vmem>>, vector<8x128xf32>
    %c0_1 = arith.constant 0 : index
    %c0_2 = arith.constant 0 : index
    %1 = vector.load %arg2[%c0_1, %c0_2] : memref<1x128xf32, #tpu.memory_space<vmem>>, vector<1x128xf32>
    %2 = vector.broadcast %1 : vector<1x128xf32> to vector<8x128xf32>
    %3 = arith.mulf %0, %2 : vector<8x128xf32>
    %c0_3 = arith.constant 0 : index
    %c0_4 = arith.constant 0 : index
    %4 = vector.load %arg3[%c0_3, %c0_4] : memref<1x128xf32, #tpu.memory_space<vmem>>, vector<1x128xf32>
    %5 = vector.broadcast %4 : vector<1x128xf32> to vector<8x128xf32>
    %6 = arith.addf %3, %5 : vector<8x128xf32>
    %cst = arith.constant 0.000000e+00 : f32
    %7 = vector.broadcast %cst : f32 to vector<8x128xf32>
    %8 = arith.cmpf ogt, %6, %7 : vector<8x128xf32>
    %cst_5 = arith.constant 1.000000e-01 : f32
    %9 = vector.broadcast %cst_5 : f32 to vector<8x128xf32>
    %10 = arith.mulf %9, %6 : vector<8x128xf32>
    %11 = arith.select %8, %6, %10 : vector<8x128xi1>, vector<8x128xf32>
    %c0_6 = arith.constant 0 : index
    %c0_7 = arith.constant 0 : index
    %12 = vector.load %arg4[%c0_6, %c0_7] : memref<8x128xf32, #tpu.memory_space<vmem>>, vector<8x128xf32>
    tpu.vector_store %arg4[%c0_6, %c0_7], %11 {strides = array<i32>} : memref<8x128xf32, #tpu.memory_space<vmem>>, vector<8x128xf32>,
    return
  }
  func.func @transform_0(%arg0: i32) -> (i32, i32) {
    %c0_i32 = arith.constant 0 : i32
    %c0_i32_0 = arith.constant 0 : i32
    return %arg0, %c0_i32 : i32, i32
  }
  func.func @transform_1(%arg0: i32) -> (i32, i32) {
    %c0_i32 = arith.constant 0 : i32
    %c0_i32_0 = arith.constant 0 : i32
    %c0_i32_1 = arith.constant 0 : i32
    return %c0_i32, %c0_i32_0 : i32, i32
  }
  func.func @transform_2(%arg0: i32) -> (i32, i32) {
    %c0_i32 = arith.constant 0 : i32
    %c0_i32_0 = arith.constant 0 : i32
    %c0_i32_1 = arith.constant 0 : i32
    return %c0_i32, %c0_i32_0 : i32, i32
  }
  func.func @transform_3(%arg0: i32) -> (i32, i32) {
    %c0_i32 = arith.constant 0 : i32
    %c0_i32_0 = arith.constant 0 : i32
    return %arg0, %c0_i32 : i32, i32
  }
}

module attributes {stable_mosaic.version = 11 : i64} {
  func.func @_gemm_stats_kernel(%arg0: i32, %arg1: memref<64x72xbf16, #tpu.memory_space<vmem>>, %arg2: memref<72x8xbf16, #tpu.memory_space<vmem>>, %arg3: memref<1x8xf32, #tpu.memory_space<vmem>>, %arg4: memref<64x8xf32, #tpu.memory_space<vmem>>, %arg5: memref<1x8xf32, #tpu.memory_space<vmem>>, %arg6: memref<1x8xf32, #tpu.memory_space<vmem>>) attributes {dimension_semantics = [#tpu.dimension_semantics<arbitrary>], iteration_bounds = array<i64: 2>, scalar_prefetch = 0 : i64, scratch_operands = 0 : i64, tpu.core_type = #tpu.core_type<tc>, window_params = [{transform_indices = @transform_0, window_bounds = array<i64: 64, 72>}, {pipeline_mode = #tpu.pipeline_mode<synchronous>, transform_indices = @transform_1, window_bounds = array<i64: 72, 8>}, {pipeline_mode = #tpu.pipeline_mode<synchronous>, transform_indices = @transform_2, window_bounds = array<i64: 1, 8>}, {transform_indices = @transform_3, window_bounds = array<i64: 64, 8>}, {pipeline_mode = #tpu.pipeline_mode<synchronous>, transform_indices = @transform_4, window_bounds = array<i64: 1, 8>}, {pipeline_mode = #tpu.pipeline_mode<synchronous>, transform_indices = @transform_5, window_bounds = array<i64: 1, 8>}]} {
    %c0_i32 = arith.constant 0 : i32
    %0 = arith.cmpi eq, %arg0, %c0_i32 : i32
    %1 = arith.extui %0 : i1 to i32
    %c0_i32_0 = arith.constant 0 : i32
    %2 = arith.cmpi ne, %1, %c0_i32_0 : i32
    scf.if %2 {
      %cst_18 = arith.constant 0.000000e+00 : f32
      %21 = vector.broadcast %cst_18 : f32 to vector<1x8xf32>
      %c0_19 = arith.constant 0 : index
      %c0_20 = arith.constant 0 : index
      %22 = vector.load %arg5[%c0_19, %c0_20] : memref<1x8xf32, #tpu.memory_space<vmem>>, vector<1x8xf32>
      tpu.vector_store %arg5[%c0_19, %c0_20], %21 {strides = array<i32>} : memref<1x8xf32, #tpu.memory_space<vmem>>, vector<1x8xf32>,
      %cst_21 = arith.constant 0.000000e+00 : f32
      %23 = vector.broadcast %cst_21 : f32 to vector<1x8xf32>
      %c0_22 = arith.constant 0 : index
      %c0_23 = arith.constant 0 : index
      %24 = vector.load %arg6[%c0_22, %c0_23] : memref<1x8xf32, #tpu.memory_space<vmem>>, vector<1x8xf32>
      tpu.vector_store %arg6[%c0_22, %c0_23], %23 {strides = array<i32>} : memref<1x8xf32, #tpu.memory_space<vmem>>, vector<1x8xf32>,
    } else {
    }
    %c0 = arith.constant 0 : index
    %c0_1 = arith.constant 0 : index
    %3 = vector.load %arg1[%c0, %c0_1] : memref<64x72xbf16, #tpu.memory_space<vmem>>, vector<64x72xbf16>
    %c0_2 = arith.constant 0 : index
    %c0_3 = arith.constant 0 : index
    %4 = vector.load %arg2[%c0_2, %c0_3] : memref<72x8xbf16, #tpu.memory_space<vmem>>, vector<72x8xbf16>
    %cst = arith.constant dense<0.000000e+00> : vector<64x8xf32>
    %5 = tpu.matmul %3, %4, %cst {dimension_numbers = #tpu.dot_dimension_numbers<[1], [0], [0], [1], [0, 0, 1, 1], [], []>} : vector<64x72xbf16>, vector<72x8xbf16>, vector<64x8xf32> -> vector<64x8xf32>
    %c0_4 = arith.constant 0 : index
    %c0_5 = arith.constant 0 : index
    %6 = vector.load %arg3[%c0_4, %c0_5] : memref<1x8xf32, #tpu.memory_space<vmem>>, vector<1x8xf32>
    %7 = vector.broadcast %6 : vector<1x8xf32> to vector<64x8xf32>
    %8 = arith.addf %5, %7 : vector<64x8xf32>
    %c0_6 = arith.constant 0 : index
    %c0_7 = arith.constant 0 : index
    %9 = vector.load %arg4[%c0_6, %c0_7] : memref<64x8xf32, #tpu.memory_space<vmem>>, vector<64x8xf32>
    tpu.vector_store %arg4[%c0_6, %c0_7], %8 {strides = array<i32>} : memref<64x8xf32, #tpu.memory_space<vmem>>, vector<64x8xf32>,
    %c0_8 = arith.constant 0 : index
    %c0_9 = arith.constant 0 : index
    %10 = vector.load %arg5[%c0_8, %c0_9] : memref<1x8xf32, #tpu.memory_space<vmem>>, vector<1x8xf32>
    %cst_10 = arith.constant dense<0.000000e+00> : vector<8xf32>
    %11 = vector.multi_reduction <add>, %8, %cst_10 [0] : vector<64x8xf32> to vector<8xf32>
    %12 = vector.shape_cast %11 : vector<8xf32> to vector<1x8xf32>
    %13 = arith.addf %10, %12 : vector<1x8xf32>
    %c0_11 = arith.constant 0 : index
    %c0_12 = arith.constant 0 : index
    %14 = vector.load %arg5[%c0_11, %c0_12] : memref<1x8xf32, #tpu.memory_space<vmem>>, vector<1x8xf32>
    tpu.vector_store %arg5[%c0_11, %c0_12], %13 {strides = array<i32>} : memref<1x8xf32, #tpu.memory_space<vmem>>, vector<1x8xf32>,
    %c0_13 = arith.constant 0 : index
    %c0_14 = arith.constant 0 : index
    %15 = vector.load %arg6[%c0_13, %c0_14] : memref<1x8xf32, #tpu.memory_space<vmem>>, vector<1x8xf32>
    %16 = arith.mulf %8, %8 : vector<64x8xf32>
    %cst_15 = arith.constant dense<0.000000e+00> : vector<8xf32>
    %17 = vector.multi_reduction <add>, %16, %cst_15 [0] : vector<64x8xf32> to vector<8xf32>
    %18 = vector.shape_cast %17 : vector<8xf32> to vector<1x8xf32>
    %19 = arith.addf %15, %18 : vector<1x8xf32>
    %c0_16 = arith.constant 0 : index
    %c0_17 = arith.constant 0 : index
    %20 = vector.load %arg6[%c0_16, %c0_17] : memref<1x8xf32, #tpu.memory_space<vmem>>, vector<1x8xf32>
    tpu.vector_store %arg6[%c0_16, %c0_17], %19 {strides = array<i32>} : memref<1x8xf32, #tpu.memory_space<vmem>>, vector<1x8xf32>,
    return
  }
  func.func @transform_0(%arg0: i32) -> (i32, i32) {
    %c0_i32 = arith.constant 0 : i32
    %c0_i32_0 = arith.constant 0 : i32
    return %arg0, %c0_i32 : i32, i32
  }
  func.func @transform_1(%arg0: i32) -> (i32, i32) {
    %c0_i32 = arith.constant 0 : i32
    %c0_i32_0 = arith.constant 0 : i32
    %c0_i32_1 = arith.constant 0 : i32
    return %c0_i32, %c0_i32_0 : i32, i32
  }
  func.func @transform_2(%arg0: i32) -> (i32, i32) {
    %c0_i32 = arith.constant 0 : i32
    %c0_i32_0 = arith.constant 0 : i32
    %c0_i32_1 = arith.constant 0 : i32
    return %c0_i32, %c0_i32_0 : i32, i32
  }
  func.func @transform_3(%arg0: i32) -> (i32, i32) {
    %c0_i32 = arith.constant 0 : i32
    %c0_i32_0 = arith.constant 0 : i32
    return %arg0, %c0_i32 : i32, i32
  }
  func.func @transform_4(%arg0: i32) -> (i32, i32) {
    %c0_i32 = arith.constant 0 : i32
    %c0_i32_0 = arith.constant 0 : i32
    %c0_i32_1 = arith.constant 0 : i32
    return %c0_i32, %c0_i32_0 : i32, i32
  }
  func.func @transform_5(%arg0: i32) -> (i32, i32) {
    %c0_i32 = arith.constant 0 : i32
    %c0_i32_0 = arith.constant 0 : i32
    %c0_i32_1 = arith.constant 0 : i32
    return %c0_i32, %c0_i32_0 : i32, i32
  }
}

module attributes {stable_mosaic.version = 11 : i64} {
  func.func @_gemm_stats_kernel(%arg0: i32, %arg1: memref<16x72xbf16, #tpu.memory_space<vmem>>, %arg2: memref<72x8xbf16, #tpu.memory_space<vmem>>, %arg3: memref<1x8xf32, #tpu.memory_space<vmem>>, %arg4: memref<16x8xf32, #tpu.memory_space<vmem>>, %arg5: memref<1x8xf32, #tpu.memory_space<vmem>>, %arg6: memref<1x8xf32, #tpu.memory_space<vmem>>) attributes {dimension_semantics = [#tpu.dimension_semantics<arbitrary>], iteration_bounds = array<i64: 2>, scalar_prefetch = 0 : i64, scratch_operands = 0 : i64, tpu.core_type = #tpu.core_type<tc>, window_params = [{transform_indices = @transform_0, window_bounds = array<i64: 16, 72>}, {pipeline_mode = #tpu.pipeline_mode<synchronous>, transform_indices = @transform_1, window_bounds = array<i64: 72, 8>}, {pipeline_mode = #tpu.pipeline_mode<synchronous>, transform_indices = @transform_2, window_bounds = array<i64: 1, 8>}, {transform_indices = @transform_3, window_bounds = array<i64: 16, 8>}, {pipeline_mode = #tpu.pipeline_mode<synchronous>, transform_indices = @transform_4, window_bounds = array<i64: 1, 8>}, {pipeline_mode = #tpu.pipeline_mode<synchronous>, transform_indices = @transform_5, window_bounds = array<i64: 1, 8>}]} {
    %c0_i32 = arith.constant 0 : i32
    %0 = arith.cmpi eq, %arg0, %c0_i32 : i32
    %1 = arith.extui %0 : i1 to i32
    %c0_i32_0 = arith.constant 0 : i32
    %2 = arith.cmpi ne, %1, %c0_i32_0 : i32
    scf.if %2 {
      %cst_18 = arith.constant 0.000000e+00 : f32
      %21 = vector.broadcast %cst_18 : f32 to vector<1x8xf32>
      %c0_19 = arith.constant 0 : index
      %c0_20 = arith.constant 0 : index
      %22 = vector.load %arg5[%c0_19, %c0_20] : memref<1x8xf32, #tpu.memory_space<vmem>>, vector<1x8xf32>
      tpu.vector_store %arg5[%c0_19, %c0_20], %21 {strides = array<i32>} : memref<1x8xf32, #tpu.memory_space<vmem>>, vector<1x8xf32>,
      %cst_21 = arith.constant 0.000000e+00 : f32
      %23 = vector.broadcast %cst_21 : f32 to vector<1x8xf32>
      %c0_22 = arith.constant 0 : index
      %c0_23 = arith.constant 0 : index
      %24 = vector.load %arg6[%c0_22, %c0_23] : memref<1x8xf32, #tpu.memory_space<vmem>>, vector<1x8xf32>
      tpu.vector_store %arg6[%c0_22, %c0_23], %23 {strides = array<i32>} : memref<1x8xf32, #tpu.memory_space<vmem>>, vector<1x8xf32>,
    } else {
    }
    %c0 = arith.constant 0 : index
    %c0_1 = arith.constant 0 : index
    %3 = vector.load %arg1[%c0, %c0_1] : memref<16x72xbf16, #tpu.memory_space<vmem>>, vector<16x72xbf16>
    %c0_2 = arith.constant 0 : index
    %c0_3 = arith.constant 0 : index
    %4 = vector.load %arg2[%c0_2, %c0_3] : memref<72x8xbf16, #tpu.memory_space<vmem>>, vector<72x8xbf16>
    %cst = arith.constant dense<0.000000e+00> : vector<16x8xf32>
    %5 = tpu.matmul %3, %4, %cst {dimension_numbers = #tpu.dot_dimension_numbers<[1], [0], [0], [1], [0, 0, 1, 1], [], []>} : vector<16x72xbf16>, vector<72x8xbf16>, vector<16x8xf32> -> vector<16x8xf32>
    %c0_4 = arith.constant 0 : index
    %c0_5 = arith.constant 0 : index
    %6 = vector.load %arg3[%c0_4, %c0_5] : memref<1x8xf32, #tpu.memory_space<vmem>>, vector<1x8xf32>
    %7 = vector.broadcast %6 : vector<1x8xf32> to vector<16x8xf32>
    %8 = arith.addf %5, %7 : vector<16x8xf32>
    %c0_6 = arith.constant 0 : index
    %c0_7 = arith.constant 0 : index
    %9 = vector.load %arg4[%c0_6, %c0_7] : memref<16x8xf32, #tpu.memory_space<vmem>>, vector<16x8xf32>
    tpu.vector_store %arg4[%c0_6, %c0_7], %8 {strides = array<i32>} : memref<16x8xf32, #tpu.memory_space<vmem>>, vector<16x8xf32>,
    %c0_8 = arith.constant 0 : index
    %c0_9 = arith.constant 0 : index
    %10 = vector.load %arg5[%c0_8, %c0_9] : memref<1x8xf32, #tpu.memory_space<vmem>>, vector<1x8xf32>
    %cst_10 = arith.constant dense<0.000000e+00> : vector<8xf32>
    %11 = vector.multi_reduction <add>, %8, %cst_10 [0] : vector<16x8xf32> to vector<8xf32>
    %12 = vector.shape_cast %11 : vector<8xf32> to vector<1x8xf32>
    %13 = arith.addf %10, %12 : vector<1x8xf32>
    %c0_11 = arith.constant 0 : index
    %c0_12 = arith.constant 0 : index
    %14 = vector.load %arg5[%c0_11, %c0_12] : memref<1x8xf32, #tpu.memory_space<vmem>>, vector<1x8xf32>
    tpu.vector_store %arg5[%c0_11, %c0_12], %13 {strides = array<i32>} : memref<1x8xf32, #tpu.memory_space<vmem>>, vector<1x8xf32>,
    %c0_13 = arith.constant 0 : index
    %c0_14 = arith.constant 0 : index
    %15 = vector.load %arg6[%c0_13, %c0_14] : memref<1x8xf32, #tpu.memory_space<vmem>>, vector<1x8xf32>
    %16 = arith.mulf %8, %8 : vector<16x8xf32>
    %cst_15 = arith.constant dense<0.000000e+00> : vector<8xf32>
    %17 = vector.multi_reduction <add>, %16, %cst_15 [0] : vector<16x8xf32> to vector<8xf32>
    %18 = vector.shape_cast %17 : vector<8xf32> to vector<1x8xf32>
    %19 = arith.addf %15, %18 : vector<1x8xf32>
    %c0_16 = arith.constant 0 : index
    %c0_17 = arith.constant 0 : index
    %20 = vector.load %arg6[%c0_16, %c0_17] : memref<1x8xf32, #tpu.memory_space<vmem>>, vector<1x8xf32>
    tpu.vector_store %arg6[%c0_16, %c0_17], %19 {strides = array<i32>} : memref<1x8xf32, #tpu.memory_space<vmem>>, vector<1x8xf32>,
    return
  }
  func.func @transform_0(%arg0: i32) -> (i32, i32) {
    %c0_i32 = arith.constant 0 : i32
    %c0_i32_0 = arith.constant 0 : i32
    return %arg0, %c0_i32 : i32, i32
  }
  func.func @transform_1(%arg0: i32) -> (i32, i32) {
    %c0_i32 = arith.constant 0 : i32
    %c0_i32_0 = arith.constant 0 : i32
    %c0_i32_1 = arith.constant 0 : i32
    return %c0_i32, %c0_i32_0 : i32, i32
  }
  func.func @transform_2(%arg0: i32) -> (i32, i32) {
    %c0_i32 = arith.constant 0 : i32
    %c0_i32_0 = arith.constant 0 : i32
    %c0_i32_1 = arith.constant 0 : i32
    return %c0_i32, %c0_i32_0 : i32, i32
  }
  func.func @transform_3(%arg0: i32) -> (i32, i32) {
    %c0_i32 = arith.constant 0 : i32
    %c0_i32_0 = arith.constant 0 : i32
    return %arg0, %c0_i32 : i32, i32
  }
  func.func @transform_4(%arg0: i32) -> (i32, i32) {
    %c0_i32 = arith.constant 0 : i32
    %c0_i32_0 = arith.constant 0 : i32
    %c0_i32_1 = arith.constant 0 : i32
    return %c0_i32, %c0_i32_0 : i32, i32
  }
  func.func @transform_5(%arg0: i32) -> (i32, i32) {
    %c0_i32 = arith.constant 0 : i32
    %c0_i32_0 = arith.constant 0 : i32
    %c0_i32_1 = arith.constant 0 : i32
    return %c0_i32, %c0_i32_0 : i32, i32
  }
}

module attributes {stable_mosaic.version = 11 : i64} {
  func.func @_bn_apply_kernel(%arg0: i32, %arg1: memref<8x32xf32, #tpu.memory_space<vmem>>, %arg2: memref<1x32xf32, #tpu.memory_space<vmem>>, %arg3: memref<1x32xf32, #tpu.memory_space<vmem>>, %arg4: memref<8x32xf32, #tpu.memory_space<vmem>>) attributes {dimension_semantics = [#tpu.dimension_semantics<parallel>], iteration_bounds = array<i64: 1>, scalar_prefetch = 0 : i64, scratch_operands = 0 : i64, tpu.core_type = #tpu.core_type<tc>, window_params = [{transform_indices = @transform_0, window_bounds = array<i64: 8, 32>}, {pipeline_mode = #tpu.pipeline_mode<synchronous>, transform_indices = @transform_1, window_bounds = array<i64: 1, 32>}, {pipeline_mode = #tpu.pipeline_mode<synchronous>, transform_indices = @transform_2, window_bounds = array<i64: 1, 32>}, {transform_indices = @transform_3, window_bounds = array<i64: 8, 32>}]} {
    %c0 = arith.constant 0 : index
    %c0_0 = arith.constant 0 : index
    %0 = vector.load %arg1[%c0, %c0_0] : memref<8x32xf32, #tpu.memory_space<vmem>>, vector<8x32xf32>
    %c0_1 = arith.constant 0 : index
    %c0_2 = arith.constant 0 : index
    %1 = vector.load %arg2[%c0_1, %c0_2] : memref<1x32xf32, #tpu.memory_space<vmem>>, vector<1x32xf32>
    %2 = vector.broadcast %1 : vector<1x32xf32> to vector<8x32xf32>
    %3 = arith.mulf %0, %2 : vector<8x32xf32>
    %c0_3 = arith.constant 0 : index
    %c0_4 = arith.constant 0 : index
    %4 = vector.load %arg3[%c0_3, %c0_4] : memref<1x32xf32, #tpu.memory_space<vmem>>, vector<1x32xf32>
    %5 = vector.broadcast %4 : vector<1x32xf32> to vector<8x32xf32>
    %6 = arith.addf %3, %5 : vector<8x32xf32>
    %cst = arith.constant 0.000000e+00 : f32
    %7 = vector.broadcast %cst : f32 to vector<8x32xf32>
    %8 = arith.cmpf ogt, %6, %7 : vector<8x32xf32>
    %cst_5 = arith.constant 1.000000e-01 : f32
    %9 = vector.broadcast %cst_5 : f32 to vector<8x32xf32>
    %10 = arith.mulf %9, %6 : vector<8x32xf32>
    %11 = arith.select %8, %6, %10 : vector<8x32xi1>, vector<8x32xf32>
    %c0_6 = arith.constant 0 : index
    %c0_7 = arith.constant 0 : index
    %12 = vector.load %arg4[%c0_6, %c0_7] : memref<8x32xf32, #tpu.memory_space<vmem>>, vector<8x32xf32>
    tpu.vector_store %arg4[%c0_6, %c0_7], %11 {strides = array<i32>} : memref<8x32xf32, #tpu.memory_space<vmem>>, vector<8x32xf32>,
    return
  }
  func.func @transform_0(%arg0: i32) -> (i32, i32) {
    %c0_i32 = arith.constant 0 : i32
    %c0_i32_0 = arith.constant 0 : i32
    return %arg0, %c0_i32 : i32, i32
  }
  func.func @transform_1(%arg0: i32) -> (i32, i32) {
    %c0_i32 = arith.constant 0 : i32
    %c0_i32_0 = arith.constant 0 : i32
    %c0_i32_1 = arith.constant 0 : i32
    return %c0_i32, %c0_i32_0 : i32, i32
  }
  func.func @transform_2(%arg0: i32) -> (i32, i32) {
    %c0_i32 = arith.constant 0 : i32
    %c0_i32_0 = arith.constant 0 : i32
    %c0_i32_1 = arith.constant 0 : i32
    return %c0_i32, %c0_i32_0 : i32, i32
  }
  func.func @transform_3(%arg0: i32) -> (i32, i32) {
    %c0_i32 = arith.constant 0 : i32
    %c0_i32_0 = arith.constant 0 : i32
    return %arg0, %c0_i32 : i32, i32
  }
}

module attributes {stable_mosaic.version = 11 : i64} {
  func.func @_stats_kernel(%arg0: i32, %arg1: memref<8x32xf32, #tpu.memory_space<vmem>>, %arg2: memref<1x32xf32, #tpu.memory_space<vmem>>, %arg3: memref<1x32xf32, #tpu.memory_space<vmem>>) attributes {dimension_semantics = [#tpu.dimension_semantics<arbitrary>], iteration_bounds = array<i64: 1>, scalar_prefetch = 0 : i64, scratch_operands = 0 : i64, tpu.core_type = #tpu.core_type<tc>, window_params = [{transform_indices = @transform_0, window_bounds = array<i64: 8, 32>}, {pipeline_mode = #tpu.pipeline_mode<synchronous>, transform_indices = @transform_1, window_bounds = array<i64: 1, 32>}, {pipeline_mode = #tpu.pipeline_mode<synchronous>, transform_indices = @transform_2, window_bounds = array<i64: 1, 32>}]} {
    %c0_i32 = arith.constant 0 : i32
    %0 = arith.cmpi eq, %arg0, %c0_i32 : i32
    %1 = arith.extui %0 : i1 to i32
    %c0_i32_0 = arith.constant 0 : i32
    %2 = arith.cmpi ne, %1, %c0_i32_0 : i32
    scf.if %2 {
      %cst_11 = arith.constant 0.000000e+00 : f32
      %15 = vector.broadcast %cst_11 : f32 to vector<1x32xf32>
      %c0_12 = arith.constant 0 : index
      %c0_13 = arith.constant 0 : index
      %16 = vector.load %arg2[%c0_12, %c0_13] : memref<1x32xf32, #tpu.memory_space<vmem>>, vector<1x32xf32>
      tpu.vector_store %arg2[%c0_12, %c0_13], %15 {strides = array<i32>} : memref<1x32xf32, #tpu.memory_space<vmem>>, vector<1x32xf32>,
      %cst_14 = arith.constant 0.000000e+00 : f32
      %17 = vector.broadcast %cst_14 : f32 to vector<1x32xf32>
      %c0_15 = arith.constant 0 : index
      %c0_16 = arith.constant 0 : index
      %18 = vector.load %arg3[%c0_15, %c0_16] : memref<1x32xf32, #tpu.memory_space<vmem>>, vector<1x32xf32>
      tpu.vector_store %arg3[%c0_15, %c0_16], %17 {strides = array<i32>} : memref<1x32xf32, #tpu.memory_space<vmem>>, vector<1x32xf32>,
    } else {
    }
    %c0 = arith.constant 0 : index
    %c0_1 = arith.constant 0 : index
    %3 = vector.load %arg1[%c0, %c0_1] : memref<8x32xf32, #tpu.memory_space<vmem>>, vector<8x32xf32>
    %c0_2 = arith.constant 0 : index
    %c0_3 = arith.constant 0 : index
    %4 = vector.load %arg2[%c0_2, %c0_3] : memref<1x32xf32, #tpu.memory_space<vmem>>, vector<1x32xf32>
    %cst = arith.constant dense<0.000000e+00> : vector<32xf32>
    %5 = vector.multi_reduction <add>, %3, %cst [0] : vector<8x32xf32> to vector<32xf32>
    %6 = vector.shape_cast %5 : vector<32xf32> to vector<1x32xf32>
    %7 = arith.addf %4, %6 : vector<1x32xf32>
    %c0_4 = arith.constant 0 : index
    %c0_5 = arith.constant 0 : index
    %8 = vector.load %arg2[%c0_4, %c0_5] : memref<1x32xf32, #tpu.memory_space<vmem>>, vector<1x32xf32>
    tpu.vector_store %arg2[%c0_4, %c0_5], %7 {strides = array<i32>} : memref<1x32xf32, #tpu.memory_space<vmem>>, vector<1x32xf32>,
    %c0_6 = arith.constant 0 : index
    %c0_7 = arith.constant 0 : index
    %9 = vector.load %arg3[%c0_6, %c0_7] : memref<1x32xf32, #tpu.memory_space<vmem>>, vector<1x32xf32>
    %10 = arith.mulf %3, %3 : vector<8x32xf32>
    %cst_8 = arith.constant dense<0.000000e+00> : vector<32xf32>
    %11 = vector.multi_reduction <add>, %10, %cst_8 [0] : vector<8x32xf32> to vector<32xf32>
    %12 = vector.shape_cast %11 : vector<32xf32> to vector<1x32xf32>
    %13 = arith.addf %9, %12 : vector<1x32xf32>
    %c0_9 = arith.constant 0 : index
    %c0_10 = arith.constant 0 : index
    %14 = vector.load %arg3[%c0_9, %c0_10] : memref<1x32xf32, #tpu.memory_space<vmem>>, vector<1x32xf32>
    tpu.vector_store %arg3[%c0_9, %c0_10], %13 {strides = array<i32>} : memref<1x32xf32, #tpu.memory_space<vmem>>, vector<1x32xf32>,
    return
  }
  func.func @transform_0(%arg0: i32) -> (i32, i32) {
    %c0_i32 = arith.constant 0 : i32
    %c0_i32_0 = arith.constant 0 : i32
    return %arg0, %c0_i32 : i32, i32
  }
  func.func @transform_1(%arg0: i32) -> (i32, i32) {
    %c0_i32 = arith.constant 0 : i32
    %c0_i32_0 = arith.constant 0 : i32
    %c0_i32_1 = arith.constant 0 : i32
    return %c0_i32, %c0_i32_0 : i32, i32
  }
  func.func @transform_2(%arg0: i32) -> (i32, i32) {
    %c0_i32 = arith.constant 0 : i32
    %c0_i32_0 = arith.constant 0 : i32
    %c0_i32_1 = arith.constant 0 : i32
    return %c0_i32, %c0_i32_0 : i32, i32
  }
}

module attributes {stable_mosaic.version = 11 : i64} {
  func.func @_gemm_stats_kernel(%arg0: i32, %arg1: memref<16x8xbf16, #tpu.memory_space<vmem>>, %arg2: memref<8x8xbf16, #tpu.memory_space<vmem>>, %arg3: memref<1x8xf32, #tpu.memory_space<vmem>>, %arg4: memref<16x8xf32, #tpu.memory_space<vmem>>, %arg5: memref<1x8xf32, #tpu.memory_space<vmem>>, %arg6: memref<1x8xf32, #tpu.memory_space<vmem>>) attributes {dimension_semantics = [#tpu.dimension_semantics<arbitrary>], iteration_bounds = array<i64: 2>, scalar_prefetch = 0 : i64, scratch_operands = 0 : i64, tpu.core_type = #tpu.core_type<tc>, window_params = [{transform_indices = @transform_0, window_bounds = array<i64: 16, 8>}, {pipeline_mode = #tpu.pipeline_mode<synchronous>, transform_indices = @transform_1, window_bounds = array<i64: 8, 8>}, {pipeline_mode = #tpu.pipeline_mode<synchronous>, transform_indices = @transform_2, window_bounds = array<i64: 1, 8>}, {transform_indices = @transform_3, window_bounds = array<i64: 16, 8>}, {pipeline_mode = #tpu.pipeline_mode<synchronous>, transform_indices = @transform_4, window_bounds = array<i64: 1, 8>}, {pipeline_mode = #tpu.pipeline_mode<synchronous>, transform_indices = @transform_5, window_bounds = array<i64: 1, 8>}]} {
    %c0_i32 = arith.constant 0 : i32
    %0 = arith.cmpi eq, %arg0, %c0_i32 : i32
    %1 = arith.extui %0 : i1 to i32
    %c0_i32_0 = arith.constant 0 : i32
    %2 = arith.cmpi ne, %1, %c0_i32_0 : i32
    scf.if %2 {
      %cst_18 = arith.constant 0.000000e+00 : f32
      %21 = vector.broadcast %cst_18 : f32 to vector<1x8xf32>
      %c0_19 = arith.constant 0 : index
      %c0_20 = arith.constant 0 : index
      %22 = vector.load %arg5[%c0_19, %c0_20] : memref<1x8xf32, #tpu.memory_space<vmem>>, vector<1x8xf32>
      tpu.vector_store %arg5[%c0_19, %c0_20], %21 {strides = array<i32>} : memref<1x8xf32, #tpu.memory_space<vmem>>, vector<1x8xf32>,
      %cst_21 = arith.constant 0.000000e+00 : f32
      %23 = vector.broadcast %cst_21 : f32 to vector<1x8xf32>
      %c0_22 = arith.constant 0 : index
      %c0_23 = arith.constant 0 : index
      %24 = vector.load %arg6[%c0_22, %c0_23] : memref<1x8xf32, #tpu.memory_space<vmem>>, vector<1x8xf32>
      tpu.vector_store %arg6[%c0_22, %c0_23], %23 {strides = array<i32>} : memref<1x8xf32, #tpu.memory_space<vmem>>, vector<1x8xf32>,
    } else {
    }
    %c0 = arith.constant 0 : index
    %c0_1 = arith.constant 0 : index
    %3 = vector.load %arg1[%c0, %c0_1] : memref<16x8xbf16, #tpu.memory_space<vmem>>, vector<16x8xbf16>
    %c0_2 = arith.constant 0 : index
    %c0_3 = arith.constant 0 : index
    %4 = vector.load %arg2[%c0_2, %c0_3] : memref<8x8xbf16, #tpu.memory_space<vmem>>, vector<8x8xbf16>
    %cst = arith.constant dense<0.000000e+00> : vector<16x8xf32>
    %5 = tpu.matmul %3, %4, %cst {dimension_numbers = #tpu.dot_dimension_numbers<[1], [0], [0], [1], [0, 0, 1, 1], [], []>} : vector<16x8xbf16>, vector<8x8xbf16>, vector<16x8xf32> -> vector<16x8xf32>
    %c0_4 = arith.constant 0 : index
    %c0_5 = arith.constant 0 : index
    %6 = vector.load %arg3[%c0_4, %c0_5] : memref<1x8xf32, #tpu.memory_space<vmem>>, vector<1x8xf32>
    %7 = vector.broadcast %6 : vector<1x8xf32> to vector<16x8xf32>
    %8 = arith.addf %5, %7 : vector<16x8xf32>
    %c0_6 = arith.constant 0 : index
    %c0_7 = arith.constant 0 : index
    %9 = vector.load %arg4[%c0_6, %c0_7] : memref<16x8xf32, #tpu.memory_space<vmem>>, vector<16x8xf32>
    tpu.vector_store %arg4[%c0_6, %c0_7], %8 {strides = array<i32>} : memref<16x8xf32, #tpu.memory_space<vmem>>, vector<16x8xf32>,
    %c0_8 = arith.constant 0 : index
    %c0_9 = arith.constant 0 : index
    %10 = vector.load %arg5[%c0_8, %c0_9] : memref<1x8xf32, #tpu.memory_space<vmem>>, vector<1x8xf32>
    %cst_10 = arith.constant dense<0.000000e+00> : vector<8xf32>
    %11 = vector.multi_reduction <add>, %8, %cst_10 [0] : vector<16x8xf32> to vector<8xf32>
    %12 = vector.shape_cast %11 : vector<8xf32> to vector<1x8xf32>
    %13 = arith.addf %10, %12 : vector<1x8xf32>
    %c0_11 = arith.constant 0 : index
    %c0_12 = arith.constant 0 : index
    %14 = vector.load %arg5[%c0_11, %c0_12] : memref<1x8xf32, #tpu.memory_space<vmem>>, vector<1x8xf32>
    tpu.vector_store %arg5[%c0_11, %c0_12], %13 {strides = array<i32>} : memref<1x8xf32, #tpu.memory_space<vmem>>, vector<1x8xf32>,
    %c0_13 = arith.constant 0 : index
    %c0_14 = arith.constant 0 : index
    %15 = vector.load %arg6[%c0_13, %c0_14] : memref<1x8xf32, #tpu.memory_space<vmem>>, vector<1x8xf32>
    %16 = arith.mulf %8, %8 : vector<16x8xf32>
    %cst_15 = arith.constant dense<0.000000e+00> : vector<8xf32>
    %17 = vector.multi_reduction <add>, %16, %cst_15 [0] : vector<16x8xf32> to vector<8xf32>
    %18 = vector.shape_cast %17 : vector<8xf32> to vector<1x8xf32>
    %19 = arith.addf %15, %18 : vector<1x8xf32>
    %c0_16 = arith.constant 0 : index
    %c0_17 = arith.constant 0 : index
    %20 = vector.load %arg6[%c0_16, %c0_17] : memref<1x8xf32, #tpu.memory_space<vmem>>, vector<1x8xf32>
    tpu.vector_store %arg6[%c0_16, %c0_17], %19 {strides = array<i32>} : memref<1x8xf32, #tpu.memory_space<vmem>>, vector<1x8xf32>,
    return
  }
  func.func @transform_0(%arg0: i32) -> (i32, i32) {
    %c0_i32 = arith.constant 0 : i32
    %c0_i32_0 = arith.constant 0 : i32
    return %arg0, %c0_i32 : i32, i32
  }
  func.func @transform_1(%arg0: i32) -> (i32, i32) {
    %c0_i32 = arith.constant 0 : i32
    %c0_i32_0 = arith.constant 0 : i32
    %c0_i32_1 = arith.constant 0 : i32
    return %c0_i32, %c0_i32_0 : i32, i32
  }
  func.func @transform_2(%arg0: i32) -> (i32, i32) {
    %c0_i32 = arith.constant 0 : i32
    %c0_i32_0 = arith.constant 0 : i32
    %c0_i32_1 = arith.constant 0 : i32
    return %c0_i32, %c0_i32_0 : i32, i32
  }
  func.func @transform_3(%arg0: i32) -> (i32, i32) {
    %c0_i32 = arith.constant 0 : i32
    %c0_i32_0 = arith.constant 0 : i32
    return %arg0, %c0_i32 : i32, i32
  }
  func.func @transform_4(%arg0: i32) -> (i32, i32) {
    %c0_i32 = arith.constant 0 : i32
    %c0_i32_0 = arith.constant 0 : i32
    %c0_i32_1 = arith.constant 0 : i32
    return %c0_i32, %c0_i32_0 : i32, i32
  }
  func.func @transform_5(%arg0: i32) -> (i32, i32) {
    %c0_i32 = arith.constant 0 : i32
    %c0_i32_0 = arith.constant 0 : i32
    %c0_i32_1 = arith.constant 0 : i32
    return %c0_i32, %c0_i32_0 : i32, i32
  }
}

module attributes {stable_mosaic.version = 11 : i64} {
  func.func @_upsample2x_kernel(%arg0: i32, %arg1: memref<1x4x4x8xf32, #tpu.memory_space<vmem>>, %arg2: memref<1x4x4x8xf32, #tpu.memory_space<vmem>>, %arg3: memref<1x4x4x8xf32, #tpu.memory_space<vmem>>, %arg4: memref<1x4x4x8xf32, #tpu.memory_space<vmem>>, %arg5: memref<1x4x4x8xf32, #tpu.memory_space<vmem>>) attributes {dimension_semantics = [#tpu.dimension_semantics<parallel>], iteration_bounds = array<i64: 2>, scalar_prefetch = 0 : i64, scratch_operands = 0 : i64, tpu.core_type = #tpu.core_type<tc>, window_params = [{transform_indices = @transform_0, window_bounds = array<i64: 1, 4, 4, 8>}, {transform_indices = @transform_1, window_bounds = array<i64: 1, 4, 4, 8>}, {transform_indices = @transform_2, window_bounds = array<i64: 1, 4, 4, 8>}, {transform_indices = @transform_3, window_bounds = array<i64: 1, 4, 4, 8>}, {transform_indices = @transform_4, window_bounds = array<i64: 1, 4, 4, 8>}]} {
    %c0 = arith.constant 0 : index
    %c0_0 = arith.constant 0 : index
    %c0_1 = arith.constant 0 : index
    %c0_2 = arith.constant 0 : index
    %0 = vector.load %arg1[%c0, %c0_0, %c0_1, %c0_2] : memref<1x4x4x8xf32, #tpu.memory_space<vmem>>, vector<1x4x4x8xf32>
    %1 = vector.extract_strided_slice %0 {offsets = [0, 0, 0, 0], sizes = [1, 1, 4, 8], strides = [1, 1, 1, 1]} : vector<1x4x4x8xf32> to vector<1x1x4x8xf32>
    %2 = vector.extract_strided_slice %0 {offsets = [0, 0, 0, 0], sizes = [1, 3, 4, 8], strides = [1, 1, 1, 1]} : vector<1x4x4x8xf32> to vector<1x3x4x8xf32>
    %3 = tpu.concatenate %1, %2 in 1 : vector<1x1x4x8xf32>, vector<1x3x4x8xf32> -> vector<1x4x4x8xf32>
    %4 = vector.extract_strided_slice %0 {offsets = [0, 1, 0, 0], sizes = [1, 3, 4, 8], strides = [1, 1, 1, 1]} : vector<1x4x4x8xf32> to vector<1x3x4x8xf32>
    %5 = vector.extract_strided_slice %0 {offsets = [0, 3, 0, 0], sizes = [1, 1, 4, 8], strides = [1, 1, 1, 1]} : vector<1x4x4x8xf32> to vector<1x1x4x8xf32>
    %6 = tpu.concatenate %4, %5 in 1 : vector<1x3x4x8xf32>, vector<1x1x4x8xf32> -> vector<1x4x4x8xf32>
    %cst = arith.constant 2.500000e-01 : f32
    %7 = vector.broadcast %cst : f32 to vector<1x4x4x8xf32>
    %8 = arith.mulf %7, %3 : vector<1x4x4x8xf32>
    %cst_3 = arith.constant 7.500000e-01 : f32
    %9 = vector.broadcast %cst_3 : f32 to vector<1x4x4x8xf32>
    %10 = arith.mulf %9, %0 : vector<1x4x4x8xf32>
    %11 = arith.addf %8, %10 : vector<1x4x4x8xf32>
    %cst_4 = arith.constant 7.500000e-01 : f32
    %12 = vector.broadcast %cst_4 : f32 to vector<1x4x4x8xf32>
    %13 = arith.mulf %12, %0 : vector<1x4x4x8xf32>
    %cst_5 = arith.constant 2.500000e-01 : f32
    %14 = vector.broadcast %cst_5 : f32 to vector<1x4x4x8xf32>
    %15 = arith.mulf %14, %6 : vector<1x4x4x8xf32>
    %16 = arith.addf %13, %15 : vector<1x4x4x8xf32>
    %17 = vector.extract_strided_slice %11 {offsets = [0, 0, 0, 0], sizes = [1, 4, 1, 8], strides = [1, 1, 1, 1]} : vector<1x4x4x8xf32> to vector<1x4x1x8xf32>
    %18 = vector.extract_strided_slice %11 {offsets = [0, 0, 0, 0], sizes = [1, 4, 3, 8], strides = [1, 1, 1, 1]} : vector<1x4x4x8xf32> to vector<1x4x3x8xf32>
    %19 = tpu.concatenate %17, %18 in 2 : vector<1x4x1x8xf32>, vector<1x4x3x8xf32> -> vector<1x4x4x8xf32>
    %20 = vector.extract_strided_slice %11 {offsets = [0, 0, 1, 0], sizes = [1, 4, 3, 8], strides = [1, 1, 1, 1]} : vector<1x4x4x8xf32> to vector<1x4x3x8xf32>
    %21 = vector.extract_strided_slice %11 {offsets = [0, 0, 3, 0], sizes = [1, 4, 1, 8], strides = [1, 1, 1, 1]} : vector<1x4x4x8xf32> to vector<1x4x1x8xf32>
    %22 = tpu.concatenate %20, %21 in 2 : vector<1x4x3x8xf32>, vector<1x4x1x8xf32> -> vector<1x4x4x8xf32>
    %cst_6 = arith.constant 2.500000e-01 : f32
    %23 = vector.broadcast %cst_6 : f32 to vector<1x4x4x8xf32>
    %24 = arith.mulf %23, %19 : vector<1x4x4x8xf32>
    %cst_7 = arith.constant 7.500000e-01 : f32
    %25 = vector.broadcast %cst_7 : f32 to vector<1x4x4x8xf32>
    %26 = arith.mulf %25, %11 : vector<1x4x4x8xf32>
    %27 = arith.addf %24, %26 : vector<1x4x4x8xf32>
    %cst_8 = arith.constant 7.500000e-01 : f32
    %28 = vector.broadcast %cst_8 : f32 to vector<1x4x4x8xf32>
    %29 = arith.mulf %28, %11 : vector<1x4x4x8xf32>
    %cst_9 = arith.constant 2.500000e-01 : f32
    %30 = vector.broadcast %cst_9 : f32 to vector<1x4x4x8xf32>
    %31 = arith.mulf %30, %22 : vector<1x4x4x8xf32>
    %32 = arith.addf %29, %31 : vector<1x4x4x8xf32>
    %33 = vector.extract_strided_slice %16 {offsets = [0, 0, 0, 0], sizes = [1, 4, 1, 8], strides = [1, 1, 1, 1]} : vector<1x4x4x8xf32> to vector<1x4x1x8xf32>
    %34 = vector.extract_strided_slice %16 {offsets = [0, 0, 0, 0], sizes = [1, 4, 3, 8], strides = [1, 1, 1, 1]} : vector<1x4x4x8xf32> to vector<1x4x3x8xf32>
    %35 = tpu.concatenate %33, %34 in 2 : vector<1x4x1x8xf32>, vector<1x4x3x8xf32> -> vector<1x4x4x8xf32>
    %36 = vector.extract_strided_slice %16 {offsets = [0, 0, 1, 0], sizes = [1, 4, 3, 8], strides = [1, 1, 1, 1]} : vector<1x4x4x8xf32> to vector<1x4x3x8xf32>
    %37 = vector.extract_strided_slice %16 {offsets = [0, 0, 3, 0], sizes = [1, 4, 1, 8], strides = [1, 1, 1, 1]} : vector<1x4x4x8xf32> to vector<1x4x1x8xf32>
    %38 = tpu.concatenate %36, %37 in 2 : vector<1x4x3x8xf32>, vector<1x4x1x8xf32> -> vector<1x4x4x8xf32>
    %cst_10 = arith.constant 2.500000e-01 : f32
    %39 = vector.broadcast %cst_10 : f32 to vector<1x4x4x8xf32>
    %40 = arith.mulf %39, %35 : vector<1x4x4x8xf32>
    %cst_11 = arith.constant 7.500000e-01 : f32
    %41 = vector.broadcast %cst_11 : f32 to vector<1x4x4x8xf32>
    %42 = arith.mulf %41, %16 : vector<1x4x4x8xf32>
    %43 = arith.addf %40, %42 : vector<1x4x4x8xf32>
    %cst_12 = arith.constant 7.500000e-01 : f32
    %44 = vector.broadcast %cst_12 : f32 to vector<1x4x4x8xf32>
    %45 = arith.mulf %44, %16 : vector<1x4x4x8xf32>
    %cst_13 = arith.constant 2.500000e-01 : f32
    %46 = vector.broadcast %cst_13 : f32 to vector<1x4x4x8xf32>
    %47 = arith.mulf %46, %38 : vector<1x4x4x8xf32>
    %48 = arith.addf %45, %47 : vector<1x4x4x8xf32>
    %c0_14 = arith.constant 0 : index
    %c0_15 = arith.constant 0 : index
    %c0_16 = arith.constant 0 : index
    %c0_17 = arith.constant 0 : index
    %49 = vector.load %arg2[%c0_14, %c0_15, %c0_16, %c0_17] : memref<1x4x4x8xf32, #tpu.memory_space<vmem>>, vector<1x4x4x8xf32>
    tpu.vector_store %arg2[%c0_14, %c0_15, %c0_16, %c0_17], %27 {strides = array<i32>} : memref<1x4x4x8xf32, #tpu.memory_space<vmem>>, vector<1x4x4x8xf32>,
    %c0_18 = arith.constant 0 : index
    %c0_19 = arith.constant 0 : index
    %c0_20 = arith.constant 0 : index
    %c0_21 = arith.constant 0 : index
    %50 = vector.load %arg3[%c0_18, %c0_19, %c0_20, %c0_21] : memref<1x4x4x8xf32, #tpu.memory_space<vmem>>, vector<1x4x4x8xf32>
    tpu.vector_store %arg3[%c0_18, %c0_19, %c0_20, %c0_21], %32 {strides = array<i32>} : memref<1x4x4x8xf32, #tpu.memory_space<vmem>>, vector<1x4x4x8xf32>,
    %c0_22 = arith.constant 0 : index
    %c0_23 = arith.constant 0 : index
    %c0_24 = arith.constant 0 : index
    %c0_25 = arith.constant 0 : index
    %51 = vector.load %arg4[%c0_22, %c0_23, %c0_24, %c0_25] : memref<1x4x4x8xf32, #tpu.memory_space<vmem>>, vector<1x4x4x8xf32>
    tpu.vector_store %arg4[%c0_22, %c0_23, %c0_24, %c0_25], %43 {strides = array<i32>} : memref<1x4x4x8xf32, #tpu.memory_space<vmem>>, vector<1x4x4x8xf32>,
    %c0_26 = arith.constant 0 : index
    %c0_27 = arith.constant 0 : index
    %c0_28 = arith.constant 0 : index
    %c0_29 = arith.constant 0 : index
    %52 = vector.load %arg5[%c0_26, %c0_27, %c0_28, %c0_29] : memref<1x4x4x8xf32, #tpu.memory_space<vmem>>, vector<1x4x4x8xf32>
    tpu.vector_store %arg5[%c0_26, %c0_27, %c0_28, %c0_29], %48 {strides = array<i32>} : memref<1x4x4x8xf32, #tpu.memory_space<vmem>>, vector<1x4x4x8xf32>,
    return
  }
  func.func @transform_0(%arg0: i32) -> (i32, i32, i32, i32) {
    %c0_i32 = arith.constant 0 : i32
    %c0_i32_0 = arith.constant 0 : i32
    %c0_i32_1 = arith.constant 0 : i32
    %c0_i32_2 = arith.constant 0 : i32
    return %arg0, %c0_i32, %c0_i32_0, %c0_i32_1 : i32, i32, i32, i32
  }
  func.func @transform_1(%arg0: i32) -> (i32, i32, i32, i32) {
    %c0_i32 = arith.constant 0 : i32
    %c0_i32_0 = arith.constant 0 : i32
    %c0_i32_1 = arith.constant 0 : i32
    %c0_i32_2 = arith.constant 0 : i32
    return %arg0, %c0_i32, %c0_i32_0, %c0_i32_1 : i32, i32, i32, i32
  }
  func.func @transform_2(%arg0: i32) -> (i32, i32, i32, i32) {
    %c0_i32 = arith.constant 0 : i32
    %c0_i32_0 = arith.constant 0 : i32
    %c0_i32_1 = arith.constant 0 : i32
    %c0_i32_2 = arith.constant 0 : i32
    return %arg0, %c0_i32, %c0_i32_0, %c0_i32_1 : i32, i32, i32, i32
  }
  func.func @transform_3(%arg0: i32) -> (i32, i32, i32, i32) {
    %c0_i32 = arith.constant 0 : i32
    %c0_i32_0 = arith.constant 0 : i32
    %c0_i32_1 = arith.constant 0 : i32
    %c0_i32_2 = arith.constant 0 : i32
    return %arg0, %c0_i32, %c0_i32_0, %c0_i32_1 : i32, i32, i32, i32
  }
  func.func @transform_4(%arg0: i32) -> (i32, i32, i32, i32) {
    %c0_i32 = arith.constant 0 : i32
    %c0_i32_0 = arith.constant 0 : i32
    %c0_i32_1 = arith.constant 0 : i32
    %c0_i32_2 = arith.constant 0 : i32
    return %arg0, %c0_i32, %c0_i32_0, %c0_i32_1 : i32, i32, i32, i32
  }
}

module attributes {stable_mosaic.version = 11 : i64} {
  func.func @_gemm_stats_kernel(%arg0: i32, %arg1: memref<64x8xbf16, #tpu.memory_space<vmem>>, %arg2: memref<8x8xbf16, #tpu.memory_space<vmem>>, %arg3: memref<1x8xf32, #tpu.memory_space<vmem>>, %arg4: memref<64x8xf32, #tpu.memory_space<vmem>>, %arg5: memref<1x8xf32, #tpu.memory_space<vmem>>, %arg6: memref<1x8xf32, #tpu.memory_space<vmem>>) attributes {dimension_semantics = [#tpu.dimension_semantics<arbitrary>], iteration_bounds = array<i64: 2>, scalar_prefetch = 0 : i64, scratch_operands = 0 : i64, tpu.core_type = #tpu.core_type<tc>, window_params = [{transform_indices = @transform_0, window_bounds = array<i64: 64, 8>}, {pipeline_mode = #tpu.pipeline_mode<synchronous>, transform_indices = @transform_1, window_bounds = array<i64: 8, 8>}, {pipeline_mode = #tpu.pipeline_mode<synchronous>, transform_indices = @transform_2, window_bounds = array<i64: 1, 8>}, {transform_indices = @transform_3, window_bounds = array<i64: 64, 8>}, {pipeline_mode = #tpu.pipeline_mode<synchronous>, transform_indices = @transform_4, window_bounds = array<i64: 1, 8>}, {pipeline_mode = #tpu.pipeline_mode<synchronous>, transform_indices = @transform_5, window_bounds = array<i64: 1, 8>}]} {
    %c0_i32 = arith.constant 0 : i32
    %0 = arith.cmpi eq, %arg0, %c0_i32 : i32
    %1 = arith.extui %0 : i1 to i32
    %c0_i32_0 = arith.constant 0 : i32
    %2 = arith.cmpi ne, %1, %c0_i32_0 : i32
    scf.if %2 {
      %cst_18 = arith.constant 0.000000e+00 : f32
      %21 = vector.broadcast %cst_18 : f32 to vector<1x8xf32>
      %c0_19 = arith.constant 0 : index
      %c0_20 = arith.constant 0 : index
      %22 = vector.load %arg5[%c0_19, %c0_20] : memref<1x8xf32, #tpu.memory_space<vmem>>, vector<1x8xf32>
      tpu.vector_store %arg5[%c0_19, %c0_20], %21 {strides = array<i32>} : memref<1x8xf32, #tpu.memory_space<vmem>>, vector<1x8xf32>,
      %cst_21 = arith.constant 0.000000e+00 : f32
      %23 = vector.broadcast %cst_21 : f32 to vector<1x8xf32>
      %c0_22 = arith.constant 0 : index
      %c0_23 = arith.constant 0 : index
      %24 = vector.load %arg6[%c0_22, %c0_23] : memref<1x8xf32, #tpu.memory_space<vmem>>, vector<1x8xf32>
      tpu.vector_store %arg6[%c0_22, %c0_23], %23 {strides = array<i32>} : memref<1x8xf32, #tpu.memory_space<vmem>>, vector<1x8xf32>,
    } else {
    }
    %c0 = arith.constant 0 : index
    %c0_1 = arith.constant 0 : index
    %3 = vector.load %arg1[%c0, %c0_1] : memref<64x8xbf16, #tpu.memory_space<vmem>>, vector<64x8xbf16>
    %c0_2 = arith.constant 0 : index
    %c0_3 = arith.constant 0 : index
    %4 = vector.load %arg2[%c0_2, %c0_3] : memref<8x8xbf16, #tpu.memory_space<vmem>>, vector<8x8xbf16>
    %cst = arith.constant dense<0.000000e+00> : vector<64x8xf32>
    %5 = tpu.matmul %3, %4, %cst {dimension_numbers = #tpu.dot_dimension_numbers<[1], [0], [0], [1], [0, 0, 1, 1], [], []>} : vector<64x8xbf16>, vector<8x8xbf16>, vector<64x8xf32> -> vector<64x8xf32>
    %c0_4 = arith.constant 0 : index
    %c0_5 = arith.constant 0 : index
    %6 = vector.load %arg3[%c0_4, %c0_5] : memref<1x8xf32, #tpu.memory_space<vmem>>, vector<1x8xf32>
    %7 = vector.broadcast %6 : vector<1x8xf32> to vector<64x8xf32>
    %8 = arith.addf %5, %7 : vector<64x8xf32>
    %c0_6 = arith.constant 0 : index
    %c0_7 = arith.constant 0 : index
    %9 = vector.load %arg4[%c0_6, %c0_7] : memref<64x8xf32, #tpu.memory_space<vmem>>, vector<64x8xf32>
    tpu.vector_store %arg4[%c0_6, %c0_7], %8 {strides = array<i32>} : memref<64x8xf32, #tpu.memory_space<vmem>>, vector<64x8xf32>,
    %c0_8 = arith.constant 0 : index
    %c0_9 = arith.constant 0 : index
    %10 = vector.load %arg5[%c0_8, %c0_9] : memref<1x8xf32, #tpu.memory_space<vmem>>, vector<1x8xf32>
    %cst_10 = arith.constant dense<0.000000e+00> : vector<8xf32>
    %11 = vector.multi_reduction <add>, %8, %cst_10 [0] : vector<64x8xf32> to vector<8xf32>
    %12 = vector.shape_cast %11 : vector<8xf32> to vector<1x8xf32>
    %13 = arith.addf %10, %12 : vector<1x8xf32>
    %c0_11 = arith.constant 0 : index
    %c0_12 = arith.constant 0 : index
    %14 = vector.load %arg5[%c0_11, %c0_12] : memref<1x8xf32, #tpu.memory_space<vmem>>, vector<1x8xf32>
    tpu.vector_store %arg5[%c0_11, %c0_12], %13 {strides = array<i32>} : memref<1x8xf32, #tpu.memory_space<vmem>>, vector<1x8xf32>,
    %c0_13 = arith.constant 0 : index
    %c0_14 = arith.constant 0 : index
    %15 = vector.load %arg6[%c0_13, %c0_14] : memref<1x8xf32, #tpu.memory_space<vmem>>, vector<1x8xf32>
    %16 = arith.mulf %8, %8 : vector<64x8xf32>
    %cst_15 = arith.constant dense<0.000000e+00> : vector<8xf32>
    %17 = vector.multi_reduction <add>, %16, %cst_15 [0] : vector<64x8xf32> to vector<8xf32>
    %18 = vector.shape_cast %17 : vector<8xf32> to vector<1x8xf32>
    %19 = arith.addf %15, %18 : vector<1x8xf32>
    %c0_16 = arith.constant 0 : index
    %c0_17 = arith.constant 0 : index
    %20 = vector.load %arg6[%c0_16, %c0_17] : memref<1x8xf32, #tpu.memory_space<vmem>>, vector<1x8xf32>
    tpu.vector_store %arg6[%c0_16, %c0_17], %19 {strides = array<i32>} : memref<1x8xf32, #tpu.memory_space<vmem>>, vector<1x8xf32>,
    return
  }
  func.func @transform_0(%arg0: i32) -> (i32, i32) {
    %c0_i32 = arith.constant 0 : i32
    %c0_i32_0 = arith.constant 0 : i32
    return %arg0, %c0_i32 : i32, i32
  }
  func.func @transform_1(%arg0: i32) -> (i32, i32) {
    %c0_i32 = arith.constant 0 : i32
    %c0_i32_0 = arith.constant 0 : i32
    %c0_i32_1 = arith.constant 0 : i32
    return %c0_i32, %c0_i32_0 : i32, i32
  }
  func.func @transform_2(%arg0: i32) -> (i32, i32) {
    %c0_i32 = arith.constant 0 : i32
    %c0_i32_0 = arith.constant 0 : i32
    %c0_i32_1 = arith.constant 0 : i32
    return %c0_i32, %c0_i32_0 : i32, i32
  }
  func.func @transform_3(%arg0: i32) -> (i32, i32) {
    %c0_i32 = arith.constant 0 : i32
    %c0_i32_0 = arith.constant 0 : i32
    return %arg0, %c0_i32 : i32, i32
  }
  func.func @transform_4(%arg0: i32) -> (i32, i32) {
    %c0_i32 = arith.constant 0 : i32
    %c0_i32_0 = arith.constant 0 : i32
    %c0_i32_1 = arith.constant 0 : i32
    return %c0_i32, %c0_i32_0 : i32, i32
  }
  func.func @transform_5(%arg0: i32) -> (i32, i32) {
    %c0_i32 = arith.constant 0 : i32
    %c0_i32_0 = arith.constant 0 : i32
    %c0_i32_1 = arith.constant 0 : i32
    return %c0_i32, %c0_i32_0 : i32, i32
  }
}

module attributes {stable_mosaic.version = 11 : i64} {
  func.func @_bn_apply_kernel(%arg0: i32, %arg1: memref<8x128xf32, #tpu.memory_space<vmem>>, %arg2: memref<1x128xf32, #tpu.memory_space<vmem>>, %arg3: memref<1x128xf32, #tpu.memory_space<vmem>>, %arg4: memref<8x128xf32, #tpu.memory_space<vmem>>, %arg5: memref<8x128xf32, #tpu.memory_space<vmem>>) attributes {dimension_semantics = [#tpu.dimension_semantics<parallel>], iteration_bounds = array<i64: 1>, scalar_prefetch = 0 : i64, scratch_operands = 0 : i64, tpu.core_type = #tpu.core_type<tc>, window_params = [{transform_indices = @transform_0, window_bounds = array<i64: 8, 128>}, {pipeline_mode = #tpu.pipeline_mode<synchronous>, transform_indices = @transform_1, window_bounds = array<i64: 1, 128>}, {pipeline_mode = #tpu.pipeline_mode<synchronous>, transform_indices = @transform_2, window_bounds = array<i64: 1, 128>}, {transform_indices = @transform_3, window_bounds = array<i64: 8, 128>}, {transform_indices = @transform_4, window_bounds = array<i64: 8, 128>}]} {
    %c0 = arith.constant 0 : index
    %c0_0 = arith.constant 0 : index
    %0 = vector.load %arg1[%c0, %c0_0] : memref<8x128xf32, #tpu.memory_space<vmem>>, vector<8x128xf32>
    %c0_1 = arith.constant 0 : index
    %c0_2 = arith.constant 0 : index
    %1 = vector.load %arg2[%c0_1, %c0_2] : memref<1x128xf32, #tpu.memory_space<vmem>>, vector<1x128xf32>
    %2 = vector.broadcast %1 : vector<1x128xf32> to vector<8x128xf32>
    %3 = arith.mulf %0, %2 : vector<8x128xf32>
    %c0_3 = arith.constant 0 : index
    %c0_4 = arith.constant 0 : index
    %4 = vector.load %arg3[%c0_3, %c0_4] : memref<1x128xf32, #tpu.memory_space<vmem>>, vector<1x128xf32>
    %5 = vector.broadcast %4 : vector<1x128xf32> to vector<8x128xf32>
    %6 = arith.addf %3, %5 : vector<8x128xf32>
    %cst = arith.constant 0.000000e+00 : f32
    %7 = vector.broadcast %cst : f32 to vector<8x128xf32>
    %8 = arith.cmpf ogt, %6, %7 : vector<8x128xf32>
    %cst_5 = arith.constant 1.000000e-01 : f32
    %9 = vector.broadcast %cst_5 : f32 to vector<8x128xf32>
    %10 = arith.mulf %9, %6 : vector<8x128xf32>
    %11 = arith.select %8, %6, %10 : vector<8x128xi1>, vector<8x128xf32>
    %c0_6 = arith.constant 0 : index
    %c0_7 = arith.constant 0 : index
    %12 = vector.load %arg4[%c0_6, %c0_7] : memref<8x128xf32, #tpu.memory_space<vmem>>, vector<8x128xf32>
    %13 = arith.addf %11, %12 : vector<8x128xf32>
    %c0_8 = arith.constant 0 : index
    %c0_9 = arith.constant 0 : index
    %14 = vector.load %arg5[%c0_8, %c0_9] : memref<8x128xf32, #tpu.memory_space<vmem>>, vector<8x128xf32>
    tpu.vector_store %arg5[%c0_8, %c0_9], %13 {strides = array<i32>} : memref<8x128xf32, #tpu.memory_space<vmem>>, vector<8x128xf32>,
    return
  }
  func.func @transform_0(%arg0: i32) -> (i32, i32) {
    %c0_i32 = arith.constant 0 : i32
    %c0_i32_0 = arith.constant 0 : i32
    return %arg0, %c0_i32 : i32, i32
  }
  func.func @transform_1(%arg0: i32) -> (i32, i32) {
    %c0_i32 = arith.constant 0 : i32
    %c0_i32_0 = arith.constant 0 : i32
    %c0_i32_1 = arith.constant 0 : i32
    return %c0_i32, %c0_i32_0 : i32, i32
  }
  func.func @transform_2(%arg0: i32) -> (i32, i32) {
    %c0_i32 = arith.constant 0 : i32
    %c0_i32_0 = arith.constant 0 : i32
    %c0_i32_1 = arith.constant 0 : i32
    return %c0_i32, %c0_i32_0 : i32, i32
  }
  func.func @transform_3(%arg0: i32) -> (i32, i32) {
    %c0_i32 = arith.constant 0 : i32
    %c0_i32_0 = arith.constant 0 : i32
    return %arg0, %c0_i32 : i32, i32
  }
  func.func @transform_4(%arg0: i32) -> (i32, i32) {
    %c0_i32 = arith.constant 0 : i32
    %c0_i32_0 = arith.constant 0 : i32
    return %arg0, %c0_i32 : i32, i32
  }
}

module attributes {stable_mosaic.version = 11 : i64} {
  func.func @_stats_kernel(%arg0: i32, %arg1: memref<8x128xf32, #tpu.memory_space<vmem>>, %arg2: memref<1x128xf32, #tpu.memory_space<vmem>>, %arg3: memref<1x128xf32, #tpu.memory_space<vmem>>) attributes {dimension_semantics = [#tpu.dimension_semantics<arbitrary>], iteration_bounds = array<i64: 1>, scalar_prefetch = 0 : i64, scratch_operands = 0 : i64, tpu.core_type = #tpu.core_type<tc>, window_params = [{transform_indices = @transform_0, window_bounds = array<i64: 8, 128>}, {pipeline_mode = #tpu.pipeline_mode<synchronous>, transform_indices = @transform_1, window_bounds = array<i64: 1, 128>}, {pipeline_mode = #tpu.pipeline_mode<synchronous>, transform_indices = @transform_2, window_bounds = array<i64: 1, 128>}]} {
    %c0_i32 = arith.constant 0 : i32
    %0 = arith.cmpi eq, %arg0, %c0_i32 : i32
    %1 = arith.extui %0 : i1 to i32
    %c0_i32_0 = arith.constant 0 : i32
    %2 = arith.cmpi ne, %1, %c0_i32_0 : i32
    scf.if %2 {
      %cst_11 = arith.constant 0.000000e+00 : f32
      %15 = vector.broadcast %cst_11 : f32 to vector<1x128xf32>
      %c0_12 = arith.constant 0 : index
      %c0_13 = arith.constant 0 : index
      %16 = vector.load %arg2[%c0_12, %c0_13] : memref<1x128xf32, #tpu.memory_space<vmem>>, vector<1x128xf32>
      tpu.vector_store %arg2[%c0_12, %c0_13], %15 {strides = array<i32>} : memref<1x128xf32, #tpu.memory_space<vmem>>, vector<1x128xf32>,
      %cst_14 = arith.constant 0.000000e+00 : f32
      %17 = vector.broadcast %cst_14 : f32 to vector<1x128xf32>
      %c0_15 = arith.constant 0 : index
      %c0_16 = arith.constant 0 : index
      %18 = vector.load %arg3[%c0_15, %c0_16] : memref<1x128xf32, #tpu.memory_space<vmem>>, vector<1x128xf32>
      tpu.vector_store %arg3[%c0_15, %c0_16], %17 {strides = array<i32>} : memref<1x128xf32, #tpu.memory_space<vmem>>, vector<1x128xf32>,
    } else {
    }
    %c0 = arith.constant 0 : index
    %c0_1 = arith.constant 0 : index
    %3 = vector.load %arg1[%c0, %c0_1] : memref<8x128xf32, #tpu.memory_space<vmem>>, vector<8x128xf32>
    %c0_2 = arith.constant 0 : index
    %c0_3 = arith.constant 0 : index
    %4 = vector.load %arg2[%c0_2, %c0_3] : memref<1x128xf32, #tpu.memory_space<vmem>>, vector<1x128xf32>
    %cst = arith.constant dense<0.000000e+00> : vector<128xf32>
    %5 = vector.multi_reduction <add>, %3, %cst [0] : vector<8x128xf32> to vector<128xf32>
    %6 = vector.shape_cast %5 : vector<128xf32> to vector<1x128xf32>
    %7 = arith.addf %4, %6 : vector<1x128xf32>
    %c0_4 = arith.constant 0 : index
    %c0_5 = arith.constant 0 : index
    %8 = vector.load %arg2[%c0_4, %c0_5] : memref<1x128xf32, #tpu.memory_space<vmem>>, vector<1x128xf32>
    tpu.vector_store %arg2[%c0_4, %c0_5], %7 {strides = array<i32>} : memref<1x128xf32, #tpu.memory_space<vmem>>, vector<1x128xf32>,
    %c0_6 = arith.constant 0 : index
    %c0_7 = arith.constant 0 : index
    %9 = vector.load %arg3[%c0_6, %c0_7] : memref<1x128xf32, #tpu.memory_space<vmem>>, vector<1x128xf32>
    %10 = arith.mulf %3, %3 : vector<8x128xf32>
    %cst_8 = arith.constant dense<0.000000e+00> : vector<128xf32>
    %11 = vector.multi_reduction <add>, %10, %cst_8 [0] : vector<8x128xf32> to vector<128xf32>
    %12 = vector.shape_cast %11 : vector<128xf32> to vector<1x128xf32>
    %13 = arith.addf %9, %12 : vector<1x128xf32>
    %c0_9 = arith.constant 0 : index
    %c0_10 = arith.constant 0 : index
    %14 = vector.load %arg3[%c0_9, %c0_10] : memref<1x128xf32, #tpu.memory_space<vmem>>, vector<1x128xf32>
    tpu.vector_store %arg3[%c0_9, %c0_10], %13 {strides = array<i32>} : memref<1x128xf32, #tpu.memory_space<vmem>>, vector<1x128xf32>,
    return
  }
  func.func @transform_0(%arg0: i32) -> (i32, i32) {
    %c0_i32 = arith.constant 0 : i32
    %c0_i32_0 = arith.constant 0 : i32
    return %arg0, %c0_i32 : i32, i32
  }
  func.func @transform_1(%arg0: i32) -> (i32, i32) {
    %c0_i32 = arith.constant 0 : i32
    %c0_i32_0 = arith.constant 0 : i32
    %c0_i32_1 = arith.constant 0 : i32
    return %c0_i32, %c0_i32_0 : i32, i32
  }
  func.func @transform_2(%arg0: i32) -> (i32, i32) {
    %c0_i32 = arith.constant 0 : i32
    %c0_i32_0 = arith.constant 0 : i32
    %c0_i32_1 = arith.constant 0 : i32
    return %c0_i32, %c0_i32_0 : i32, i32
  }
}

module attributes {stable_mosaic.version = 11 : i64} {
  func.func @_upsample2x_kernel(%arg0: i32, %arg1: memref<1x8x8x8xf32, #tpu.memory_space<vmem>>, %arg2: memref<1x8x8x8xf32, #tpu.memory_space<vmem>>, %arg3: memref<1x8x8x8xf32, #tpu.memory_space<vmem>>, %arg4: memref<1x8x8x8xf32, #tpu.memory_space<vmem>>, %arg5: memref<1x8x8x8xf32, #tpu.memory_space<vmem>>) attributes {dimension_semantics = [#tpu.dimension_semantics<parallel>], iteration_bounds = array<i64: 2>, scalar_prefetch = 0 : i64, scratch_operands = 0 : i64, tpu.core_type = #tpu.core_type<tc>, window_params = [{transform_indices = @transform_0, window_bounds = array<i64: 1, 8, 8, 8>}, {transform_indices = @transform_1, window_bounds = array<i64: 1, 8, 8, 8>}, {transform_indices = @transform_2, window_bounds = array<i64: 1, 8, 8, 8>}, {transform_indices = @transform_3, window_bounds = array<i64: 1, 8, 8, 8>}, {transform_indices = @transform_4, window_bounds = array<i64: 1, 8, 8, 8>}]} {
    %c0 = arith.constant 0 : index
    %c0_0 = arith.constant 0 : index
    %c0_1 = arith.constant 0 : index
    %c0_2 = arith.constant 0 : index
    %0 = vector.load %arg1[%c0, %c0_0, %c0_1, %c0_2] : memref<1x8x8x8xf32, #tpu.memory_space<vmem>>, vector<1x8x8x8xf32>
    %1 = vector.extract_strided_slice %0 {offsets = [0, 0, 0, 0], sizes = [1, 1, 8, 8], strides = [1, 1, 1, 1]} : vector<1x8x8x8xf32> to vector<1x1x8x8xf32>
    %2 = vector.extract_strided_slice %0 {offsets = [0, 0, 0, 0], sizes = [1, 7, 8, 8], strides = [1, 1, 1, 1]} : vector<1x8x8x8xf32> to vector<1x7x8x8xf32>
    %3 = tpu.concatenate %1, %2 in 1 : vector<1x1x8x8xf32>, vector<1x7x8x8xf32> -> vector<1x8x8x8xf32>
    %4 = vector.extract_strided_slice %0 {offsets = [0, 1, 0, 0], sizes = [1, 7, 8, 8], strides = [1, 1, 1, 1]} : vector<1x8x8x8xf32> to vector<1x7x8x8xf32>
    %5 = vector.extract_strided_slice %0 {offsets = [0, 7, 0, 0], sizes = [1, 1, 8, 8], strides = [1, 1, 1, 1]} : vector<1x8x8x8xf32> to vector<1x1x8x8xf32>
    %6 = tpu.concatenate %4, %5 in 1 : vector<1x7x8x8xf32>, vector<1x1x8x8xf32> -> vector<1x8x8x8xf32>
    %cst = arith.constant 2.500000e-01 : f32
    %7 = vector.broadcast %cst : f32 to vector<1x8x8x8xf32>
    %8 = arith.mulf %7, %3 : vector<1x8x8x8xf32>
    %cst_3 = arith.constant 7.500000e-01 : f32
    %9 = vector.broadcast %cst_3 : f32 to vector<1x8x8x8xf32>
    %10 = arith.mulf %9, %0 : vector<1x8x8x8xf32>
    %11 = arith.addf %8, %10 : vector<1x8x8x8xf32>
    %cst_4 = arith.constant 7.500000e-01 : f32
    %12 = vector.broadcast %cst_4 : f32 to vector<1x8x8x8xf32>
    %13 = arith.mulf %12, %0 : vector<1x8x8x8xf32>
    %cst_5 = arith.constant 2.500000e-01 : f32
    %14 = vector.broadcast %cst_5 : f32 to vector<1x8x8x8xf32>
    %15 = arith.mulf %14, %6 : vector<1x8x8x8xf32>
    %16 = arith.addf %13, %15 : vector<1x8x8x8xf32>
    %17 = vector.extract_strided_slice %11 {offsets = [0, 0, 0, 0], sizes = [1, 8, 1, 8], strides = [1, 1, 1, 1]} : vector<1x8x8x8xf32> to vector<1x8x1x8xf32>
    %18 = vector.extract_strided_slice %11 {offsets = [0, 0, 0, 0], sizes = [1, 8, 7, 8], strides = [1, 1, 1, 1]} : vector<1x8x8x8xf32> to vector<1x8x7x8xf32>
    %19 = tpu.concatenate %17, %18 in 2 : vector<1x8x1x8xf32>, vector<1x8x7x8xf32> -> vector<1x8x8x8xf32>
    %20 = vector.extract_strided_slice %11 {offsets = [0, 0, 1, 0], sizes = [1, 8, 7, 8], strides = [1, 1, 1, 1]} : vector<1x8x8x8xf32> to vector<1x8x7x8xf32>
    %21 = vector.extract_strided_slice %11 {offsets = [0, 0, 7, 0], sizes = [1, 8, 1, 8], strides = [1, 1, 1, 1]} : vector<1x8x8x8xf32> to vector<1x8x1x8xf32>
    %22 = tpu.concatenate %20, %21 in 2 : vector<1x8x7x8xf32>, vector<1x8x1x8xf32> -> vector<1x8x8x8xf32>
    %cst_6 = arith.constant 2.500000e-01 : f32
    %23 = vector.broadcast %cst_6 : f32 to vector<1x8x8x8xf32>
    %24 = arith.mulf %23, %19 : vector<1x8x8x8xf32>
    %cst_7 = arith.constant 7.500000e-01 : f32
    %25 = vector.broadcast %cst_7 : f32 to vector<1x8x8x8xf32>
    %26 = arith.mulf %25, %11 : vector<1x8x8x8xf32>
    %27 = arith.addf %24, %26 : vector<1x8x8x8xf32>
    %cst_8 = arith.constant 7.500000e-01 : f32
    %28 = vector.broadcast %cst_8 : f32 to vector<1x8x8x8xf32>
    %29 = arith.mulf %28, %11 : vector<1x8x8x8xf32>
    %cst_9 = arith.constant 2.500000e-01 : f32
    %30 = vector.broadcast %cst_9 : f32 to vector<1x8x8x8xf32>
    %31 = arith.mulf %30, %22 : vector<1x8x8x8xf32>
    %32 = arith.addf %29, %31 : vector<1x8x8x8xf32>
    %33 = vector.extract_strided_slice %16 {offsets = [0, 0, 0, 0], sizes = [1, 8, 1, 8], strides = [1, 1, 1, 1]} : vector<1x8x8x8xf32> to vector<1x8x1x8xf32>
    %34 = vector.extract_strided_slice %16 {offsets = [0, 0, 0, 0], sizes = [1, 8, 7, 8], strides = [1, 1, 1, 1]} : vector<1x8x8x8xf32> to vector<1x8x7x8xf32>
    %35 = tpu.concatenate %33, %34 in 2 : vector<1x8x1x8xf32>, vector<1x8x7x8xf32> -> vector<1x8x8x8xf32>
    %36 = vector.extract_strided_slice %16 {offsets = [0, 0, 1, 0], sizes = [1, 8, 7, 8], strides = [1, 1, 1, 1]} : vector<1x8x8x8xf32> to vector<1x8x7x8xf32>
    %37 = vector.extract_strided_slice %16 {offsets = [0, 0, 7, 0], sizes = [1, 8, 1, 8], strides = [1, 1, 1, 1]} : vector<1x8x8x8xf32> to vector<1x8x1x8xf32>
    %38 = tpu.concatenate %36, %37 in 2 : vector<1x8x7x8xf32>, vector<1x8x1x8xf32> -> vector<1x8x8x8xf32>
    %cst_10 = arith.constant 2.500000e-01 : f32
    %39 = vector.broadcast %cst_10 : f32 to vector<1x8x8x8xf32>
    %40 = arith.mulf %39, %35 : vector<1x8x8x8xf32>
    %cst_11 = arith.constant 7.500000e-01 : f32
    %41 = vector.broadcast %cst_11 : f32 to vector<1x8x8x8xf32>
    %42 = arith.mulf %41, %16 : vector<1x8x8x8xf32>
    %43 = arith.addf %40, %42 : vector<1x8x8x8xf32>
    %cst_12 = arith.constant 7.500000e-01 : f32
    %44 = vector.broadcast %cst_12 : f32 to vector<1x8x8x8xf32>
    %45 = arith.mulf %44, %16 : vector<1x8x8x8xf32>
    %cst_13 = arith.constant 2.500000e-01 : f32
    %46 = vector.broadcast %cst_13 : f32 to vector<1x8x8x8xf32>
    %47 = arith.mulf %46, %38 : vector<1x8x8x8xf32>
    %48 = arith.addf %45, %47 : vector<1x8x8x8xf32>
    %c0_14 = arith.constant 0 : index
    %c0_15 = arith.constant 0 : index
    %c0_16 = arith.constant 0 : index
    %c0_17 = arith.constant 0 : index
    %49 = vector.load %arg2[%c0_14, %c0_15, %c0_16, %c0_17] : memref<1x8x8x8xf32, #tpu.memory_space<vmem>>, vector<1x8x8x8xf32>
    tpu.vector_store %arg2[%c0_14, %c0_15, %c0_16, %c0_17], %27 {strides = array<i32>} : memref<1x8x8x8xf32, #tpu.memory_space<vmem>>, vector<1x8x8x8xf32>,
    %c0_18 = arith.constant 0 : index
    %c0_19 = arith.constant 0 : index
    %c0_20 = arith.constant 0 : index
    %c0_21 = arith.constant 0 : index
    %50 = vector.load %arg3[%c0_18, %c0_19, %c0_20, %c0_21] : memref<1x8x8x8xf32, #tpu.memory_space<vmem>>, vector<1x8x8x8xf32>
    tpu.vector_store %arg3[%c0_18, %c0_19, %c0_20, %c0_21], %32 {strides = array<i32>} : memref<1x8x8x8xf32, #tpu.memory_space<vmem>>, vector<1x8x8x8xf32>,
    %c0_22 = arith.constant 0 : index
    %c0_23 = arith.constant 0 : index
    %c0_24 = arith.constant 0 : index
    %c0_25 = arith.constant 0 : index
    %51 = vector.load %arg4[%c0_22, %c0_23, %c0_24, %c0_25] : memref<1x8x8x8xf32, #tpu.memory_space<vmem>>, vector<1x8x8x8xf32>
    tpu.vector_store %arg4[%c0_22, %c0_23, %c0_24, %c0_25], %43 {strides = array<i32>} : memref<1x8x8x8xf32, #tpu.memory_space<vmem>>, vector<1x8x8x8xf32>,
    %c0_26 = arith.constant 0 : index
    %c0_27 = arith.constant 0 : index
    %c0_28 = arith.constant 0 : index
    %c0_29 = arith.constant 0 : index
    %52 = vector.load %arg5[%c0_26, %c0_27, %c0_28, %c0_29] : memref<1x8x8x8xf32, #tpu.memory_space<vmem>>, vector<1x8x8x8xf32>
    tpu.vector_store %arg5[%c0_26, %c0_27, %c0_28, %c0_29], %48 {strides = array<i32>} : memref<1x8x8x8xf32, #tpu.memory_space<vmem>>, vector<1x8x8x8xf32>,
    return
  }
  func.func @transform_0(%arg0: i32) -> (i32, i32, i32, i32) {
    %c0_i32 = arith.constant 0 : i32
    %c0_i32_0 = arith.constant 0 : i32
    %c0_i32_1 = arith.constant 0 : i32
    %c0_i32_2 = arith.constant 0 : i32
    return %arg0, %c0_i32, %c0_i32_0, %c0_i32_1 : i32, i32, i32, i32
  }
  func.func @transform_1(%arg0: i32) -> (i32, i32, i32, i32) {
    %c0_i32 = arith.constant 0 : i32
    %c0_i32_0 = arith.constant 0 : i32
    %c0_i32_1 = arith.constant 0 : i32
    %c0_i32_2 = arith.constant 0 : i32
    return %arg0, %c0_i32, %c0_i32_0, %c0_i32_1 : i32, i32, i32, i32
  }
  func.func @transform_2(%arg0: i32) -> (i32, i32, i32, i32) {
    %c0_i32 = arith.constant 0 : i32
    %c0_i32_0 = arith.constant 0 : i32
    %c0_i32_1 = arith.constant 0 : i32
    %c0_i32_2 = arith.constant 0 : i32
    return %arg0, %c0_i32, %c0_i32_0, %c0_i32_1 : i32, i32, i32, i32
  }
  func.func @transform_3(%arg0: i32) -> (i32, i32, i32, i32) {
    %c0_i32 = arith.constant 0 : i32
    %c0_i32_0 = arith.constant 0 : i32
    %c0_i32_1 = arith.constant 0 : i32
    %c0_i32_2 = arith.constant 0 : i32
    return %arg0, %c0_i32, %c0_i32_0, %c0_i32_1 : i32, i32, i32, i32
  }
  func.func @transform_4(%arg0: i32) -> (i32, i32, i32, i32) {
    %c0_i32 = arith.constant 0 : i32
    %c0_i32_0 = arith.constant 0 : i32
    %c0_i32_1 = arith.constant 0 : i32
    %c0_i32_2 = arith.constant 0 : i32
    return %arg0, %c0_i32, %c0_i32_0, %c0_i32_1 : i32, i32, i32, i32
  }
}

module attributes {stable_mosaic.version = 11 : i64} {
  func.func @_gemm_kernel(%arg0: i32, %arg1: memref<256x8xbf16, #tpu.memory_space<vmem>>, %arg2: memref<8x3xbf16, #tpu.memory_space<vmem>>, %arg3: memref<1x3xf32, #tpu.memory_space<vmem>>, %arg4: memref<256x3xf32, #tpu.memory_space<vmem>>) attributes {dimension_semantics = [#tpu.dimension_semantics<parallel>], iteration_bounds = array<i64: 2>, scalar_prefetch = 0 : i64, scratch_operands = 0 : i64, tpu.core_type = #tpu.core_type<tc>, window_params = [{transform_indices = @transform_0, window_bounds = array<i64: 256, 8>}, {pipeline_mode = #tpu.pipeline_mode<synchronous>, transform_indices = @transform_1, window_bounds = array<i64: 8, 3>}, {pipeline_mode = #tpu.pipeline_mode<synchronous>, transform_indices = @transform_2, window_bounds = array<i64: 1, 3>}, {transform_indices = @transform_3, window_bounds = array<i64: 256, 3>}]} {
    %c0 = arith.constant 0 : index
    %c0_0 = arith.constant 0 : index
    %0 = vector.load %arg1[%c0, %c0_0] : memref<256x8xbf16, #tpu.memory_space<vmem>>, vector<256x8xbf16>
    %c0_1 = arith.constant 0 : index
    %c0_2 = arith.constant 0 : index
    %1 = vector.load %arg2[%c0_1, %c0_2] : memref<8x3xbf16, #tpu.memory_space<vmem>>, vector<8x3xbf16>
    %cst = arith.constant dense<0.000000e+00> : vector<256x3xf32>
    %2 = tpu.matmul %0, %1, %cst {dimension_numbers = #tpu.dot_dimension_numbers<[1], [0], [0], [1], [0, 0, 1, 1], [], []>} : vector<256x8xbf16>, vector<8x3xbf16>, vector<256x3xf32> -> vector<256x3xf32>
    %c0_3 = arith.constant 0 : index
    %c0_4 = arith.constant 0 : index
    %3 = vector.load %arg3[%c0_3, %c0_4] : memref<1x3xf32, #tpu.memory_space<vmem>>, vector<1x3xf32>
    %4 = vector.broadcast %3 : vector<1x3xf32> to vector<256x3xf32>
    %5 = arith.addf %2, %4 : vector<256x3xf32>
    %c0_5 = arith.constant 0 : index
    %c0_6 = arith.constant 0 : index
    %6 = vector.load %arg4[%c0_5, %c0_6] : memref<256x3xf32, #tpu.memory_space<vmem>>, vector<256x3xf32>
    tpu.vector_store %arg4[%c0_5, %c0_6], %5 {strides = array<i32>} : memref<256x3xf32, #tpu.memory_space<vmem>>, vector<256x3xf32>,
    return
  }
  func.func @transform_0(%arg0: i32) -> (i32, i32) {
    %c0_i32 = arith.constant 0 : i32
    %c0_i32_0 = arith.constant 0 : i32
    return %arg0, %c0_i32 : i32, i32
  }
  func.func @transform_1(%arg0: i32) -> (i32, i32) {
    %c0_i32 = arith.constant 0 : i32
    %c0_i32_0 = arith.constant 0 : i32
    %c0_i32_1 = arith.constant 0 : i32
    return %c0_i32, %c0_i32_0 : i32, i32
  }
  func.func @transform_2(%arg0: i32) -> (i32, i32) {
    %c0_i32 = arith.constant 0 : i32
    %c0_i32_0 = arith.constant 0 : i32
    %c0_i32_1 = arith.constant 0 : i32
    return %c0_i32, %c0_i32_0 : i32, i32
  }
  func.func @transform_3(%arg0: i32) -> (i32, i32) {
    %c0_i32 = arith.constant 0 : i32
    %c0_i32_0 = arith.constant 0 : i32
    return %arg0, %c0_i32 : i32, i32
  }
}

</mosaic_0001>

<bundles_post_ra>
// kernel: dipnet_forward.24
= control target key start
LH: loop header
LB: loop body
LE: loop exit
PB: predicated region body
PF: predicated region fallthrough
CT: control target
= control target key end

     0   :  { %s73_s0 = inlined_call_operand.vmem [shape: f32[8,128], index: 0, kind: input, shape index: {}]   ;;  %s74_s1 = inlined_call_operand.vmem [shape: f32[1,128], index: 1, kind: input, shape index: {}]   ;;  %s75_s2 = inlined_call_operand.vmem [shape: f32[1,128], index: 2, kind: input, shape index: {}]   ;;  %s76_s3 = inlined_call_operand.vmem [shape: f32[8,128], index: 3, kind: output, shape index: {}]  }
   0x1   :  { %v14_v0 = vld [vmem:[%s73_s0] sm:$0xff] }
   0x2   :  { %v39_v1 = vld [vmem:[%s74_s1] ss:$0 sm:$0xff] }
   0x3   :  { %v40_v2 = vld [vmem:[%s75_s2] ss:$0 sm:$0xff]  ;;  %v22_v3 = vmul.f32 %v39_v1, %v14_v0 }
   0x5   :  { %v30_v4 = vadd.f32 %v40_v2, %v22_v3 }
   0x7   :  { %vm31_vm0 = vcmp.gt.f32.partialorder %v30_v4, 0.0  ;;  %v32_v5 = vmul.f32 0.1, %v30_v4 }
   0x9   :  { %v33_v6 = vsel %vm31_vm0, %v30_v4, %v32_v5 }
   0xa   :  { %34 = vst [vmem:[%s76_s3] sm:$0xff] %v33_v6 }

// kernel: dipnet_forward.23
= control target key start
LH: loop header
LB: loop body
LE: loop exit
PB: predicated region body
PF: predicated region fallthrough
CT: control target
= control target key end

     0   :  { %s610_s18 = smov 0   ;;  %s695_s0 = inlined_call_operand.vmem [shape: bf16[128,36], index: 0, kind: input, shape index: {}]   ;;  %s696_s1 = inlined_call_operand.vmem [shape: bf16[36,8], index: 1, kind: input, shape index: {}]   ;;  %s697_s2 = inlined_call_operand.vmem [shape: f32[1,8], index: 2, kind: input, shape index: {}]   ;;  %s698_s3 = inlined_call_operand.vmem [shape: f32[128,8], index: 3, kind: output, shape index: {0}]   ;;  %s699_s4 = inlined_call_operand.vmem [shape: f32[1,8], index: 4, kind: output, shape index: {1}]   ;;  %s700_s5 = inlined_call_operand.vmem [shape: f32[1,8], index: 5, kind: output, shape index: {2}]  }
   0x1 LB: > { %s502_s19 = sadd.s32 4294967295, %s577_s18   ;;  %p506_p0 = scmp.ge.s32.totalorder %s577_s18, 1  ;;  %s577_s18 = sphi %s610_s18, %s16_s18  }
   0x2   : > { %p183_p1 = scmp.lt.s32.totalorder %s577_s18, 3 }
   0x4   : > { %p184_p2 = pnand %p506_p0, %p183_p1 }
   0x5   : > { %s507_s20 = sshll.u32 (!%p184_p2), %s502_s19, 3  ;;  %p511_p4 = scmp.ne.s32.totalorder (!%p184_p2), %s502_s19, 0 }
   0x6   : > { %187 = sbr.rel (%p184_p2) target bundleno = 264 (0x108), region = 32  ;;  %p212_p3 = scmp.lt.s32.totalorder (!%p184_p2), %s507_s20, 15 }
   0xb   : > { %s702_s20 = smov (!%p212_p3, %s507_s20), 15  ;;  %227 = sbr.rel (%p511_p4) target bundleno = 18 (0x12), region = 36 }
   0xc   : > { %s508_s21 = sshll.u32 %s702_s20, 2  ;;  %s510_s22 = sshll.u32 %s702_s20, 3 }
   0xd   : > { %s215_s25 = scalar_lea.vmem %s695_s0, %s508_s21  ;;  %s624_s28 = scalar_lea.vmem %s698_s3, %s510_s22 }
  0x10   : > { %vm228_vm0 = vcmask 57344   ;;  %v579_v0 = vmov 0.0  }
  0x11   : > { %229 = vst.msk [vmem:[%s699_s4] sm:$0x1] %vm228_vm0, %v579_v0  ;;  %230 = vst.msk [vmem:[%s700_s5] sm:$0x1] %vm228_vm0, %v579_v0 }
  0x12 PF: > { %v564_v1 = vld [vmem:[%s696_s1 + $0x10] ss:$0 sps:$4 sm:$0x33]   ;;  %vm299_vm1 = vcmask 1041408   ;;  %v565_v2 = vld [vmem:[%s696_s1 + $0x8] sm:$0xff]   ;;  %vm286_vm2 = vcmask 293888  }
  0x13   : > { %553 = vmatprep.subr.msk.bf16.mxu0 %vm299_vm1, %v564_v1  ;;  %v301_v3 = vsel %vm299_vm1, %v564_v1, 0  ;;  %554 = vmatprep.subr.msk.bf16.mxu1 %vm299_vm1, %v564_v1  ;;  %v567_v4 = vld [vmem:[%s215_s25] sm:$0xff]   ;;  %v569_v6 = vld [vmem:[%s215_s25 + $0x10] sm:$0xff]   ;;  %v568_v7 = vld [vmem:[%s215_s25 + $0x8] sm:$0xff]   ;;  %vm368_vm3 = vcmask 64512   ;;  %vm400_vm4 = vcmask 57344  }
  0x14   : > { %534 = vmatpush3.bf16.msra.mxu0 %v301_v3  ;;  %550 = vmatpush3.bf16.msra.mxu1 %v301_v3  ;;  %v566_v5 = vld [vmem:[%s696_s1] sm:$0xff]   ;;  %v570_v8 = vld [vmem:[%s215_s25 + $0x18] sm:$0xff]  }
  0x15   : > { %535 = vmatprep.subr.bf16.mxu0 %v565_v2  ;;  %548 = vmatprep.subr.bf16.mxu1 %v565_v2  ;;  %v512_v9 = vld [vmem:[%s697_s2] ss:$0 sm:$0xff] }
  0x16   : > { %539 = vmatprep.mubr.msk.bf16.mxu0 %vm286_vm2, %v567_v4  ;;  %543 = vmatprep.mubr.msk.bf16.mxu1 %vm286_vm2, %v569_v6 }
  0x18   : > { %536 = vmatpush3.bf16.msra.mxu0 %v565_v2  ;;  %551 = vmatpush3.bf16.msra.mxu1 %v565_v2 }
  0x19   : > { %537 = vmatprep.subr.bf16.mxu0 %v566_v5  ;;  %549 = vmatprep.subr.bf16.mxu1 %v566_v5 }
  0x1c   : > { %538 = vmatpush3.bf16.msra.mxu0 %v566_v5  ;;  %552 = vmatpush3.bf16.msra.mxu1 %v566_v5 }
  0x1f   : > { %540 = vmatmul.mubr.msk.bf16.vlgmr.msra.gmra.mxu0 %vm286_vm2, %v568_v7  ;;  %544 = vmatmul.mubr.msk.bf16.vlgmr.msra.gmra.mxu1 %vm286_vm2, %v570_v8 }
  0xdf   : > { %v541_v10 = vpop.f32.mrf.mxu0  ;;  %v545_v11 = vpop.f32.mrf.mxu1 }
  0xe0   : > { %v346_v12 = vadd.f32 %v541_v10, %v512_v9  ;;  %v362_v13 = vadd.f32 %v545_v11, %v512_v9 }
  0xe1   : > { %v337_v14 = vpop.f32.mrf.mxu0  ;;  %v353_v15 = vpop.f32.mrf.mxu1 }
  0xe2   : > { %371 = vst.msk [vmem:[%s624_s28 + $0x10] sm:$0xff] %vm368_vm3, %v346_v12  ;;  %v338_v16 = vadd.f32 %v512_v9, %v337_v14  ;;  %375 = vst.msk [vmem:[%s624_s28 + $0x30] sm:$0xff] %vm368_vm3, %v362_v13  ;;  %v354_v18 = vadd.f32 %v512_v9, %v353_v15  ;;  %v405_v27 = vmul.f32 %v346_v12, %v346_v12  ;;  %v381_v32 = vsel %vm368_vm3, %v346_v12, 0.0  ;;  %v402_v12 = vld [vmem:[%s700_s5] sm:$0x1] }
  0xe3   : > { %v542_v17 = vpop.f32.mrf.mxu0  ;;  %v546_v19 = vpop.f32.mrf.mxu1  ;;  %v409_v48 = vmul.f32 %v362_v13, %v362_v13  ;;  %v389_v53 = vsel %vm368_vm3, %v362_v13, 0.0 }
  0xe4   : > { %369 = vst.msk [vmem:[%s624_s28] sm:$0xff] %vm368_vm3, %v338_v16  ;;  %v349_v20 = vadd.f32 %v542_v17, %v512_v9  ;;  %373 = vst.msk [vmem:[%s624_s28 + $0x20] sm:$0xff] %vm368_vm3, %v354_v18  ;;  %v365_v22 = vadd.f32 %v546_v19, %v512_v9  ;;  %v403_v24 = vmul.f32 %v338_v16, %v338_v16  ;;  %v378_v28 = vsel %vm368_vm3, %v338_v16, 0.0 }
  0xe5   : > { %v340_v21 = vpop.f32.mrf.mxu0  ;;  %v356_v23 = vpop.f32.mrf.mxu1  ;;  %v414_v38 = vsel %vm368_vm3, %v405_v27, 0.0  ;;  %v407_v40 = vmul.f32 %v354_v18, %v354_v18  ;;  %v385_v44 = vsel %vm368_vm3, %v354_v18, 0.0  ;;  %v422_v58 = vsel %vm368_vm3, %v409_v48, 0.0 }
  0xe6   : > { %372 = vst.msk [vmem:[%s624_s28 + $0x18] sm:$0xff] %vm368_vm3, %v349_v20  ;;  %v341_v25 = vadd.f32 %v512_v9, %v340_v21  ;;  %376 = vst.msk [vmem:[%s624_s28 + $0x38] sm:$0xff] %vm368_vm3, %v365_v22  ;;  %v357_v26 = vadd.f32 %v512_v9, %v356_v23  ;;  %v411_v33 = vsel %vm368_vm3, %v403_v24, 0.0  ;;  %v406_v34 = vmul.f32 %v349_v20, %v349_v20  ;;  %v377_v9 = vld [vmem:[%s699_s4] sm:$0x1] }
  0xe7   : > { %v383_v39 = vsel %vm368_vm3, %v349_v20, 0.0  ;;  %v418_v49 = vsel %vm368_vm3, %v407_v40, 0.0  ;;  %v410_v54 = vmul.f32 %v365_v22, %v365_v22  ;;  %v391_v59 = vsel %vm368_vm3, %v365_v22, 0.0 }
  0xe8   : > { %370 = vst.msk [vmem:[%s624_s28 + $0x8] sm:$0xff] %vm368_vm3, %v341_v25  ;;  %v379_v29 = vsel %vm368_vm3, %v341_v25, 0.0  ;;  %v404_v30 = vmul.f32 %v341_v25, %v341_v25  ;;  %374 = vst.msk [vmem:[%s624_s28 + $0x28] sm:$0xff] %vm368_vm3, %v357_v26  ;;  %v416_v43 = vsel %vm368_vm3, %v406_v34, 0.0  ;;  %v408_v45 = vmul.f32 %v357_v26, %v357_v26 }
  0xe9   : > { %v380_v31 = vadd.f32 %v379_v29, %v378_v28  ;;  %v387_v50 = vsel %vm368_vm3, %v357_v26, 0.0  ;;  %v424_v62 = vsel %vm368_vm3, %v410_v54, 0.0 }
  0xea   : > { %v412_v35 = vsel %vm368_vm3, %v404_v30, 0.0  ;;  %v420_v55 = vsel %vm368_vm3, %v408_v45, 0.0 }
  0xeb   : > { %v382_v36 = vadd.f32 %v381_v32, %v380_v31  ;;  %v413_v37 = vadd.f32 %v412_v35, %v411_v33 }
  0xed   : > { %v415_v41 = vadd.f32 %v414_v38, %v413_v37  ;;  %v384_v42 = vadd.f32 %v383_v39, %v382_v36 }
  0xef   : > { %v386_v46 = vadd.f32 %v385_v44, %v384_v42  ;;  %v417_v47 = vadd.f32 %v416_v43, %v415_v41 }
  0xf1   : > { %v388_v51 = vadd.f32 %v387_v50, %v386_v46  ;;  %v419_v52 = vadd.f32 %v418_v49, %v417_v47 }
  0xf3   : > { %v390_v56 = vadd.f32 %v389_v53, %v388_v51  ;;  %v421_v57 = vadd.f32 %v420_v55, %v419_v52 }
  0xf5   : > { %v392_v60 = vadd.f32 %v391_v59, %v390_v56  ;;  %v423_v61 = vadd.f32 %v422_v58, %v421_v57 }
  0xf7   : > { %v393_v63 = vrot.slane %v392_v60, 4  ;;  %v425_v0 = vadd.f32 %v424_v62, %v423_v61 }
  0xf9   : > { %v394_v1 = vadd.f32 %v393_v63, %v392_v60  ;;  %v426_v2 = vrot.slane %v425_v0, 4 }
  0xfb   : > { %v395_v3 = vrot.slane %v394_v1, 2  ;;  %v427_v4 = vadd.f32 %v426_v2, %v425_v0 }
  0xfd   : > { %v396_v5 = vadd.f32 %v395_v3, %v394_v1  ;;  %v428_v6 = vrot.slane %v427_v4, 2 }
  0xff   : > { %v397_v7 = vrot.slane %v396_v5, 1  ;;  %v429_v8 = vadd.f32 %v428_v6, %v427_v4 }
 0x101   : > { %v398_v10 = vadd.f32 %v397_v7, %v396_v5  ;;  %v430_v11 = vrot.slane %v429_v8, 1 }
 0x103   : > { %v399_v13 = vadd.f32 %v398_v10, %v377_v9  ;;  %v431_v14 = vadd.f32 %v430_v11, %v429_v8 }
 0x105   : > { %401 = vst.msk [vmem:[%s699_s4] sm:$0x1] %vm400_vm4, %v399_v13  ;;  %v432_v15 = vadd.f32 %v431_v14, %v402_v12 }
 0x107   : > { %433 = vst.msk [vmem:[%s700_s5] sm:$0x1] %vm400_vm4, %v432_v15 }
 0x108 PF: > { %s16_s18 = sadd.s32 1, %s577_s18  }
 0x109   : > { %p13_p5 = scmp.ge.s32.totalorder %s16_s18, 4  }
 0x10b   :  { %15 = sbr.rel (!%p13_p5) target bundleno = 1 (0x1), region = 82 }

// kernel: dipnet_forward.25
= control target key start
LH: loop header
LB: loop body
LE: loop exit
PB: predicated region body
PF: predicated region fallthrough
CT: control target
= control target key end

     0   :  { %s640_s18 = smov 0   ;;  %s737_s0 = inlined_call_operand.vmem [shape: bf16[128,72], index: 0, kind: input, shape index: {}]   ;;  %s738_s1 = inlined_call_operand.vmem [shape: bf16[72,8], index: 1, kind: input, shape index: {}]   ;;  %s739_s2 = inlined_call_operand.vmem [shape: f32[1,8], index: 2, kind: input, shape index: {}]   ;;  %s740_s3 = inlined_call_operand.vmem [shape: f32[128,8], index: 3, kind: output, shape index: {0}]   ;;  %s741_s4 = inlined_call_operand.vmem [shape: f32[1,8], index: 4, kind: output, shape index: {1}]   ;;  %s742_s5 = inlined_call_operand.vmem [shape: f32[1,8], index: 5, kind: output, shape index: {2}]  }
   0x1 LB: > { %s518_s19 = sadd.s32 4294967295, %s607_s18   ;;  %p522_p0 = scmp.ge.s32.totalorder %s607_s18, 1  ;;  %s607_s18 = sphi %s640_s18, %s16_s18  }
   0x2   : > { %p183_p1 = scmp.lt.s32.totalorder %s607_s18, 3 }
   0x4   : > { %p184_p2 = pnand %p522_p0, %p183_p1 }
   0x5   : > { %s523_s20 = sshll.u32 (!%p184_p2), %s518_s19, 3  ;;  %p527_p4 = scmp.ne.s32.totalorder (!%p184_p2), %s518_s19, 0 }
   0x6   : > { %187 = sbr.rel (%p184_p2) target bundleno = 272 (0x110), region = 32  ;;  %p212_p3 = scmp.lt.s32.totalorder (!%p184_p2), %s523_s20, 15 }
   0xb   : > { %s744_s20 = smov (!%p212_p3, %s523_s20), 15  ;;  %227 = sbr.rel (%p527_p4) target bundleno = 18 (0x12), region = 36 }
   0xc   : > { %s524_s21 = sshll.u32 %s744_s20, 2  ;;  %s526_s22 = sshll.u32 %s744_s20, 3 }
   0xd   : > { %s651_s25 = scalar_lea.vmem %s737_s0, %s524_s21  ;;  %s656_s28 = scalar_lea.vmem %s740_s3, %s526_s22 }
  0x10   : > { %vm228_vm0 = vcmask 57344   ;;  %v609_v0 = vmov 0.0  }
  0x11   : > { %229 = vst.msk [vmem:[%s741_s4] sm:$0x1] %vm228_vm0, %v609_v0  ;;  %230 = vst.msk [vmem:[%s742_s5] sm:$0x1] %vm228_vm0, %v609_v0 }
  0x12 PF: > { %v592_v1 = vld [vmem:[%s738_s1 + $0x20] ss:$0 sps:$4 sm:$0xff]   ;;  %vm315_vm1 = vcmask 1043456   ;;  %v593_v2 = vld [vmem:[%s738_s1 + $0x18] sm:$0xff]   ;;  %v594_v4 = vld [vmem:[%s738_s1 + $0x10] sm:$0xff]   ;;  %vm302_vm2 = vcmask 588800  }
  0x13   : > { %581 = vmatprep.subr.msk.bf16.mxu0 %vm315_vm1, %v592_v1  ;;  %v317_v3 = vsel %vm315_vm1, %v592_v1, 0  ;;  %582 = vmatprep.subr.msk.bf16.mxu1 %vm315_vm1, %v592_v1  ;;  %v597_v5 = vld [vmem:[%s651_s25] sm:$0xff]   ;;  %v599_v6 = vld [vmem:[%s651_s25 + $0x10] sm:$0xff]   ;;  %v595_v7 = vld [vmem:[%s738_s1 + $0x8] sm:$0xff]   ;;  %vm384_vm3 = vcmask 64512   ;;  %vm416_vm4 = vcmask 57344  }
  0x14   : > { %554 = vmatpush3.bf16.msra.mxu0 %v317_v3  ;;  %576 = vmatpush3.bf16.msra.mxu1 %v317_v3  ;;  %v596_v8 = vld [vmem:[%s738_s1] sm:$0xff]   ;;  %v598_v9 = vld [vmem:[%s651_s25 + $0x8] sm:$0xff]   ;;  %v600_v10 = vld [vmem:[%s651_s25 + $0x18] sm:$0xff]  }
  0x15   : > { %555 = vmatprep.subr.bf16.mxu0 %v593_v2  ;;  %572 = vmatprep.subr.bf16.mxu1 %v593_v2  ;;  %v528_v11 = vld [vmem:[%s739_s2] ss:$0 sm:$0xff] }
  0x16   : > { %563 = vmatprep.mubr.msk.bf16.mxu0 %vm302_vm2, %v597_v5  ;;  %567 = vmatprep.mubr.msk.bf16.mxu1 %vm302_vm2, %v599_v6 }
  0x18   : > { %556 = vmatpush3.bf16.msra.mxu0 %v593_v2  ;;  %577 = vmatpush3.bf16.msra.mxu1 %v593_v2 }
  0x19   : > { %557 = vmatprep.subr.bf16.mxu0 %v594_v4  ;;  %573 = vmatprep.subr.bf16.mxu1 %v594_v4 }
  0x1c   : > { %558 = vmatpush3.bf16.msra.mxu0 %v594_v4  ;;  %578 = vmatpush3.bf16.msra.mxu1 %v594_v4 }
  0x1d   : > { %559 = vmatprep.subr.bf16.mxu0 %v595_v7  ;;  %574 = vmatprep.subr.bf16.mxu1 %v595_v7 }
  0x20   : > { %560 = vmatpush3.bf16.msra.mxu0 %v595_v7  ;;  %579 = vmatpush3.bf16.msra.mxu1 %v595_v7 }
  0x21   : > { %561 = vmatprep.subr.bf16.mxu0 %v596_v8  ;;  %575 = vmatprep.subr.bf16.mxu1 %v596_v8 }
  0x24   : > { %562 = vmatpush3.bf16.msra.mxu0 %v596_v8  ;;  %580 = vmatpush3.bf16.msra.mxu1 %v596_v8 }
  0x27   : > { %564 = vmatmul.mubr.msk.bf16.vlgmr.msra.gmra.mxu0 %vm302_vm2, %v598_v9  ;;  %568 = vmatmul.mubr.msk.bf16.vlgmr.msra.gmra.mxu1 %vm302_vm2, %v600_v10 }
  0xe7   : > { %v565_v12 = vpop.f32.mrf.mxu0  ;;  %v569_v13 = vpop.f32.mrf.mxu1 }
  0xe8   : > { %v362_v14 = vadd.f32 %v565_v12, %v528_v11  ;;  %v378_v15 = vadd.f32 %v569_v13, %v528_v11 }
  0xe9   : > { %v353_v16 = vpop.f32.mrf.mxu0  ;;  %v369_v17 = vpop.f32.mrf.mxu1 }
  0xea   : > { %387 = vst.msk [vmem:[%s656_s28 + $0x10] sm:$0xff] %vm384_vm3, %v362_v14  ;;  %v354_v18 = vadd.f32 %v528_v11, %v353_v16  ;;  %391 = vst.msk [vmem:[%s656_s28 + $0x30] sm:$0xff] %vm384_vm3, %v378_v15  ;;  %v370_v20 = vadd.f32 %v528_v11, %v369_v17  ;;  %v421_v29 = vmul.f32 %v362_v14, %v362_v14  ;;  %v397_v34 = vsel %vm384_vm3, %v362_v14, 0.0  ;;  %v418_v14 = vld [vmem:[%s742_s5] sm:$0x1] }
  0xeb   : > { %v566_v19 = vpop.f32.mrf.mxu0  ;;  %v570_v21 = vpop.f32.mrf.mxu1  ;;  %v425_v50 = vmul.f32 %v378_v15, %v378_v15  ;;  %v405_v55 = vsel %vm384_vm3, %v378_v15, 0.0 }
  0xec   : > { %385 = vst.msk [vmem:[%s656_s28] sm:$0xff] %vm384_vm3, %v354_v18  ;;  %v365_v22 = vadd.f32 %v566_v19, %v528_v11  ;;  %389 = vst.msk [vmem:[%s656_s28 + $0x20] sm:$0xff] %vm384_vm3, %v370_v20  ;;  %v381_v24 = vadd.f32 %v570_v21, %v528_v11  ;;  %v419_v26 = vmul.f32 %v354_v18, %v354_v18  ;;  %v394_v30 = vsel %vm384_vm3, %v354_v18, 0.0 }
  0xed   : > { %v356_v23 = vpop.f32.mrf.mxu0  ;;  %v372_v25 = vpop.f32.mrf.mxu1  ;;  %v430_v40 = vsel %vm384_vm3, %v421_v29, 0.0  ;;  %v423_v42 = vmul.f32 %v370_v20, %v370_v20  ;;  %v401_v46 = vsel %vm384_vm3, %v370_v20, 0.0  ;;  %v438_v60 = vsel %vm384_vm3, %v425_v50, 0.0 }
  0xee   : > { %388 = vst.msk [vmem:[%s656_s28 + $0x18] sm:$0xff] %vm384_vm3, %v365_v22  ;;  %v357_v27 = vadd.f32 %v528_v11, %v356_v23  ;;  %392 = vst.msk [vmem:[%s656_s28 + $0x38] sm:$0xff] %vm384_vm3, %v381_v24  ;;  %v373_v28 = vadd.f32 %v528_v11, %v372_v25  ;;  %v427_v35 = vsel %vm384_vm3, %v419_v26, 0.0  ;;  %v422_v36 = vmul.f32 %v365_v22, %v365_v22  ;;  %v393_v11 = vld [vmem:[%s741_s4] sm:$0x1] }
  0xef   : > { %v399_v41 = vsel %vm384_vm3, %v365_v22, 0.0  ;;  %v434_v51 = vsel %vm384_vm3, %v423_v42, 0.0  ;;  %v426_v56 = vmul.f32 %v381_v24, %v381_v24  ;;  %v407_v61 = vsel %vm384_vm3, %v381_v24, 0.0 }
  0xf0   : > { %386 = vst.msk [vmem:[%s656_s28 + $0x8] sm:$0xff] %vm384_vm3, %v357_v27  ;;  %v395_v31 = vsel %vm384_vm3, %v357_v27, 0.0  ;;  %v420_v32 = vmul.f32 %v357_v27, %v357_v27  ;;  %390 = vst.msk [vmem:[%s656_s28 + $0x28] sm:$0xff] %vm384_vm3, %v373_v28  ;;  %v432_v45 = vsel %vm384_vm3, %v422_v36, 0.0  ;;  %v424_v47 = vmul.f32 %v373_v28, %v373_v28 }
  0xf1   : > { %v396_v33 = vadd.f32 %v395_v31, %v394_v30  ;;  %v403_v52 = vsel %vm384_vm3, %v373_v28, 0.0  ;;  %v440_v0 = vsel %vm384_vm3, %v426_v56, 0.0 }
  0xf2   : > { %v428_v37 = vsel %vm384_vm3, %v420_v32, 0.0  ;;  %v436_v57 = vsel %vm384_vm3, %v424_v47, 0.0 }
  0xf3   : > { %v398_v38 = vadd.f32 %v397_v34, %v396_v33  ;;  %v429_v39 = vadd.f32 %v428_v37, %v427_v35 }
  0xf5   : > { %v431_v43 = vadd.f32 %v430_v40, %v429_v39  ;;  %v400_v44 = vadd.f32 %v399_v41, %v398_v38 }
  0xf7   : > { %v402_v48 = vadd.f32 %v401_v46, %v400_v44  ;;  %v433_v49 = vadd.f32 %v432_v45, %v431_v43 }
  0xf9   : > { %v404_v53 = vadd.f32 %v403_v52, %v402_v48  ;;  %v435_v54 = vadd.f32 %v434_v51, %v433_v49 }
  0xfb   : > { %v406_v58 = vadd.f32 %v405_v55, %v404_v53  ;;  %v437_v59 = vadd.f32 %v436_v57, %v435_v54 }
  0xfd   : > { %v408_v62 = vadd.f32 %v407_v61, %v406_v58  ;;  %v439_v63 = vadd.f32 %v438_v60, %v437_v59 }
  0xff   : > { %v409_v1 = vrot.slane %v408_v62, 4  ;;  %v441_v2 = vadd.f32 %v440_v0, %v439_v63 }
 0x101   : > { %v410_v3 = vadd.f32 %v409_v1, %v408_v62  ;;  %v442_v4 = vrot.slane %v441_v2, 4 }
 0x103   : > { %v411_v5 = vrot.slane %v410_v3, 2  ;;  %v443_v6 = vadd.f32 %v442_v4, %v441_v2 }
 0x105   : > { %v412_v7 = vadd.f32 %v411_v5, %v410_v3  ;;  %v444_v8 = vrot.slane %v443_v6, 2 }
 0x107   : > { %v413_v9 = vrot.slane %v412_v7, 1  ;;  %v445_v10 = vadd.f32 %v444_v8, %v443_v6 }
 0x109   : > { %v414_v12 = vadd.f32 %v413_v9, %v412_v7  ;;  %v446_v13 = vrot.slane %v445_v10, 1 }
 0x10b   : > { %v415_v15 = vadd.f32 %v414_v12, %v393_v11  ;;  %v447_v16 = vadd.f32 %v446_v13, %v445_v10 }
 0x10d   : > { %417 = vst.msk [vmem:[%s741_s4] sm:$0x1] %vm416_vm4, %v415_v15  ;;  %v448_v17 = vadd.f32 %v447_v16, %v418_v14 }
 0x10f   : > { %449 = vst.msk [vmem:[%s742_s5] sm:$0x1] %vm416_vm4, %v448_v17 }
 0x110 PF: > { %s16_s18 = sadd.s32 1, %s607_s18  }
 0x111   : > { %p13_p5 = scmp.ge.s32.totalorder %s16_s18, 4  }
 0x113   :  { %15 = sbr.rel (!%p13_p5) target bundleno = 1 (0x1), region = 82 }

// kernel: dipnet_forward.27
= control target key start
LH: loop header
LB: loop body
LE: loop exit
PB: predicated region body
PF: predicated region fallthrough
CT: control target
= control target key end

     0   :  { %s526_s18 = smov 0   ;;  %s583_s0 = inlined_call_operand.vmem [shape: bf16[32,72], index: 0, kind: input, shape index: {}]   ;;  %s584_s1 = inlined_call_operand.vmem [shape: bf16[72,8], index: 1, kind: input, shape index: {}]   ;;  %s585_s2 = inlined_call_operand.vmem [shape: f32[1,8], index: 2, kind: input, shape index: {}]   ;;  %s586_s3 = inlined_call_operand.vmem [shape: f32[32,8], index: 3, kind: output, shape index: {0}]   ;;  %s587_s4 = inlined_call_operand.vmem [shape: f32[1,8], index: 4, kind: output, shape index: {1}]   ;;  %s588_s5 = inlined_call_operand.vmem [shape: f32[1,8], index: 5, kind: output, shape index: {2}]  }
   0x1 LB: > { %s428_s19 = sadd.s32 4294967295, %s491_s18   ;;  %p432_p0 = scmp.ge.s32.totalorder %s491_s18, 1  ;;  %s491_s18 = sphi %s526_s18, %s16_s18  }
   0x2   : > { %p183_p1 = scmp.lt.s32.totalorder %s491_s18, 3 }
   0x4   : > { %p184_p2 = pnand %p432_p0, %p183_p1 }
   0x5   : > { %s433_s20 = sshll.u32 (!%p184_p2), %s428_s19, 1  ;;  %p437_p4 = scmp.ne.s32.totalorder (!%p184_p2), %s428_s19, 0 }
   0x6   : > { %187 = sbr.rel (%p184_p2) target bundleno = 258 (0x102), region = 32  ;;  %p212_p3 = scmp.lt.s32.totalorder (!%p184_p2), %s433_s20, 3 }
   0xb   : > { %s590_s20 = smov (!%p212_p3, %s433_s20), 3  ;;  %227 = sbr.rel (%p437_p4) target bundleno = 18 (0x12), region = 36 }
   0xc   : > { %s434_s21 = sshll.u32 %s590_s20, 2  ;;  %s436_s22 = sshll.u32 %s590_s20, 3 }
   0xd   : > { %s215_s25 = scalar_lea.vmem %s583_s0, %s434_s21  ;;  %s540_s28 = scalar_lea.vmem %s586_s3, %s436_s22 }
  0x10   : > { %vm228_vm0 = vcmask 57344   ;;  %v493_v0 = vmov 0.0  }
  0x11   : > { %229 = vst.msk [vmem:[%s587_s4] sm:$0x1] %vm228_vm0, %v493_v0  ;;  %230 = vst.msk [vmem:[%s588_s5] sm:$0x1] %vm228_vm0, %v493_v0 }
  0x12 PF: > { %v479_v1 = vld [vmem:[%s584_s1 + $0x20] ss:$0 sps:$4 sm:$0xff]   ;;  %vm285_vm1 = vcmask 1043456   ;;  %v494_v2 = vmov 0.0   ;;  %vm495_vm2 = vmmov 0   ;;  %v480_v4 = vld [vmem:[%s584_s1 + $0x18] sm:$0xff]  }
  0x13   : > { %454 = vmatprep.subr.bf16.mxu0 %v494_v2  ;;  %v287_v3 = vsel %vm285_vm1, %v479_v1, 0  ;;  %464 = vmatprep.mubr.msk.bf16.mxu0 %vm495_vm2, %v494_v2  ;;  %v481_v5 = vld [vmem:[%s584_s1 + $0x10] sm:$0xff]   ;;  %v482_v6 = vld [vmem:[%s584_s1 + $0x8] sm:$0xff]   ;;  %v483_v7 = vld [vmem:[%s584_s1] sm:$0xff]   ;;  %vm281_vm3 = vcmask 588800   ;;  %vm330_vm4 = vcmask 64512  }
  0x14   : > { %455 = vmatpush3.bf16.msra.mxu0 %v287_v3  ;;  %v484_v8 = vld [vmem:[%s215_s25] sm:$0xff]   ;;  %vm344_vm5 = vcmask 57344  }
  0x15   : > { %456 = vmatprep.subr.bf16.mxu0 %v494_v2  ;;  %v438_v9 = vld [vmem:[%s585_s2] ss:$0 sm:$0xff] }
  0x18   : > { %457 = vmatpush3.bf16.msra.mxu0 %v480_v4  ;;  %v333_v33 = vld [vmem:[%s587_s4] sm:$0x1] }
  0x19   : > { %458 = vmatprep.subr.bf16.mxu0 %v494_v2  ;;  %v346_v36 = vld [vmem:[%s588_s5] sm:$0x1] }
  0x1c   : > { %459 = vmatpush3.bf16.msra.mxu0 %v481_v5 }
  0x1d   : > { %460 = vmatprep.subr.bf16.mxu0 %v494_v2 }
  0x20   : > { %461 = vmatpush3.bf16.msra.mxu0 %v482_v6 }
  0x21   : > { %462 = vmatprep.subr.bf16.mxu0 %v494_v2 }
  0x24   : > { %463 = vmatpush3.bf16.msra.mxu0 %v483_v7 }
  0x27   : > { %465 = vmatmul.mubr.msk.bf16.vlgmr.msra.gmra.mxu0 %vm281_vm3, %v484_v8 }
  0xe7   : > { %v323_v10 = vpop.f32.mrf.mxu0 }
  0xe8   : > { %v324_v11 = vadd.f32 %v438_v9, %v323_v10 }
  0xe9   : > { %v466_v12 = vpop.f32.mrf.mxu0 }
  0xea   : > { %331 = vst.msk [vmem:[%s540_s28] sm:$0xff] %vm330_vm4, %v324_v11  ;;  %v347_v14 = vmul.f32 %v324_v11, %v324_v11  ;;  %v334_v17 = vsel %vm330_vm4, %v324_v11, 0.0 }
  0xeb   : > { %v326_v13 = vpop.f32.mrf.mxu0 }
  0xec   : > { %v327_v15 = vadd.f32 %v438_v9, %v326_v13  ;;  %v349_v21 = vsel %vm330_vm4, %v347_v14, 0.0 }
  0xed   : > { %v467_v16 = vpop.f32.mrf.mxu0 }
  0xee   : > { %332 = vst.msk [vmem:[%s540_s28 + $0x8] sm:$0xff] %vm330_vm4, %v327_v15  ;;  %v335_v18 = vsel %vm330_vm4, %v327_v15, 0.0  ;;  %v348_v19 = vmul.f32 %v327_v15, %v327_v15 }
  0xef   : > { %v336_v20 = vadd.f32 %v335_v18, %v334_v17 }
  0xf0   : > { %v350_v22 = vsel %vm330_vm4, %v348_v19, 0.0 }
  0xf1   : > { %v337_v23 = vrot.slane %v336_v20, 4  ;;  %v351_v24 = vadd.f32 %v350_v22, %v349_v21 }
  0xf3   : > { %v338_v25 = vadd.f32 %v337_v23, %v336_v20  ;;  %v352_v26 = vrot.slane %v351_v24, 4 }
  0xf5   : > { %v339_v27 = vrot.slane %v338_v25, 2  ;;  %v353_v28 = vadd.f32 %v352_v26, %v351_v24 }
  0xf7   : > { %v340_v29 = vadd.f32 %v339_v27, %v338_v25  ;;  %v354_v30 = vrot.slane %v353_v28, 2 }
  0xf9   : > { %v341_v31 = vrot.slane %v340_v29, 1  ;;  %v355_v32 = vadd.f32 %v354_v30, %v353_v28 }
  0xfb   : > { %v342_v34 = vadd.f32 %v341_v31, %v340_v29  ;;  %v356_v35 = vrot.slane %v355_v32, 1 }
  0xfd   : > { %v343_v37 = vadd.f32 %v342_v34, %v333_v33  ;;  %v357_v38 = vadd.f32 %v356_v35, %v355_v32 }
  0xff   : > { %345 = vst.msk [vmem:[%s587_s4] sm:$0x1] %vm344_vm5, %v343_v37  ;;  %v358_v39 = vadd.f32 %v357_v38, %v346_v36 }
 0x101   : > { %359 = vst.msk [vmem:[%s588_s5] sm:$0x1] %vm344_vm5, %v358_v39 }
 0x102 PF: > { %s16_s18 = sadd.s32 1, %s491_s18  }
 0x103   : > { %p13_p5 = scmp.ge.s32.totalorder %s16_s18, 4  }
 0x105   :  { %15 = sbr.rel (!%p13_p5) target bundleno = 1 (0x1), region = 82 }

// kernel: dipnet_forward.28
= control target key start
LH: loop header
LB: loop body
LE: loop exit
PB: predicated region body
PF: predicated region fallthrough
CT: control target
= control target key end

     0   :  { %vm34_vm1 = vcmask 261120   ;;  %s74_s0 = inlined_call_operand.vmem [shape: f32[8,32], index: 0, kind: input, shape index: {}]   ;;  %s75_s1 = inlined_call_operand.vmem [shape: f32[1,32], index: 1, kind: input, shape index: {}]   ;;  %s76_s2 = inlined_call_operand.vmem [shape: f32[1,32], index: 2, kind: input, shape index: {}]   ;;  %s77_s3 = inlined_call_operand.vmem [shape: f32[8,32], index: 3, kind: output, shape index: {}]  }
   0x1   :  { %v14_v0 = vld [vmem:[%s74_s0] sm:$0xff] }
   0x2   :  { %v40_v1 = vld [vmem:[%s75_s1] ss:$0 sm:$0xff] }
   0x3   :  { %v41_v2 = vld [vmem:[%s76_s2] ss:$0 sm:$0xff]  ;;  %v22_v3 = vmul.f32 %v40_v1, %v14_v0 }
   0x5   :  { %v30_v4 = vadd.f32 %v41_v2, %v22_v3 }
   0x7   :  { %vm31_vm0 = vcmp.gt.f32.partialorder %v30_v4, 0.0  ;;  %v32_v5 = vmul.f32 0.1, %v30_v4 }
   0x9   :  { %v33_v6 = vsel %vm31_vm0, %v30_v4, %v32_v5 }
   0xa   :  { %35 = vst.msk [vmem:[%s77_s3] sm:$0xff] %vm34_vm1, %v33_v6 }

// kernel: dipnet_forward.31
= control target key start
LH: loop header
LB: loop body
LE: loop exit
PB: predicated region body
PF: predicated region fallthrough
CT: control target
= control target key end

     0   :  { %vm14_vm0 = vcmask 253952   ;;  %vm19_vm1 = vcmask 261120   ;;  %v50_v0 = vmov 0.0   ;;  %s91_s0 = inlined_call_operand.vmem [shape: f32[8,32], index: 0, kind: input, shape index: {}]   ;;  %s92_s1 = inlined_call_operand.vmem [shape: f32[1,32], index: 1, kind: output, shape index: {0}]   ;;  %s93_s2 = inlined_call_operand.vmem [shape: f32[1,32], index: 2, kind: output, shape index: {1}]  }
   0x1   :  { %15 = vst.msk [vmem:[%s92_s1] sm:$0x1] %vm14_vm0, %v50_v0  ;;  %v17_v1 = vld [vmem:[%s91_s0] sm:$0xff]  ;;  %16 = vst.msk [vmem:[%s93_s2] sm:$0x1] %vm14_vm0, %v50_v0 }
   0x2   :  { %v20_v2 = vsel %vm19_vm1, %v17_v1, 0.0  ;;  %v31_v3 = vmul.f32 %v17_v1, %v17_v1 }
   0x3   :  { %v21_v4 = vrot.slane %v20_v2, 4 }
   0x4   :  { %v32_v5 = vsel %vm19_vm1, %v31_v3, 0.0 }
   0x5   :  { %v22_v6 = vadd.f32 %v21_v4, %v20_v2  ;;  %v33_v7 = vrot.slane %v32_v5, 4 }
   0x7   :  { %v23_v8 = vrot.slane %v22_v6, 2  ;;  %v34_v9 = vadd.f32 %v33_v7, %v32_v5 }
   0x8   :  { %v18_v14 = vld [vmem:[%s92_s1] sm:$0x1] }
   0x9   :  { %v24_v10 = vadd.f32 %v23_v8, %v22_v6  ;;  %v35_v11 = vrot.slane %v34_v9, 2  ;;  %v30_v17 = vld [vmem:[%s93_s2] sm:$0x1] }
   0xb   :  { %v25_v12 = vrot.slane %v24_v10, 1  ;;  %v36_v13 = vadd.f32 %v35_v11, %v34_v9 }
   0xd   :  { %v26_v15 = vadd.f32 %v25_v12, %v24_v10  ;;  %v37_v16 = vrot.slane %v36_v13, 1 }
   0xf   :  { %v27_v18 = vadd.f32 %v26_v15, %v18_v14  ;;  %v38_v19 = vadd.f32 %v37_v16, %v36_v13 }
  0x11   :  { %29 = vst.msk [vmem:[%s92_s1] sm:$0x1] %vm14_vm0, %v27_v18  ;;  %v39_v20 = vadd.f32 %v38_v19, %v30_v17 }
  0x13   :  { %40 = vst.msk [vmem:[%s93_s2] sm:$0x1] %vm14_vm0, %v39_v20 }

// kernel: dipnet_forward.34
= control target key start
LH: loop header
LB: loop body
LE: loop exit
PB: predicated region body
PF: predicated region fallthrough
CT: control target
= control target key end

     0   :  { %s468_s18 = smov 0   ;;  %s516_s0 = inlined_call_operand.vmem [shape: bf16[32,8], index: 0, kind: input, shape index: {}]   ;;  %s517_s1 = inlined_call_operand.vmem [shape: bf16[8,8], index: 1, kind: input, shape index: {}]   ;;  %s518_s2 = inlined_call_operand.vmem [shape: f32[1,8], index: 2, kind: input, shape index: {}]   ;;  %s519_s3 = inlined_call_operand.vmem [shape: f32[32,8], index: 3, kind: output, shape index: {0}]   ;;  %s520_s4 = inlined_call_operand.vmem [shape: f32[1,8], index: 4, kind: output, shape index: {1}]   ;;  %s521_s5 = inlined_call_operand.vmem [shape: f32[1,8], index: 5, kind: output, shape index: {2}]  }
   0x1 LB: > { %s392_s19 = sadd.s32 4294967295, %s433_s18   ;;  %p396_p0 = scmp.ge.s32.totalorder %s433_s18, 1  ;;  %s433_s18 = sphi %s468_s18, %s16_s18  }
   0x2   : > { %p183_p1 = scmp.lt.s32.totalorder %s433_s18, 3 }
   0x4   : > { %p184_p2 = pnand %p396_p0, %p183_p1 }
   0x5   : > { %s397_s20 = sshll.u32 (!%p184_p2), %s392_s19, 1  ;;  %p401_p4 = scmp.ne.s32.totalorder (!%p184_p2), %s392_s19, 0 }
   0x6   : > { %187 = sbr.rel (%p184_p2) target bundleno = 242 (0xf2), region = 32  ;;  %p212_p3 = scmp.lt.s32.totalorder (!%p184_p2), %s397_s20, 3 }
   0xb   : > { %s523_s20 = smov (!%p212_p3, %s397_s20), 3  ;;  %227 = sbr.rel (%p401_p4) target bundleno = 18 (0x12), region = 36 }
   0xc   : > { %s398_s21 = sshll.u32 %s523_s20, 2  ;;  %s400_s22 = sshll.u32 %s523_s20, 3 }
   0xd   : > { %s215_s25 = scalar_lea.vmem %s516_s0, %s398_s21  ;;  %s221_s28 = scalar_lea.vmem %s519_s3, %s400_s22 }
  0x10   : > { %vm228_vm0 = vcmask 57344   ;;  %v435_v0 = vmov 0.0  }
  0x11   : > { %229 = vst.msk [vmem:[%s520_s4] sm:$0x1] %vm228_vm0, %v435_v0  ;;  %230 = vst.msk [vmem:[%s521_s5] sm:$0x1] %vm228_vm0, %v435_v0 }
  0x12 PF: > { %v233_v1 = vld [vmem:[%s517_s1] sm:$0xf]  ;;  %vm250_vm1 = vcmask 1043456   ;;  %v436_v2 = vmov 0.0   ;;  %vm437_vm2 = vmmov 0   ;;  %vm246_vm3 = vcmask 64512  }
  0x13   : > { %409 = vmatprep.subr.bf16.mxu0 %v436_v2  ;;  %v252_v3 = vsel %vm250_vm1, %v233_v1, 0  ;;  %411 = vmatprep.mubr.msk.bf16.mxu0 %vm437_vm2, %v436_v2  ;;  %v426_v4 = vld [vmem:[%s215_s25] sm:$0xff]   ;;  %vm308_vm4 = vcmask 57344  }
  0x14   : > { %410 = vmatpush3.bf16.msra.mxu0 %v252_v3  ;;  %v402_v5 = vld [vmem:[%s518_s2] ss:$0 sm:$0xff] }
  0x17   : > { %412 = vmatmul.mubr.msk.bf16.vlgmr.msra.gmra.mxu0 %vm246_vm3, %v426_v4 }
  0x18   : > { %v297_v29 = vld [vmem:[%s520_s4] sm:$0x1] }
  0x19   : > { %v310_v32 = vld [vmem:[%s521_s5] sm:$0x1] }
  0xd7   : > { %v288_v6 = vpop.f32.mrf.mxu0 }
  0xd8   : > { %v289_v7 = vadd.f32 %v402_v5, %v288_v6 }
  0xd9   : > { %v413_v8 = vpop.f32.mrf.mxu0 }
  0xda   : > { %295 = vst.msk [vmem:[%s221_s28] sm:$0xff] %vm246_vm3, %v289_v7  ;;  %v311_v10 = vmul.f32 %v289_v7, %v289_v7  ;;  %v298_v13 = vsel %vm246_vm3, %v289_v7, 0.0 }
  0xdb   : > { %v291_v9 = vpop.f32.mrf.mxu0 }
  0xdc   : > { %v292_v11 = vadd.f32 %v402_v5, %v291_v9  ;;  %v313_v17 = vsel %vm246_vm3, %v311_v10, 0.0 }
  0xdd   : > { %v414_v12 = vpop.f32.mrf.mxu0 }
  0xde   : > { %296 = vst.msk [vmem:[%s221_s28 + $0x8] sm:$0xff] %vm246_vm3, %v292_v11  ;;  %v299_v14 = vsel %vm246_vm3, %v292_v11, 0.0  ;;  %v312_v15 = vmul.f32 %v292_v11, %v292_v11 }
  0xdf   : > { %v300_v16 = vadd.f32 %v299_v14, %v298_v13 }
  0xe0   : > { %v314_v18 = vsel %vm246_vm3, %v312_v15, 0.0 }
  0xe1   : > { %v301_v19 = vrot.slane %v300_v16, 4  ;;  %v315_v20 = vadd.f32 %v314_v18, %v313_v17 }
  0xe3   : > { %v302_v21 = vadd.f32 %v301_v19, %v300_v16  ;;  %v316_v22 = vrot.slane %v315_v20, 4 }
  0xe5   : > { %v303_v23 = vrot.slane %v302_v21, 2  ;;  %v317_v24 = vadd.f32 %v316_v22, %v315_v20 }
  0xe7   : > { %v304_v25 = vadd.f32 %v303_v23, %v302_v21  ;;  %v318_v26 = vrot.slane %v317_v24, 2 }
  0xe9   : > { %v305_v27 = vrot.slane %v304_v25, 1  ;;  %v319_v28 = vadd.f32 %v318_v26, %v317_v24 }
  0xeb   : > { %v306_v30 = vadd.f32 %v305_v27, %v304_v25  ;;  %v320_v31 = vrot.slane %v319_v28, 1 }
  0xed   : > { %v307_v33 = vadd.f32 %v306_v30, %v297_v29  ;;  %v321_v34 = vadd.f32 %v320_v31, %v319_v28 }
  0xef   : > { %309 = vst.msk [vmem:[%s520_s4] sm:$0x1] %vm308_vm4, %v307_v33  ;;  %v322_v35 = vadd.f32 %v321_v34, %v310_v32 }
  0xf1   : > { %323 = vst.msk [vmem:[%s521_s5] sm:$0x1] %vm308_vm4, %v322_v35 }
  0xf2 PF: > { %s16_s18 = sadd.s32 1, %s433_s18  }
  0xf3   : > { %p13_p5 = scmp.ge.s32.totalorder %s16_s18, 4  }
  0xf5   :  { %15 = sbr.rel (!%p13_p5) target bundleno = 1 (0x1), region = 82 }

// kernel: tile.177
= control target key start
LH: loop header
LB: loop body
LE: loop exit
PB: predicated region body
PF: predicated region fallthrough
CT: control target
= control target key end

     0   :  { %s22_s0 = inlined_call_operand.vmem [shape: f32[4], index: 0, kind: input, shape index: {}]   ;;  %s23_s1 = inlined_call_operand.vmem [shape: f32[2,4], index: 1, kind: output, shape index: {}]  }
   0x1   :  { %v4_v0 = vld [vmem:[%s22_s0] ss:$0 sm:$0xff] }
   0x2   :  { %5 = vst [vmem:[%s23_s1] sm:$0x3] %v4_v0 }

// kernel: tile.187
= control target key start
LH: loop header
LB: loop body
LE: loop exit
PB: predicated region body
PF: predicated region fallthrough
CT: control target
= control target key end

     0   :  { %vm8_vm0 = vcmask 31744   ;;  %vm14_vm1 = vcmask 64544   ;;  %s42_s0 = inlined_call_operand.vmem [shape: f32[2,4], index: 0, kind: input, shape index: {}]   ;;  %s43_s1 = inlined_call_operand.vmem [shape: f32[1,8], index: 1, kind: output, shape index: {}]  }
   0x1   :  { %v5_v0 = vld [vmem:[%s42_s0] sm:$0x3]  ;;  %s25_s0 = smov 4  }
   0x2   :  { %6 = vst [vmem:[#allocation1] sm:$0x3] %v5_v0 }
   0x9   :  { %v11_v1 = vld [vmem:[#allocation1 + $0x1] sm:$0x1]   ;;  %v7_v2 = vld [vmem:[#allocation1] sm:$0x1]  }
   0xa   :  { %12 = vrot.lane.b32.xlu0 %v11_v1, %s25_s0  ;;  %9 = vst.msk [vmem:[#allocation0] sm:$0x1] %vm8_vm0, %v7_v2  }
  0x7c   :  { %v13_v3 = vpop.permute.xlu0 %12  }
  0x7d   :  { %15 = vst.msk [vmem:[#allocation0] sm:$0x1] %vm14_vm1, %v13_v3  }
  0x84   :  { %v20_v4 = vld [vmem:[#allocation0] sm:$0x1] }
  0x85   :  { %23 = vst [vmem:[%s43_s1] sm:$0x1] %v20_v4 }

// kernel: dipnet_forward.36
= control target key start
LH: loop header
LB: loop body
LE: loop exit
PB: predicated region body
PF: predicated region fallthrough
CT: control target
= control target key end

     0   :  { %s587_s15 = smov 0   ;;  %s685_s0 = inlined_call_operand.vmem [shape: f32[2,4,4,8], index: 0, kind: input, shape index: {}]   ;;  %s686_s1 = inlined_call_operand.vmem [shape: f32[2,4,4,8], index: 1, kind: output, shape index: {0}]   ;;  %s687_s2 = inlined_call_operand.vmem [shape: f32[2,4,4,8], index: 2, kind: output, shape index: {1}]   ;;  %s688_s3 = inlined_call_operand.vmem [shape: f32[2,4,4,8], index: 3, kind: output, shape index: {2}]   ;;  %s689_s4 = inlined_call_operand.vmem [shape: f32[2,4,4,8], index: 4, kind: output, shape index: {3}]  }
   0x1 LB: > { %s524_s16 = sadd.s32 4294967295, %s560_s15   ;;  %p528_p0 = scmp.ge.s32.totalorder %s560_s15, 1  ;;  %s560_s15 = sphi %s587_s15, %s15_s15  }
   0x2   : > { %p169_p1 = scmp.lt.s32.totalorder %s560_s15, 3 }
   0x4   : > { %p170_p2 = pnand %p528_p0, %p169_p1 }
   0x5   : > { %p210_p3 = scmp.lt.s32.totalorder (!%p170_p2), %s524_s16, 1 }
   0x6   : > { %173 = sbr.rel (%p170_p2) target bundleno = 41 (0x29), region = 24 }
   0xb   : > { %s691_s16 = smov (!%p210_p3, %s524_s16), 1  ;;  %vm267_vm0 = vcmask 1040384   ;;  %vm353_vm1 = vcmask 60416   ;;  %vm280_vm2 = vcmask 1042432  }
   0xc   : > { %s595_s17 = sshll.u32 %s691_s16, 4 }
   0xd   : > { %s214_s20 = scalar_lea.vmem %s685_s0, %s595_s17  ;;  %s219_s23 = scalar_lea.vmem %s686_s1, %s595_s17 }
   0xe   : > { %v235_v0 = vld [vmem:[%s214_s20] sm:$0xf]  ;;  %v236_v1 = vld [vmem:[%s214_s20 + $0x4] sm:$0xf]  ;;  %v237_v2 = vld [vmem:[%s214_s20 + $0x8] sm:$0xf]  ;;  %s621_s26 = scalar_lea.vmem %s687_s2, %s595_s17  ;;  %s647_s29 = scalar_lea.vmem %s688_s3, %s595_s17 }
   0xf   : > { %v238_v3 = vld [vmem:[%s214_s20 + $0xc] sm:$0xf]  ;;  %v239_v4 = vmul.f32 0.25, %v235_v0  ;;  %v242_v5 = vmul.f32 0.75, %v235_v0  ;;  %v243_v6 = vmul.f32 0.75, %v236_v1  ;;  %v240_v7 = vmul.f32 0.25, %v236_v1  ;;  %s234_s6 = scalar_lea.vmem %s689_s4, %s595_s17 }
  0x10   : > { %v244_v8 = vmul.f32 0.75, %v237_v2  ;;  %v241_v9 = vmul.f32 0.25, %v237_v2  ;;  %v245_v10 = vmul.f32 0.75, %v238_v3  ;;  %v250_v11 = vmul.f32 0.25, %v238_v3 }
  0x11   : > { %v246_v12 = vadd.f32 %v242_v5, %v239_v4  ;;  %v247_v13 = vadd.f32 %v243_v6, %v239_v4  ;;  %v601_v14 = vadd.f32 %v242_v5, %v240_v7 }
  0x12   : > { %v248_v15 = vadd.f32 %v244_v8, %v240_v7  ;;  %v249_v16 = vadd.f32 %v245_v10, %v241_v9  ;;  %v603_v17 = vadd.f32 %v243_v6, %v241_v9  ;;  %v605_v18 = vadd.f32 %v250_v11, %v244_v8 }
  0x13   : > { %v259_v19 = vrot.slane %v246_v12, 7  ;;  %v289_v20 = vmul.f32 0.75, %v246_v12  ;;  %v260_v21 = vrot.slane %v247_v13, 7  ;;  %v290_v22 = vmul.f32 0.75, %v247_v13 }
  0x14   : > { %v261_v23 = vrot.slane %v248_v15, 7  ;;  %v291_v24 = vmul.f32 0.75, %v248_v15  ;;  %v262_v25 = vrot.slane %v249_v16, 7  ;;  %v292_v26 = vmul.f32 0.75, %v249_v16 }
  0x15   : > { %v268_v27 = vsel %vm267_vm0, %v246_v12, %v259_v19  ;;  %v269_v28 = vsel %vm267_vm0, %v247_v13, %v260_v21  ;;  %v272_v29 = vrot.slane %v246_v12, 1  ;;  %v273_v30 = vrot.slane %v247_v13, 1 }
  0x16   : > { %v285_v31 = vmul.f32 0.25, %v268_v27  ;;  %v286_v32 = vmul.f32 0.25, %v269_v28  ;;  %v270_v33 = vsel %vm267_vm0, %v248_v15, %v261_v23  ;;  %v271_v34 = vsel %vm267_vm0, %v249_v16, %v262_v25 }
  0x17   : > { %v287_v35 = vmul.f32 0.25, %v270_v33  ;;  %v288_v36 = vmul.f32 0.25, %v271_v34  ;;  %v281_v37 = vsel %vm280_vm2, %v272_v29, %v246_v12  ;;  %v282_v38 = vsel %vm280_vm2, %v273_v30, %v247_v13 }
  0x18   : > { %v293_v39 = vadd.f32 %v289_v20, %v285_v31  ;;  %v294_v40 = vadd.f32 %v290_v22, %v286_v32  ;;  %v297_v41 = vmul.f32 0.25, %v281_v37  ;;  %v298_v42 = vmul.f32 0.25, %v282_v38 }
  0x19   : > { %v295_v43 = vadd.f32 %v291_v24, %v287_v35  ;;  %v296_v44 = vadd.f32 %v292_v26, %v288_v36  ;;  %v274_v45 = vrot.slane %v248_v15, 1  ;;  %v275_v46 = vrot.slane %v249_v16, 1 }
  0x1a   : > { %354 = vst.msk [vmem:[%s219_s23] sm:$0xf] %vm353_vm1, %v293_v39  ;;  %355 = vst.msk [vmem:[%s219_s23 + $0x4] sm:$0xf] %vm353_vm1, %v294_v40  ;;  %v301_v47 = vadd.f32 %v297_v41, %v289_v20  ;;  %v302_v48 = vadd.f32 %v298_v42, %v290_v22  ;;  %v309_v49 = vrot.slane %v601_v14, 7  ;;  %v337_v50 = vmul.f32 0.75, %v601_v14 }
  0x1b   : > { %356 = vst.msk [vmem:[%s219_s23 + $0x8] sm:$0xf] %vm353_vm1, %v295_v43  ;;  %357 = vst.msk [vmem:[%s219_s23 + $0xc] sm:$0xf] %vm353_vm1, %v296_v44  ;;  %v283_v51 = vsel %vm280_vm2, %v274_v45, %v248_v15  ;;  %v284_v52 = vsel %vm280_vm2, %v275_v46, %v249_v16  ;;  %v310_v53 = vrot.slane %v603_v17, 7  ;;  %v338_v54 = vmul.f32 0.75, %v603_v17 }
  0x1c   : > { %358 = vst.msk [vmem:[%s621_s26] sm:$0xf] %vm353_vm1, %v301_v47  ;;  %359 = vst.msk [vmem:[%s621_s26 + $0x4] sm:$0xf] %vm353_vm1, %v302_v48  ;;  %v299_v55 = vmul.f32 0.25, %v283_v51  ;;  %v300_v56 = vmul.f32 0.25, %v284_v52  ;;  %v317_v57 = vsel %vm267_vm0, %v601_v14, %v309_v49  ;;  %v254_v62 = vadd.f32 %v250_v11, %v245_v10 }
  0x1d   : > { %v311_v58 = vrot.slane %v605_v18, 7  ;;  %v333_v59 = vmul.f32 0.25, %v317_v57  ;;  %v318_v60 = vsel %vm267_vm0, %v603_v17, %v310_v53  ;;  %v339_v61 = vmul.f32 0.75, %v605_v18 }
  0x1e   : > { %v303_v63 = vadd.f32 %v299_v55, %v291_v24  ;;  %v304_v0 = vadd.f32 %v300_v56, %v292_v26  ;;  %v334_v1 = vmul.f32 0.25, %v318_v60  ;;  %v312_v5 = vrot.slane %v254_v62, 7 }
  0x1f   : > { %v319_v2 = vsel %vm267_vm0, %v605_v18, %v311_v58  ;;  %v341_v3 = vadd.f32 %v337_v50, %v333_v59  ;;  %v340_v6 = vmul.f32 0.75, %v254_v62  ;;  %v321_v8 = vrot.slane %v601_v14, 1 }
  0x20   : > { %v335_v4 = vmul.f32 0.25, %v319_v2  ;;  %360 = vst.msk [vmem:[%s621_s26 + $0x8] sm:$0xf] %vm353_vm1, %v303_v63  ;;  %361 = vst.msk [vmem:[%s621_s26 + $0xc] sm:$0xf] %vm353_vm1, %v304_v0  ;;  %v342_v7 = vadd.f32 %v338_v54, %v334_v1  ;;  %v322_v9 = vrot.slane %v603_v17, 1  ;;  %v320_v12 = vsel %vm267_vm0, %v254_v62, %v312_v5 }
  0x21   : > { %v323_v10 = vrot.slane %v605_v18, 1  ;;  %362 = vst.msk [vmem:[%s647_s29] sm:$0xf] %vm353_vm1, %v341_v3  ;;  %v324_v13 = vrot.slane %v254_v62, 1  ;;  %v336_v15 = vmul.f32 0.25, %v320_v12  ;;  %v329_v16 = vsel %vm280_vm2, %v321_v8, %v601_v14 }
  0x22   : > { %v343_v11 = vadd.f32 %v339_v61, %v335_v4  ;;  %363 = vst.msk [vmem:[%s647_s29 + $0x4] sm:$0xf] %vm353_vm1, %v342_v7  ;;  %v330_v19 = vsel %vm280_vm2, %v322_v9, %v603_v17  ;;  %v345_v21 = vmul.f32 0.25, %v329_v16 }
  0x23   : > { %v331_v20 = vsel %vm280_vm2, %v323_v10, %v605_v18  ;;  %v346_v22 = vmul.f32 0.25, %v330_v19  ;;  %v332_v24 = vsel %vm280_vm2, %v324_v13, %v254_v62  ;;  %v344_v25 = vadd.f32 %v340_v6, %v336_v15 }
  0x24   : > { %364 = vst.msk [vmem:[%s647_s29 + $0x8] sm:$0xf] %vm353_vm1, %v343_v11  ;;  %v347_v23 = vmul.f32 0.25, %v331_v20  ;;  %v348_v26 = vmul.f32 0.25, %v332_v24  ;;  %v349_v14 = vadd.f32 %v345_v21, %v337_v50 }
  0x25   : > { %v350_v27 = vadd.f32 %v346_v22, %v338_v54  ;;  %365 = vst.msk [vmem:[%s647_s29 + $0xc] sm:$0xf] %vm353_vm1, %v344_v25 }
  0x26   : > { %v351_v28 = vadd.f32 %v347_v23, %v339_v61  ;;  %v352_v17 = vadd.f32 %v348_v26, %v340_v6  ;;  %366 = vst.msk [vmem:[%s234_s6] sm:$0xf] %vm353_vm1, %v349_v14 }
  0x27   : > { %367 = vst.msk [vmem:[%s234_s6 + $0x4] sm:$0xf] %vm353_vm1, %v350_v27 }
  0x28   : > { %368 = vst.msk [vmem:[%s234_s6 + $0x8] sm:$0xf] %vm353_vm1, %v351_v28  ;;  %369 = vst.msk [vmem:[%s234_s6 + $0xc] sm:$0xf] %vm353_vm1, %v352_v17 }
  0x29 PF: > { %s15_s15 = sadd.s32 1, %s560_s15  }
  0x2a   : > { %p12_p4 = scmp.ge.s32.totalorder %s15_s15, 4  }
  0x2c   :  { %14 = sbr.rel (!%p12_p4) target bundleno = 1 (0x1), region = 90 }

// kernel: dipnet_forward.38
= control target key start
LH: loop header
LB: loop body
LE: loop exit
PB: predicated region body
PF: predicated region fallthrough
CT: control target
= control target key end

     0   :  { %s86_s0 = inlined_call_operand.vmem [shape: f32[8,128], index: 0, kind: input, shape index: {}]   ;;  %s87_s1 = inlined_call_operand.vmem [shape: f32[1,128], index: 1, kind: input, shape index: {}]   ;;  %s88_s2 = inlined_call_operand.vmem [shape: f32[1,128], index: 2, kind: input, shape index: {}]   ;;  %s89_s3 = inlined_call_operand.vmem [shape: f32[8,128], index: 3, kind: input, shape index: {}]   ;;  %s90_s4 = inlined_call_operand.vmem [shape: f32[8,128], index: 4, kind: output, shape index: {}]  }
   0x1   :  { %v17_v0 = vld [vmem:[%s86_s0] sm:$0xff] }
   0x2   :  { %v44_v1 = vld [vmem:[%s87_s1] ss:$0 sm:$0xff] }
   0x3   :  { %v45_v2 = vld [vmem:[%s88_s2] ss:$0 sm:$0xff]  ;;  %v25_v3 = vmul.f32 %v44_v1, %v17_v0 }
   0x4   :  { %v37_v6 = vld [vmem:[%s89_s3] sm:$0xff] }
   0x5   :  { %v33_v4 = vadd.f32 %v45_v2, %v25_v3 }
   0x7   :  { %vm34_vm0 = vcmp.gt.f32.partialorder %v33_v4, 0.0  ;;  %v35_v5 = vmul.f32 0.1, %v33_v4 }
   0x9   :  { %v36_v7 = vsel %vm34_vm0, %v33_v4, %v35_v5 }
   0xa   :  { %v38_v8 = vadd.f32 %v37_v6, %v36_v7 }
   0xc   :  { %39 = vst [vmem:[%s90_s4] sm:$0xff] %v38_v8 }

// kernel: dipnet_forward.37
= control target key start
LH: loop header
LB: loop body
LE: loop exit
PB: predicated region body
PF: predicated region fallthrough
CT: control target
= control target key end

     0   :  { %s574_s18 = smov 0   ;;  %s653_s0 = inlined_call_operand.vmem [shape: bf16[128,8], index: 0, kind: input, shape index: {}]   ;;  %s654_s1 = inlined_call_operand.vmem [shape: bf16[8,8], index: 1, kind: input, shape index: {}]   ;;  %s655_s2 = inlined_call_operand.vmem [shape: f32[1,8], index: 2, kind: input, shape index: {}]   ;;  %s656_s3 = inlined_call_operand.vmem [shape: f32[128,8], index: 3, kind: output, shape index: {0}]   ;;  %s657_s4 = inlined_call_operand.vmem [shape: f32[1,8], index: 4, kind: output, shape index: {1}]   ;;  %s658_s5 = inlined_call_operand.vmem [shape: f32[1,8], index: 5, kind: output, shape index: {2}]  }
   0x1 LB: > { %s482_s19 = sadd.s32 4294967295, %s541_s18   ;;  %p486_p0 = scmp.ge.s32.totalorder %s541_s18, 1  ;;  %s541_s18 = sphi %s574_s18, %s16_s18  }
   0x2   : > { %p183_p1 = scmp.lt.s32.totalorder %s541_s18, 3 }
   0x4   : > { %p184_p2 = pnand %p486_p0, %p183_p1 }
   0x5   : > { %s487_s20 = sshll.u32 (!%p184_p2), %s482_s19, 3  ;;  %p491_p4 = scmp.ne.s32.totalorder (!%p184_p2), %s482_s19, 0 }
   0x6   : > { %187 = sbr.rel (%p184_p2) target bundleno = 256 (0x100), region = 32  ;;  %p212_p3 = scmp.lt.s32.totalorder (!%p184_p2), %s487_s20, 15 }
   0xb   : > { %s660_s20 = smov (!%p212_p3, %s487_s20), 15  ;;  %227 = sbr.rel (%p491_p4) target bundleno = 18 (0x12), region = 36 }
   0xc   : > { %s488_s21 = sshll.u32 %s660_s20, 2  ;;  %s490_s22 = sshll.u32 %s660_s20, 3 }
   0xd   : > { %s215_s25 = scalar_lea.vmem %s653_s0, %s488_s21  ;;  %s588_s28 = scalar_lea.vmem %s656_s3, %s490_s22 }
  0x10   : > { %vm228_vm0 = vcmask 57344   ;;  %v543_v0 = vmov 0.0  }
  0x11   : > { %229 = vst.msk [vmem:[%s657_s4] sm:$0x1] %vm228_vm0, %v543_v0  ;;  %230 = vst.msk [vmem:[%s658_s5] sm:$0x1] %vm228_vm0, %v543_v0 }
  0x12 PF: > { %v239_v1 = vld [vmem:[%s654_s1] sm:$0xf]  ;;  %vm280_vm1 = vcmask 1043456   ;;  %vm267_vm2 = vcmask 64512   ;;  %v532_v4 = vld [vmem:[%s215_s25 + $0x8] sm:$0xff]   ;;  %v533_v5 = vld [vmem:[%s215_s25 + $0x10] sm:$0xff]  }
  0x13   : > { %v531_v2 = vld [vmem:[%s215_s25] sm:$0xff]   ;;  %520 = vmatprep.subr.msk.bf16.mxu0 %vm280_vm1, %v239_v1  ;;  %v282_v3 = vsel %vm280_vm1, %v239_v1, 0  ;;  %521 = vmatprep.subr.msk.bf16.mxu1 %vm280_vm1, %v239_v1  ;;  %v534_v6 = vld [vmem:[%s215_s25 + $0x18] sm:$0xff]   ;;  %vm380_vm3 = vcmask 57344  }
  0x14   : > { %509 = vmatpush3.bf16.msra.mxu0 %v282_v3  ;;  %519 = vmatpush3.bf16.msra.mxu1 %v282_v3  ;;  %v492_v7 = vld [vmem:[%s655_s2] ss:$0 sm:$0xff] }
  0x15   : > { %510 = vmatprep.mubr.msk.bf16.mxu0 %vm267_vm2, %v531_v2  ;;  %514 = vmatprep.mubr.msk.bf16.mxu1 %vm267_vm2, %v533_v5 }
  0x17   : > { %511 = vmatmul.mubr.msk.bf16.vlgmr.msra.gmra.mxu0 %vm267_vm2, %v532_v4  ;;  %515 = vmatmul.mubr.msk.bf16.vlgmr.msra.gmra.mxu1 %vm267_vm2, %v534_v6 }
  0xd7   : > { %v512_v8 = vpop.f32.mrf.mxu0  ;;  %v516_v10 = vpop.f32.mrf.mxu1 }
  0xd8   : > { %v327_v9 = vadd.f32 %v512_v8, %v492_v7  ;;  %v343_v12 = vadd.f32 %v516_v10, %v492_v7  ;;  %v382_v10 = vld [vmem:[%s658_s5] sm:$0x1] }
  0xd9   : > { %v318_v11 = vpop.f32.mrf.mxu0  ;;  %v334_v14 = vpop.f32.mrf.mxu1 }
  0xda   : > { %351 = vst.msk [vmem:[%s588_s28 + $0x10] sm:$0xff] %vm267_vm2, %v327_v9  ;;  %v319_v13 = vadd.f32 %v492_v7, %v318_v11  ;;  %355 = vst.msk [vmem:[%s588_s28 + $0x30] sm:$0xff] %vm267_vm2, %v343_v12  ;;  %v335_v16 = vadd.f32 %v492_v7, %v334_v14  ;;  %v385_v25 = vmul.f32 %v327_v9, %v327_v9  ;;  %v361_v30 = vsel %vm267_vm2, %v327_v9, 0.0 }
  0xdb   : > { %v513_v15 = vpop.f32.mrf.mxu0  ;;  %v517_v18 = vpop.f32.mrf.mxu1  ;;  %v389_v46 = vmul.f32 %v343_v12, %v343_v12  ;;  %v369_v51 = vsel %vm267_vm2, %v343_v12, 0.0 }
  0xdc   : > { %349 = vst.msk [vmem:[%s588_s28] sm:$0xff] %vm267_vm2, %v319_v13  ;;  %v330_v17 = vadd.f32 %v513_v15, %v492_v7  ;;  %353 = vst.msk [vmem:[%s588_s28 + $0x20] sm:$0xff] %vm267_vm2, %v335_v16  ;;  %v346_v20 = vadd.f32 %v517_v18, %v492_v7  ;;  %v383_v21 = vmul.f32 %v319_v13, %v319_v13  ;;  %v358_v26 = vsel %vm267_vm2, %v319_v13, 0.0 }
  0xdd   : > { %v321_v19 = vpop.f32.mrf.mxu0  ;;  %v337_v23 = vpop.f32.mrf.mxu1  ;;  %v394_v36 = vsel %vm267_vm2, %v385_v25, 0.0  ;;  %v387_v38 = vmul.f32 %v335_v16, %v335_v16  ;;  %v365_v42 = vsel %vm267_vm2, %v335_v16, 0.0  ;;  %v402_v56 = vsel %vm267_vm2, %v389_v46, 0.0 }
  0xde   : > { %352 = vst.msk [vmem:[%s588_s28 + $0x18] sm:$0xff] %vm267_vm2, %v330_v17  ;;  %v322_v22 = vadd.f32 %v492_v7, %v321_v19  ;;  %356 = vst.msk [vmem:[%s588_s28 + $0x38] sm:$0xff] %vm267_vm2, %v346_v20  ;;  %v338_v24 = vadd.f32 %v492_v7, %v337_v23  ;;  %v391_v31 = vsel %vm267_vm2, %v383_v21, 0.0  ;;  %v386_v32 = vmul.f32 %v330_v17, %v330_v17  ;;  %v357_v7 = vld [vmem:[%s657_s4] sm:$0x1] }
  0xdf   : > { %v363_v37 = vsel %vm267_vm2, %v330_v17, 0.0  ;;  %v398_v47 = vsel %vm267_vm2, %v387_v38, 0.0  ;;  %v390_v52 = vmul.f32 %v346_v20, %v346_v20  ;;  %v371_v57 = vsel %vm267_vm2, %v346_v20, 0.0 }
  0xe0   : > { %350 = vst.msk [vmem:[%s588_s28 + $0x8] sm:$0xff] %vm267_vm2, %v322_v22  ;;  %v359_v27 = vsel %vm267_vm2, %v322_v22, 0.0  ;;  %v384_v28 = vmul.f32 %v322_v22, %v322_v22  ;;  %354 = vst.msk [vmem:[%s588_s28 + $0x28] sm:$0xff] %vm267_vm2, %v338_v24  ;;  %v396_v41 = vsel %vm267_vm2, %v386_v32, 0.0  ;;  %v388_v43 = vmul.f32 %v338_v24, %v338_v24 }
  0xe1   : > { %v360_v29 = vadd.f32 %v359_v27, %v358_v26  ;;  %v367_v48 = vsel %vm267_vm2, %v338_v24, 0.0  ;;  %v404_v60 = vsel %vm267_vm2, %v390_v52, 0.0 }
  0xe2   : > { %v392_v33 = vsel %vm267_vm2, %v384_v28, 0.0  ;;  %v400_v53 = vsel %vm267_vm2, %v388_v43, 0.0 }
  0xe3   : > { %v362_v34 = vadd.f32 %v361_v30, %v360_v29  ;;  %v393_v35 = vadd.f32 %v392_v33, %v391_v31 }
  0xe5   : > { %v395_v39 = vadd.f32 %v394_v36, %v393_v35  ;;  %v364_v40 = vadd.f32 %v363_v37, %v362_v34 }
  0xe7   : > { %v366_v44 = vadd.f32 %v365_v42, %v364_v40  ;;  %v397_v45 = vadd.f32 %v396_v41, %v395_v39 }
  0xe9   : > { %v368_v49 = vadd.f32 %v367_v48, %v366_v44  ;;  %v399_v50 = vadd.f32 %v398_v47, %v397_v45 }
  0xeb   : > { %v370_v54 = vadd.f32 %v369_v51, %v368_v49  ;;  %v401_v55 = vadd.f32 %v400_v53, %v399_v50 }
  0xed   : > { %v372_v58 = vadd.f32 %v371_v57, %v370_v54  ;;  %v403_v59 = vadd.f32 %v402_v56, %v401_v55 }
  0xef   : > { %v373_v61 = vrot.slane %v372_v58, 4  ;;  %v405_v62 = vadd.f32 %v404_v60, %v403_v59 }
  0xf1   : > { %v374_v63 = vadd.f32 %v373_v61, %v372_v58  ;;  %v406_v0 = vrot.slane %v405_v62, 4 }
  0xf3   : > { %v375_v1 = vrot.slane %v374_v63, 2  ;;  %v407_v2 = vadd.f32 %v406_v0, %v405_v62 }
  0xf5   : > { %v376_v3 = vadd.f32 %v375_v1, %v374_v63  ;;  %v408_v4 = vrot.slane %v407_v2, 2 }
  0xf7   : > { %v377_v5 = vrot.slane %v376_v3, 1  ;;  %v409_v6 = vadd.f32 %v408_v4, %v407_v2 }
  0xf9   : > { %v378_v8 = vadd.f32 %v377_v5, %v376_v3  ;;  %v410_v9 = vrot.slane %v409_v6, 1 }
  0xfb   : > { %v379_v11 = vadd.f32 %v378_v8, %v357_v7  ;;  %v411_v12 = vadd.f32 %v410_v9, %v409_v6 }
  0xfd   : > { %381 = vst.msk [vmem:[%s657_s4] sm:$0x1] %vm380_vm3, %v379_v11  ;;  %v412_v13 = vadd.f32 %v411_v12, %v382_v10 }
  0xff   : > { %413 = vst.msk [vmem:[%s658_s5] sm:$0x1] %vm380_vm3, %v412_v13 }
 0x100 PF: > { %s16_s18 = sadd.s32 1, %s541_s18  }
 0x101   : > { %p13_p5 = scmp.ge.s32.totalorder %s16_s18, 4  }
 0x103   :  { %15 = sbr.rel (!%p13_p5) target bundleno = 1 (0x1), region = 82 }

// kernel: dipnet_forward.39
= control target key start
LH: loop header
LB: loop body
LE: loop exit
PB: predicated region body
PF: predicated region fallthrough
CT: control target
= control target key end

     0   :  { %v45_v0 = vmov 0.0   ;;  %s82_s1 = inlined_call_operand.vmem [shape: f32[1,128], index: 1, kind: output, shape index: {0}]   ;;  %s83_s2 = inlined_call_operand.vmem [shape: f32[1,128], index: 2, kind: output, shape index: {1}]   ;;  %s84_s0 = inlined_call_operand.vmem [shape: f32[8,128], index: 0, kind: input, shape index: {}]  }
   0x1   :  { %14 = vst [vmem:[%s82_s1] sm:$0x1] %v45_v0  ;;  %15 = vst [vmem:[%s83_s2] sm:$0x1] %v45_v0  ;;  %v16_v1 = vld [vmem:[%s84_s0] sm:$0xff] }
   0x2   :  { %v18_v2 = vrot.slane %v16_v1, 4  ;;  %v27_v3 = vmul.f32 %v16_v1, %v16_v1 }
   0x4   :  { %v19_v4 = vadd.f32 %v18_v2, %v16_v1  ;;  %v28_v5 = vrot.slane %v27_v3, 4 }
   0x6   :  { %v20_v6 = vrot.slane %v19_v4, 2  ;;  %v29_v7 = vadd.f32 %v28_v5, %v27_v3 }
   0x8   :  { %v21_v8 = vadd.f32 %v20_v6, %v19_v4  ;;  %v30_v9 = vrot.slane %v29_v7, 2  ;;  %v17_v12 = vld [vmem:[%s82_s1] sm:$0x1] }
   0x9   :  { %v26_v15 = vld [vmem:[%s83_s2] sm:$0x1] }
   0xa   :  { %v22_v10 = vrot.slane %v21_v8, 1  ;;  %v31_v11 = vadd.f32 %v30_v9, %v29_v7 }
   0xc   :  { %v23_v13 = vadd.f32 %v22_v10, %v21_v8  ;;  %v32_v14 = vrot.slane %v31_v11, 1 }
   0xe   :  { %v24_v16 = vadd.f32 %v23_v13, %v17_v12  ;;  %v33_v17 = vadd.f32 %v32_v14, %v31_v11 }
  0x10   :  { %25 = vst [vmem:[%s82_s1] sm:$0x1] %v24_v16  ;;  %v34_v18 = vadd.f32 %v33_v17, %v26_v15 }
  0x12   :  { %35 = vst [vmem:[%s83_s2] sm:$0x1] %v34_v18 }

// kernel: dipnet_forward.44
= control target key start
LH: loop header
LB: loop body
LE: loop exit
PB: predicated region body
PF: predicated region fallthrough
CT: control target
= control target key end

     0   :  { %s719_s15 = smov 0   ;;  %s1014_s0 = inlined_call_operand.vmem [shape: f32[2,8,8,8], index: 0, kind: input, shape index: {}]   ;;  %s1015_s1 = inlined_call_operand.vmem [shape: f32[2,8,8,8], index: 1, kind: output, shape index: {0}]   ;;  %s1016_s2 = inlined_call_operand.vmem [shape: f32[2,8,8,8], index: 2, kind: output, shape index: {1}]   ;;  %s1017_s3 = inlined_call_operand.vmem [shape: f32[2,8,8,8], index: 3, kind: output, shape index: {2}]   ;;  %s1018_s4 = inlined_call_operand.vmem [shape: f32[2,8,8,8], index: 4, kind: output, shape index: {3}]  }
   0x1 LB: > { %s656_s16 = sadd.s32 4294967295, %s692_s15   ;;  %p660_p0 = scmp.ge.s32.totalorder %s692_s15, 1  ;;  %s692_s15 = sphi %s719_s15, %s15_s15  }
   0x2   : > { %p169_p1 = scmp.lt.s32.totalorder %s692_s15, 3 }
   0x4   : > { %p170_p2 = pnand %p660_p0, %p169_p1 }
   0x5   : > { %p210_p3 = scmp.lt.s32.totalorder (!%p170_p2), %s656_s16, 1 }
   0x6   : > { %173 = sbr.rel (%p170_p2) target bundleno = 64 (0x40), region = 24 }
   0xb   : > { %s1020_s16 = smov (!%p210_p3, %s656_s16), 1  ;;  %vm299_vm0 = vcmask 1040384   ;;  %vm469_vm1 = vcmask 64512   ;;  %vm324_vm2 = vcmask 1046528  }
   0xc   : > { %s727_s17 = sshll.u32 %s1020_s16, 6 }
   0xd   : > { %s733_s20 = scalar_lea.vmem %s1014_s0, %s727_s17  ;;  %s809_s23 = scalar_lea.vmem %s1015_s1, %s727_s17 }
   0xe   : > { %v235_v0 = vld [vmem:[%s733_s20] sm:$0xff]  ;;  %v236_v1 = vld [vmem:[%s733_s20 + $0x8] sm:$0xff]  ;;  %v237_v2 = vld [vmem:[%s733_s20 + $0x10] sm:$0xff]  ;;  %s866_s26 = scalar_lea.vmem %s1016_s2, %s727_s17  ;;  %s933_s29 = scalar_lea.vmem %s1017_s3, %s727_s17 }
   0xf   : > { %v243_v3 = vmul.f32 0.25, %v235_v0  ;;  %v738_v4 = vmul.f32 0.75, %v235_v0  ;;  %v740_v5 = vmul.f32 0.75, %v236_v1  ;;  %v742_v6 = vmul.f32 0.25, %v236_v1  ;;  %v238_v7 = vld [vmem:[%s733_s20 + $0x18] sm:$0xff]  ;;  %v239_v8 = vld [vmem:[%s733_s20 + $0x20] sm:$0xff]  ;;  %s971_s6 = scalar_lea.vmem %s1018_s4, %s727_s17 }
  0x10   : > { %v746_v9 = vmul.f32 0.75, %v237_v2  ;;  %v748_v10 = vmul.f32 0.25, %v237_v2  ;;  %v750_v11 = vmul.f32 0.75, %v238_v7  ;;  %v752_v12 = vmul.f32 0.25, %v238_v7  ;;  %v240_v13 = vld [vmem:[%s733_s20 + $0x28] sm:$0xff]  ;;  %v241_v38 = vld [vmem:[%s733_s20 + $0x30] sm:$0xff] }
  0x11   : > { %v258_v14 = vadd.f32 %v738_v4, %v243_v3  ;;  %v757_v15 = vadd.f32 %v740_v5, %v243_v3  ;;  %v759_v16 = vmul.f32 0.75, %v239_v8  ;;  %v761_v17 = vmul.f32 0.25, %v239_v8  ;;  %v816_v43 = vld [vmem:[%s733_s20 + $0x38] sm:$0xff] }
  0x12   : > { %v765_v18 = vadd.f32 %v746_v9, %v742_v6  ;;  %v769_v19 = vadd.f32 %v750_v11, %v748_v10  ;;  %v771_v20 = vmul.f32 0.75, %v240_v13  ;;  %v773_v21 = vmul.f32 0.25, %v240_v13 }
  0x13   : > { %v283_v22 = vrot.slane %v258_v14, 7  ;;  %v775_v23 = vmul.f32 0.75, %v258_v14  ;;  %v284_v24 = vrot.slane %v757_v15, 7  ;;  %v779_v25 = vmul.f32 0.75, %v757_v15 }
  0x14   : > { %v285_v26 = vrot.slane %v765_v18, 7  ;;  %v783_v27 = vmul.f32 0.75, %v765_v18  ;;  %v286_v28 = vrot.slane %v769_v19, 7  ;;  %v787_v29 = vmul.f32 0.75, %v769_v19 }
  0x15   : > { %v300_v30 = vsel %vm299_vm0, %v258_v14, %v283_v22  ;;  %v301_v31 = vsel %vm299_vm0, %v757_v15, %v284_v24  ;;  %v794_v32 = vadd.f32 %v759_v16, %v752_v12  ;;  %v798_v33 = vadd.f32 %v771_v20, %v761_v17 }
  0x16   : > { %v333_v34 = vmul.f32 0.25, %v300_v30  ;;  %v334_v35 = vmul.f32 0.25, %v301_v31  ;;  %v302_v36 = vsel %vm299_vm0, %v765_v18, %v285_v26  ;;  %v303_v37 = vsel %vm299_vm0, %v769_v19, %v286_v28 }
  0x17   : > { %v335_v39 = vmul.f32 0.25, %v302_v36  ;;  %v336_v40 = vmul.f32 0.25, %v303_v37  ;;  %v287_v41 = vrot.slane %v794_v32, 7  ;;  %v813_v42 = vmul.f32 0.75, %v794_v32 }
  0x18   : > { %v349_v44 = vadd.f32 %v775_v23, %v333_v34  ;;  %v350_v45 = vadd.f32 %v779_v25, %v334_v35  ;;  %v288_v46 = vrot.slane %v798_v33, 7  ;;  %v822_v47 = vmul.f32 0.75, %v798_v33 }
  0x19   : > { %v351_v48 = vadd.f32 %v783_v27, %v335_v39  ;;  %v352_v49 = vadd.f32 %v787_v29, %v336_v40  ;;  %v304_v50 = vsel %vm299_vm0, %v794_v32, %v287_v41  ;;  %v828_v51 = vmul.f32 0.75, %v241_v38 }
  0x1a   : > { %470 = vst.msk [vmem:[%s809_s23] sm:$0xff] %vm469_vm1, %v349_v44  ;;  %471 = vst.msk [vmem:[%s809_s23 + $0x8] sm:$0xff] %vm469_vm1, %v350_v45  ;;  %v337_v52 = vmul.f32 0.25, %v304_v50  ;;  %v305_v53 = vsel %vm299_vm0, %v798_v33, %v288_v46  ;;  %v836_v54 = vmul.f32 0.25, %v241_v38  ;;  %v839_v55 = vmul.f32 0.75, %v816_v43 }
  0x1b   : > { %472 = vst.msk [vmem:[%s809_s23 + $0x10] sm:$0xff] %vm469_vm1, %v351_v48  ;;  %473 = vst.msk [vmem:[%s809_s23 + $0x18] sm:$0xff] %vm469_vm1, %v352_v49  ;;  %v338_v56 = vmul.f32 0.25, %v305_v53  ;;  %v264_v57 = vadd.f32 %v828_v51, %v773_v21  ;;  %v308_v58 = vrot.slane %v258_v14, 1  ;;  %v309_v59 = vrot.slane %v757_v15, 1 }
  0x1c   : > { %v353_v60 = vadd.f32 %v813_v42, %v337_v52  ;;  %v265_v61 = vadd.f32 %v839_v55, %v836_v54  ;;  %v310_v62 = vrot.slane %v765_v18, 1  ;;  %v311_v63 = vrot.slane %v769_v19, 1 }
  0x1d   : > { %v354_v0 = vadd.f32 %v822_v47, %v338_v56  ;;  %v289_v1 = vrot.slane %v264_v57, 7  ;;  %v347_v2 = vmul.f32 0.75, %v264_v57  ;;  %v325_v3 = vsel %vm324_vm2, %v308_v58, %v258_v14 }
  0x1e   : > { %474 = vst.msk [vmem:[%s809_s23 + $0x20] sm:$0xff] %vm469_vm1, %v353_v60  ;;  %v290_v7 = vrot.slane %v265_v61, 7  ;;  %v348_v8 = vmul.f32 0.75, %v265_v61  ;;  %v357_v13 = vmul.f32 0.25, %v325_v3  ;;  %v326_v22 = vsel %vm324_vm2, %v309_v59, %v757_v15 }
  0x1f   : > { %475 = vst.msk [vmem:[%s809_s23 + $0x28] sm:$0xff] %vm469_vm1, %v354_v0  ;;  %v306_v24 = vsel %vm299_vm0, %v264_v57, %v289_v1  ;;  %v358_v26 = vmul.f32 0.25, %v326_v22  ;;  %v327_v14 = vsel %vm324_vm2, %v310_v62, %v765_v18  ;;  %v328_v28 = vsel %vm324_vm2, %v311_v63, %v769_v19 }
  0x20   : > { %v339_v30 = vmul.f32 0.25, %v306_v24  ;;  %v307_v15 = vsel %vm299_vm0, %v265_v61, %v290_v7  ;;  %v365_v31 = vadd.f32 %v357_v13, %v775_v23  ;;  %v359_v34 = vmul.f32 0.25, %v327_v14 }
  0x21   : > { %v340_v35 = vmul.f32 0.25, %v307_v15  ;;  %v366_v36 = vadd.f32 %v358_v26, %v779_v25  ;;  %v360_v37 = vmul.f32 0.25, %v328_v28  ;;  %v312_v38 = vrot.slane %v794_v32, 1 }
  0x22   : > { %v355_v39 = vadd.f32 %v347_v2, %v339_v30  ;;  %478 = vst.msk [vmem:[%s866_s26] sm:$0xff] %vm469_vm1, %v365_v31  ;;  %v367_v18 = vadd.f32 %v359_v34, %v783_v27  ;;  %v313_v19 = vrot.slane %v798_v33, 1  ;;  %v314_v40 = vrot.slane %v264_v57, 1 }
  0x23   : > { %v356_v23 = vadd.f32 %v348_v8, %v340_v35  ;;  %479 = vst.msk [vmem:[%s866_s26 + $0x8] sm:$0xff] %vm469_vm1, %v366_v36  ;;  %v368_v41 = vadd.f32 %v360_v37, %v787_v29  ;;  %v329_v25 = vsel %vm324_vm2, %v312_v38, %v794_v32  ;;  %v315_v44 = vrot.slane %v265_v61, 1 }
  0x24   : > { %476 = vst.msk [vmem:[%s809_s23 + $0x30] sm:$0xff] %vm469_vm1, %v355_v39  ;;  %480 = vst.msk [vmem:[%s866_s26 + $0x10] sm:$0xff] %vm469_vm1, %v367_v18  ;;  %v361_v45 = vmul.f32 0.25, %v329_v25  ;;  %v330_v27 = vsel %vm324_vm2, %v313_v19, %v798_v33  ;;  %v331_v46 = vsel %vm324_vm2, %v314_v40, %v264_v57  ;;  %v267_v48 = vadd.f32 %v738_v4, %v742_v6 }
  0x25   : > { %477 = vst.msk [vmem:[%s809_s23 + $0x38] sm:$0xff] %vm469_vm1, %v356_v23  ;;  %481 = vst.msk [vmem:[%s866_s26 + $0x18] sm:$0xff] %vm469_vm1, %v368_v41  ;;  %v362_v29 = vmul.f32 0.25, %v330_v27  ;;  %v363_v32 = vmul.f32 0.25, %v331_v46  ;;  %v332_v49 = vsel %vm324_vm2, %v315_v44, %v265_v61  ;;  %v268_v50 = vadd.f32 %v740_v5, %v748_v10 }
  0x26   : > { %v369_v33 = vadd.f32 %v361_v45, %v813_v42  ;;  %v364_v52 = vmul.f32 0.25, %v332_v49  ;;  %v381_v53 = vrot.slane %v267_v48, 7  ;;  %v437_v56 = vmul.f32 0.75, %v267_v48 }
  0x27   : > { %v370_v4 = vadd.f32 %v362_v29, %v822_v47  ;;  %v371_v6 = vadd.f32 %v363_v32, %v347_v2  ;;  %v382_v57 = vrot.slane %v268_v50, 7  ;;  %v903_v58 = vmul.f32 0.75, %v268_v50 }
  0x28   : > { %482 = vst.msk [vmem:[%s866_s26 + $0x20] sm:$0xff] %vm469_vm1, %v369_v33  ;;  %v372_v59 = vadd.f32 %v364_v52, %v348_v8  ;;  %v397_v60 = vsel %vm299_vm0, %v267_v48, %v381_v53  ;;  %v269_v5 = vadd.f32 %v746_v9, %v752_v12  ;;  %v912_v10 = vadd.f32 %v750_v11, %v761_v17 }
  0x29   : > { %483 = vst.msk [vmem:[%s866_s26 + $0x28] sm:$0xff] %vm469_vm1, %v370_v4  ;;  %484 = vst.msk [vmem:[%s866_s26 + $0x30] sm:$0xff] %vm469_vm1, %v371_v6  ;;  %v429_v42 = vmul.f32 0.25, %v397_v60  ;;  %v398_v47 = vsel %vm299_vm0, %v268_v50, %v382_v57  ;;  %v921_v61 = vadd.f32 %v759_v16, %v773_v21  ;;  %v925_v62 = vadd.f32 %v771_v20, %v836_v54 }
  0x2a   : > { %485 = vst.msk [vmem:[%s866_s26 + $0x38] sm:$0xff] %vm469_vm1, %v372_v59  ;;  %v430_v9 = vmul.f32 0.25, %v398_v47  ;;  %v383_v11 = vrot.slane %v269_v5, 7  ;;  %v439_v12 = vmul.f32 0.75, %v269_v5  ;;  %v384_v17 = vrot.slane %v912_v10, 7 }
  0x2b   : > { %v445_v16 = vadd.f32 %v437_v56, %v429_v42  ;;  %v440_v21 = vmul.f32 0.75, %v912_v10  ;;  %v385_v20 = vrot.slane %v921_v61, 7  ;;  %v939_v54 = vmul.f32 0.75, %v921_v61 }
  0x2c   : > { %v446_v63 = vadd.f32 %v903_v58, %v430_v9  ;;  %v399_v0 = vsel %vm299_vm0, %v269_v5, %v383_v11  ;;  %v400_v1 = vsel %vm299_vm0, %v912_v10, %v384_v17  ;;  %v386_v2 = vrot.slane %v925_v62, 7 }
  0x2d   : > { %486 = vst.msk [vmem:[%s933_s29] sm:$0xff] %vm469_vm1, %v445_v16  ;;  %v431_v3 = vmul.f32 0.25, %v399_v0  ;;  %v432_v7 = vmul.f32 0.25, %v400_v1  ;;  %v401_v8 = vsel %vm299_vm0, %v921_v61, %v385_v20  ;;  %v442_v13 = vmul.f32 0.75, %v925_v62 }
  0x2e   : > { %487 = vst.msk [vmem:[%s933_s29 + $0x8] sm:$0xff] %vm469_vm1, %v446_v63  ;;  %v433_v22 = vmul.f32 0.25, %v401_v8  ;;  %v402_v24 = vsel %vm299_vm0, %v925_v62, %v386_v2  ;;  %v266_v26 = vmul.f32 0.25, %v816_v43  ;;  %v405_v14 = vrot.slane %v267_v48, 1 }
  0x2f   : > { %v447_v28 = vadd.f32 %v439_v12, %v431_v3  ;;  %v448_v30 = vadd.f32 %v440_v21, %v432_v7  ;;  %v434_v15 = vmul.f32 0.25, %v402_v24  ;;  %v406_v31 = vrot.slane %v268_v50, 1 }
  0x30   : > { %v449_v34 = vadd.f32 %v939_v54, %v433_v22  ;;  %v273_v35 = vadd.f32 %v266_v26, %v828_v51  ;;  %v274_v36 = vadd.f32 %v266_v26, %v839_v55  ;;  %v421_v37 = vsel %vm324_vm2, %v405_v14, %v267_v48 }
  0x31   : > { %488 = vst.msk [vmem:[%s933_s29 + $0x10] sm:$0xff] %vm469_vm1, %v447_v28  ;;  %489 = vst.msk [vmem:[%s933_s29 + $0x18] sm:$0xff] %vm469_vm1, %v448_v30  ;;  %v450_v43 = vadd.f32 %v442_v13, %v434_v15  ;;  %v453_v38 = vmul.f32 0.25, %v421_v37  ;;  %v422_v39 = vsel %vm324_vm2, %v406_v31, %v268_v50  ;;  %v407_v18 = vrot.slane %v269_v5, 1 }
  0x32   : > { %490 = vst.msk [vmem:[%s933_s29 + $0x20] sm:$0xff] %vm469_vm1, %v449_v34  ;;  %v387_v19 = vrot.slane %v273_v35, 7  ;;  %v443_v40 = vmul.f32 0.75, %v273_v35  ;;  %v388_v23 = vrot.slane %v274_v36, 7  ;;  %v444_v41 = vmul.f32 0.75, %v274_v36 }
  0x33   : > { %491 = vst.msk [vmem:[%s933_s29 + $0x28] sm:$0xff] %vm469_vm1, %v450_v43  ;;  %v461_v51 = vadd.f32 %v453_v38, %v437_v56  ;;  %v454_v55 = vmul.f32 0.25, %v422_v39  ;;  %v423_v25 = vsel %vm324_vm2, %v407_v18, %v269_v5  ;;  %v408_v44 = vrot.slane %v912_v10, 1 }
  0x34   : > { %v403_v45 = vsel %vm299_vm0, %v273_v35, %v387_v19  ;;  %v404_v27 = vsel %vm299_vm0, %v274_v36, %v388_v23  ;;  %v455_v46 = vmul.f32 0.25, %v423_v25  ;;  %v409_v48 = vrot.slane %v921_v61, 1 }
  0x35   : > { %v435_v29 = vmul.f32 0.25, %v403_v45  ;;  %v436_v32 = vmul.f32 0.25, %v404_v27  ;;  %494 = vst.msk [vmem:[%s971_s6] sm:$0xff] %vm469_vm1, %v461_v51  ;;  %v462_v49 = vadd.f32 %v454_v55, %v903_v58  ;;  %v424_v50 = vsel %vm324_vm2, %v408_v44, %v912_v10 }
  0x36   : > { %v463_v33 = vadd.f32 %v455_v46, %v439_v12  ;;  %v456_v52 = vmul.f32 0.25, %v424_v50  ;;  %v425_v53 = vsel %vm324_vm2, %v409_v48, %v921_v61  ;;  %v410_v56 = vrot.slane %v925_v62, 1 }
  0x37   : > { %v451_v4 = vadd.f32 %v443_v40, %v435_v29  ;;  %v452_v6 = vadd.f32 %v444_v41, %v436_v32  ;;  %495 = vst.msk [vmem:[%s971_s6 + $0x8] sm:$0xff] %vm469_vm1, %v462_v49  ;;  %v457_v57 = vmul.f32 0.25, %v425_v53  ;;  %v411_v59 = vrot.slane %v273_v35, 1 }
  0x38   : > { %496 = vst.msk [vmem:[%s971_s6 + $0x10] sm:$0xff] %vm469_vm1, %v463_v33  ;;  %v464_v58 = vadd.f32 %v456_v52, %v440_v21  ;;  %v426_v60 = vsel %vm324_vm2, %v410_v56, %v925_v62  ;;  %v412_v5 = vrot.slane %v274_v36, 1 }
  0x39   : > { %492 = vst.msk [vmem:[%s933_s29 + $0x30] sm:$0xff] %vm469_vm1, %v451_v4  ;;  %493 = vst.msk [vmem:[%s933_s29 + $0x38] sm:$0xff] %vm469_vm1, %v452_v6  ;;  %v465_v10 = vadd.f32 %v457_v57, %v939_v54  ;;  %v458_v42 = vmul.f32 0.25, %v426_v60  ;;  %v427_v47 = vsel %vm324_vm2, %v411_v59, %v273_v35 }
  0x3a   : > { %497 = vst.msk [vmem:[%s971_s6 + $0x18] sm:$0xff] %vm469_vm1, %v464_v58  ;;  %v459_v61 = vmul.f32 0.25, %v427_v47  ;;  %v428_v9 = vsel %vm324_vm2, %v412_v5, %v274_v36 }
  0x3b   : > { %498 = vst.msk [vmem:[%s971_s6 + $0x20] sm:$0xff] %vm469_vm1, %v465_v10  ;;  %v466_v62 = vadd.f32 %v458_v42, %v442_v13  ;;  %v460_v11 = vmul.f32 0.25, %v428_v9 }
  0x3c   : > { %v467_v12 = vadd.f32 %v459_v61, %v443_v40 }
  0x3d   : > { %499 = vst.msk [vmem:[%s971_s6 + $0x28] sm:$0xff] %vm469_vm1, %v466_v62  ;;  %v468_v17 = vadd.f32 %v460_v11, %v444_v41 }
  0x3e   : > { %500 = vst.msk [vmem:[%s971_s6 + $0x30] sm:$0xff] %vm469_vm1, %v467_v12 }
  0x3f   : > { %501 = vst.msk [vmem:[%s971_s6 + $0x38] sm:$0xff] %vm469_vm1, %v468_v17 }
  0x40 PF: > { %s15_s15 = sadd.s32 1, %s692_s15  }
  0x41   : > { %p12_p4 = scmp.ge.s32.totalorder %s15_s15, 4  }
  0x43   :  { %14 = sbr.rel (!%p12_p4) target bundleno = 1 (0x1), region = 90 }

// kernel: dipnet_forward.45
= control target key start
LH: loop header
LB: loop body
LE: loop exit
PB: predicated region body
PF: predicated region fallthrough
CT: control target
= control target key end

     0   :  { %s749_s12 = smov 0   ;;  %s910_s0 = inlined_call_operand.vmem [shape: bf16[512,8], index: 0, kind: input, shape index: {}]   ;;  %s911_s1 = inlined_call_operand.vmem [shape: bf16[8,3], index: 1, kind: input, shape index: {}]   ;;  %s912_s2 = inlined_call_operand.vmem [shape: f32[1,3], index: 2, kind: input, shape index: {}]   ;;  %s913_s3 = inlined_call_operand.vmem [shape: f32[512,3], index: 3, kind: output, shape index: {}]  }
   0x1 LB: > { %s598_s13 = sadd.s32 4294967295, %s727_s12   ;;  %p602_p0 = scmp.ge.s32.totalorder %s727_s12, 1  ;;  %s727_s12 = sphi %s749_s12, %s13_s12  }
   0x2   : > { %p138_p1 = scmp.lt.s32.totalorder %s727_s12, 3 }
   0x4   : > { %p139_p2 = pnand %p602_p0, %p138_p1 }
   0x5   : > { %s603_s16 = sshll.u32 (!%p139_p2), %s598_s13, 5 }
   0x6   : > { %142 = sbr.rel (%p139_p2) target bundleno = 243 (0xf3), region = 32  ;;  %p163_p3 = scmp.lt.s32.totalorder (!%p139_p2), %s603_s16, 63 }
   0xb   : > { %v207_v0 = vld [vmem:[%s911_s1] sm:$0xf]  ;;  %vm344_vm0 = vcmask 1043456   ;;  %s915_s16 = smov (!%p163_p3, %s603_s16), 63  ;;  %vm295_vm1 = vcmask 64512   ;;  %vm509_vm2 = vcmask 23552  }
   0xc   : > { %695 = vmatprep.subr.msk.bf16.mxu0 %vm344_vm0, %v207_v0  ;;  %696 = vmatprep.subr.msk.bf16.mxu1 %vm344_vm0, %v207_v0  ;;  %v346_v1 = vsel %vm344_vm0, %v207_v0, 0  ;;  %s604_s17 = sshll.u32 %s915_s16, 2  ;;  %s606_s21 = sshll.u32 %s915_s16, 3  ;;  %v804_v18 = vld [vmem:[%s912_s2] ss:$0 sm:$0xff] }
   0xd   : > { %660 = vmatpush3.bf16.msra.mxu0 %v346_v1  ;;  %694 = vmatpush3.bf16.msra.mxu1 %v346_v1  ;;  %s766_s20 = scalar_lea.vmem %s910_s0, %s604_s17  ;;  %s809_s26 = scalar_lea.vmem %s913_s3, %s606_s21 }
   0xe   : > { %v705_v2 = vld [vmem:[%s766_s20] sm:$0xff]   ;;  %v707_v4 = vld [vmem:[%s766_s20 + $0x8] sm:$0xff]   ;;  %v709_v6 = vld [vmem:[%s766_s20 + $0x10] sm:$0xff]  }
   0xf   : > { %v706_v3 = vld [vmem:[%s766_s20 + $0x40] sm:$0xff]   ;;  %661 = vmatprep.mubr.msk.bf16.mxu0 %vm295_vm1, %v705_v2  ;;  %v708_v5 = vld [vmem:[%s766_s20 + $0x48] sm:$0xff]   ;;  %v710_v7 = vld [vmem:[%s766_s20 + $0x50] sm:$0xff]  }
  0x10   : > { %677 = vmatprep.mubr.msk.bf16.mxu1 %vm295_vm1, %v706_v3  ;;  %662 = vmatmul.mubr.msk.bf16.vlgmr.msra.gmra.mxu0 %vm295_vm1, %v707_v4  ;;  %v711_v8 = vld [vmem:[%s766_s20 + $0x18] sm:$0xff]   ;;  %v713_v10 = vld [vmem:[%s766_s20 + $0x20] sm:$0xff]   ;;  %v715_v12 = vld [vmem:[%s766_s20 + $0x28] sm:$0xff]  }
  0x11   : > { %678 = vmatmul.mubr.msk.bf16.vlgmr.msra.gmra.mxu1 %vm295_vm1, %v708_v5  ;;  %665 = vmatprep.mubr.msk.bf16.mxu0 %vm295_vm1, %v709_v6  ;;  %v712_v9 = vld [vmem:[%s766_s20 + $0x58] sm:$0xff]   ;;  %v714_v11 = vld [vmem:[%s766_s20 + $0x60] sm:$0xff]   ;;  %v716_v13 = vld [vmem:[%s766_s20 + $0x68] sm:$0xff]  }
  0x12   : > { %681 = vmatprep.mubr.msk.bf16.mxu1 %vm295_vm1, %v710_v7  ;;  %v717_v14 = vld [vmem:[%s766_s20 + $0x30] sm:$0xff]   ;;  %v719_v16 = vld [vmem:[%s766_s20 + $0x38] sm:$0xff]  }
  0x13   : > { %v718_v15 = vld [vmem:[%s766_s20 + $0x70] sm:$0xff]   ;;  %v720_v17 = vld [vmem:[%s766_s20 + $0x78] sm:$0xff]  }
  0x18   : > { %666 = vmatmul.mubr.msk.bf16.gmra.mxu0 %vm295_vm1, %v711_v8 }
  0x19   : > { %682 = vmatmul.mubr.msk.bf16.gmra.mxu1 %vm295_vm1, %v712_v9  ;;  %669 = vmatprep.mubr.msk.bf16.mxu0 %vm295_vm1, %v713_v10 }
  0x1a   : > { %685 = vmatprep.mubr.msk.bf16.mxu1 %vm295_vm1, %v714_v11 }
  0x20   : > { %670 = vmatmul.mubr.msk.bf16.gmra.mxu0 %vm295_vm1, %v715_v12 }
  0x21   : > { %686 = vmatmul.mubr.msk.bf16.gmra.mxu1 %vm295_vm1, %v716_v13  ;;  %673 = vmatprep.mubr.msk.bf16.mxu0 %vm295_vm1, %v717_v14 }
  0x22   : > { %689 = vmatprep.mubr.msk.bf16.mxu1 %vm295_vm1, %v718_v15 }
  0x28   : > { %674 = vmatmul.mubr.msk.bf16.gmra.mxu0 %vm295_vm1, %v719_v16 }
  0x29   : > { %690 = vmatmul.mubr.msk.bf16.gmra.mxu1 %vm295_vm1, %v720_v17 }
  0xd0   : > { %v663_v19 = vpop.f32.mrf.mxu0 }
  0xd1   : > { %v391_v20 = vadd.f32 %v663_v19, %v804_v18  ;;  %v679_v21 = vpop.f32.mrf.mxu1 }
  0xd2   : > { %v455_v22 = vadd.f32 %v679_v21, %v804_v18  ;;  %v382_v23 = vpop.f32.mrf.mxu0 }
  0xd3   : > { %512 = vst.msk [vmem:[%s809_s26 + $0x10] sm:$0xff] %vm509_vm2, %v391_v20  ;;  %v383_v24 = vadd.f32 %v804_v18, %v382_v23  ;;  %v446_v25 = vpop.f32.mrf.mxu1 }
  0xd4   : > { %528 = vst.msk [vmem:[%s809_s26 + $0x90] sm:$0xff] %vm509_vm2, %v455_v22  ;;  %v447_v26 = vadd.f32 %v804_v18, %v446_v25  ;;  %v664_v27 = vpop.f32.mrf.mxu0 }
  0xd5   : > { %510 = vst.msk [vmem:[%s809_s26] sm:$0xff] %vm509_vm2, %v383_v24  ;;  %v394_v28 = vadd.f32 %v664_v27, %v804_v18  ;;  %v680_v29 = vpop.f32.mrf.mxu1 }
  0xd6   : > { %526 = vst.msk [vmem:[%s809_s26 + $0x80] sm:$0xff] %vm509_vm2, %v447_v26  ;;  %v458_v30 = vadd.f32 %v680_v29, %v804_v18  ;;  %v385_v31 = vpop.f32.mrf.mxu0 }
  0xd7   : > { %513 = vst.msk [vmem:[%s809_s26 + $0x18] sm:$0xff] %vm509_vm2, %v394_v28  ;;  %v386_v32 = vadd.f32 %v804_v18, %v385_v31  ;;  %v449_v33 = vpop.f32.mrf.mxu1 }
  0xd8   : > { %529 = vst.msk [vmem:[%s809_s26 + $0x98] sm:$0xff] %vm509_vm2, %v458_v30  ;;  %v450_v34 = vadd.f32 %v804_v18, %v449_v33  ;;  %v667_v35 = vpop.f32.mrf.mxu0 }
  0xd9   : > { %511 = vst.msk [vmem:[%s809_s26 + $0x8] sm:$0xff] %vm509_vm2, %v386_v32  ;;  %v407_v36 = vadd.f32 %v667_v35, %v804_v18  ;;  %v683_v37 = vpop.f32.mrf.mxu1 }
  0xda   : > { %527 = vst.msk [vmem:[%s809_s26 + $0x88] sm:$0xff] %vm509_vm2, %v450_v34  ;;  %v471_v38 = vadd.f32 %v683_v37, %v804_v18  ;;  %v398_v39 = vpop.f32.mrf.mxu0 }
  0xdb   : > { %516 = vst.msk [vmem:[%s809_s26 + $0x30] sm:$0xff] %vm509_vm2, %v407_v36  ;;  %v399_v40 = vadd.f32 %v804_v18, %v398_v39  ;;  %v462_v41 = vpop.f32.mrf.mxu1 }
  0xdc   : > { %532 = vst.msk [vmem:[%s809_s26 + $0xb0] sm:$0xff] %vm509_vm2, %v471_v38  ;;  %v463_v42 = vadd.f32 %v804_v18, %v462_v41  ;;  %v668_v43 = vpop.f32.mrf.mxu0 }
  0xdd   : > { %514 = vst.msk [vmem:[%s809_s26 + $0x20] sm:$0xff] %vm509_vm2, %v399_v40  ;;  %v410_v44 = vadd.f32 %v668_v43, %v804_v18  ;;  %v684_v45 = vpop.f32.mrf.mxu1 }
  0xde   : > { %530 = vst.msk [vmem:[%s809_s26 + $0xa0] sm:$0xff] %vm509_vm2, %v463_v42  ;;  %v474_v46 = vadd.f32 %v684_v45, %v804_v18  ;;  %v401_v47 = vpop.f32.mrf.mxu0 }
  0xdf   : > { %517 = vst.msk [vmem:[%s809_s26 + $0x38] sm:$0xff] %vm509_vm2, %v410_v44  ;;  %v402_v48 = vadd.f32 %v804_v18, %v401_v47  ;;  %v465_v49 = vpop.f32.mrf.mxu1 }
  0xe0   : > { %533 = vst.msk [vmem:[%s809_s26 + $0xb8] sm:$0xff] %vm509_vm2, %v474_v46  ;;  %v466_v50 = vadd.f32 %v804_v18, %v465_v49  ;;  %v671_v51 = vpop.f32.mrf.mxu0 }
  0xe1   : > { %515 = vst.msk [vmem:[%s809_s26 + $0x28] sm:$0xff] %vm509_vm2, %v402_v48  ;;  %v423_v52 = vadd.f32 %v671_v51, %v804_v18  ;;  %v687_v53 = vpop.f32.mrf.mxu1 }
  0xe2   : > { %531 = vst.msk [vmem:[%s809_s26 + $0xa8] sm:$0xff] %vm509_vm2, %v466_v50  ;;  %v487_v54 = vadd.f32 %v687_v53, %v804_v18  ;;  %v414_v55 = vpop.f32.mrf.mxu0 }
  0xe3   : > { %520 = vst.msk [vmem:[%s809_s26 + $0x50] sm:$0xff] %vm509_vm2, %v423_v52  ;;  %v415_v56 = vadd.f32 %v804_v18, %v414_v55  ;;  %v478_v57 = vpop.f32.mrf.mxu1 }
  0xe4   : > { %536 = vst.msk [vmem:[%s809_s26 + $0xd0] sm:$0xff] %vm509_vm2, %v487_v54  ;;  %v479_v58 = vadd.f32 %v804_v18, %v478_v57  ;;  %v672_v59 = vpop.f32.mrf.mxu0 }
  0xe5   : > { %518 = vst.msk [vmem:[%s809_s26 + $0x40] sm:$0xff] %vm509_vm2, %v415_v56  ;;  %v426_v60 = vadd.f32 %v672_v59, %v804_v18  ;;  %v688_v61 = vpop.f32.mrf.mxu1 }
  0xe6   : > { %534 = vst.msk [vmem:[%s809_s26 + $0xc0] sm:$0xff] %vm509_vm2, %v479_v58  ;;  %v490_v62 = vadd.f32 %v688_v61, %v804_v18  ;;  %v417_v63 = vpop.f32.mrf.mxu0 }
  0xe7   : > { %521 = vst.msk [vmem:[%s809_s26 + $0x58] sm:$0xff] %vm509_vm2, %v426_v60  ;;  %v418_v0 = vadd.f32 %v804_v18, %v417_v63  ;;  %v481_v1 = vpop.f32.mrf.mxu1 }
  0xe8   : > { %537 = vst.msk [vmem:[%s809_s26 + $0xd8] sm:$0xff] %vm509_vm2, %v490_v62  ;;  %v482_v2 = vadd.f32 %v804_v18, %v481_v1  ;;  %v675_v3 = vpop.f32.mrf.mxu0 }
  0xe9   : > { %519 = vst.msk [vmem:[%s809_s26 + $0x48] sm:$0xff] %vm509_vm2, %v418_v0  ;;  %v439_v4 = vadd.f32 %v675_v3, %v804_v18  ;;  %v691_v5 = vpop.f32.mrf.mxu1 }
  0xea   : > { %535 = vst.msk [vmem:[%s809_s26 + $0xc8] sm:$0xff] %vm509_vm2, %v482_v2  ;;  %v503_v6 = vadd.f32 %v691_v5, %v804_v18  ;;  %v430_v7 = vpop.f32.mrf.mxu0 }
  0xeb   : > { %524 = vst.msk [vmem:[%s809_s26 + $0x70] sm:$0xff] %vm509_vm2, %v439_v4  ;;  %v431_v8 = vadd.f32 %v804_v18, %v430_v7  ;;  %v494_v9 = vpop.f32.mrf.mxu1 }
  0xec   : > { %540 = vst.msk [vmem:[%s809_s26 + $0xf0] sm:$0xff] %vm509_vm2, %v503_v6  ;;  %v495_v10 = vadd.f32 %v804_v18, %v494_v9  ;;  %v676_v11 = vpop.f32.mrf.mxu0 }
  0xed   : > { %522 = vst.msk [vmem:[%s809_s26 + $0x60] sm:$0xff] %vm509_vm2, %v431_v8  ;;  %v442_v12 = vadd.f32 %v676_v11, %v804_v18  ;;  %v692_v13 = vpop.f32.mrf.mxu1 }
  0xee   : > { %538 = vst.msk [vmem:[%s809_s26 + $0xe0] sm:$0xff] %vm509_vm2, %v495_v10  ;;  %v506_v14 = vadd.f32 %v692_v13, %v804_v18  ;;  %v433_v15 = vpop.f32.mrf.mxu0 }
  0xef   : > { %525 = vst.msk [vmem:[%s809_s26 + $0x78] sm:$0xff] %vm509_vm2, %v442_v12  ;;  %v434_v16 = vadd.f32 %v804_v18, %v433_v15  ;;  %v497_v17 = vpop.f32.mrf.mxu1 }
  0xf0   : > { %541 = vst.msk [vmem:[%s809_s26 + $0xf8] sm:$0xff] %vm509_vm2, %v506_v14  ;;  %v498_v19 = vadd.f32 %v804_v18, %v497_v17 }
  0xf1   : > { %523 = vst.msk [vmem:[%s809_s26 + $0x68] sm:$0xff] %vm509_vm2, %v434_v16 }
  0xf2   : > { %539 = vst.msk [vmem:[%s809_s26 + $0xe8] sm:$0xff] %vm509_vm2, %v498_v19 }
  0xf3 PF: > { %s13_s12 = sadd.s32 1, %s727_s12  }
  0xf4   : > { %p10_p4 = scmp.ge.s32.totalorder %s13_s12, 4  }
  0xf6   :  { %12 = sbr.rel (!%p10_p4) target bundleno = 1 (0x1), region = 62 }

</bundles_post_ra>
